<compile_context>
chip_gen: v7x
topology: tpu7x:2x2x1
jax: 0.10.0
libtpu: 0.0.40
codegen_flags: <defaults>
</compile_context>

<pallas_src>
import jax
import jax.numpy as jnp
from jax import lax
from jax.experimental import pallas as pl
from jax.experimental.pallas import tpu as pltpu

BN_EPS = 1e-5
LANE = 128


# ------------------------------ small helpers -------------------------------

def _round_up(x, m):
    return (x + m - 1) // m * m


def _bn_fold(gamma, beta, mean, var):
    scale = gamma / jnp.sqrt(var + BN_EPS)
    shift = beta - mean * scale
    return scale, shift


def _dense_grouped_pointwise(w_oihw, groups):
    """Embed a grouped 1x1 conv weight (Cout, Cin/g, 1, 1) into a dense
    block-diagonal (Cin, Cout) matrix (channel counts here are tiny)."""
    cout, cin_g = w_oihw.shape[0], w_oihw.shape[1]
    cin = cin_g * groups
    cout_g = cout // groups
    w = jnp.zeros((cin, cout), jnp.float32)
    for g in range(groups):
        blk = w_oihw[g * cout_g:(g + 1) * cout_g, :, 0, 0]          # (cout_g, cin_g)
        w = w.at[g * cin_g:(g + 1) * cin_g, g * cout_g:(g + 1) * cout_g].set(blk.T)
    return w


def _shuffle_perm(channels, groups):
    j = jnp.arange(channels)
    return (j % groups) * (channels // groups) + j // groups


# ------------------------------- fused kernel --------------------------------

def _make_kernel(*, Bt, mpad, JR, tap_off, res_off, Cp, Bp, Np, mxu_dtype, has_branch):
    """All ref accesses below are static Python slices (no strided / dynamic
    indexing), so the kernel lowers cleanly in both Mosaic and interpret mode."""

    def kernel(x_ref, w1_ref, b1_ref, wdw_ref, b2_ref, w3_ref, b3_ref, *rest):
        if has_branch:
            br_ref, out_ref, y_sc = rest
        else:
            out_ref, y_sc = rest
        f32 = jnp.float32

        # ---- conv1: grouped 1x1 (+ folded channel shuffle + BN1) + masked ReLU.
        # The last input channel carries the "inside the image" mask, which zeroes
        # the conv1 output on the spatial zero-padding halo.
        mask = x_ref[:, Cp - 1:Cp]                                  # (Bt*mpad, 1)
        xin = x_ref[...].astype(mxu_dtype)
        y = jnp.dot(xin, w1_ref[...], preferred_element_type=f32)   # (Bt*mpad, Bp)
        y = jnp.maximum(y + b1_ref[...], 0.0) * mask
        y_sc[...] = y

        # small operands loaded once per grid step
        wdw = wdw_ref[...]                                          # (k*k, Bp)
        b2 = b2_ref[...]                                            # (1, Bp)
        w3 = w3_ref[...]                                            # (Bp, Np)
        b3 = b3_ref[...]                                            # (1, Np)

        for b in range(Bt):                                         # Bt is small/static
            base = b * mpad
            o0 = b * JR

            # ---- depthwise kxk (+ folded BN2): every tap is a contiguous slice.
            acc = jnp.zeros((JR, Bp), f32)
            for t, off in enumerate(tap_off):
                acc = acc + y_sc[base + off:base + off + JR, :] * wdw[t:t + 1, :]
            z = (acc + b2).astype(mxu_dtype)

            # ---- conv3: grouped 1x1 (+ bias and BN3 folded)
            main = jnp.dot(z, w3, preferred_element_type=f32) + b3  # (JR, Np)

            if not has_branch:
                # residual add + ReLU; residual sliced straight from the input slab
                res = x_ref[base + res_off:base + res_off + JR, :Np]
                out_ref[o0:o0 + JR, :] = jnp.maximum(main + res, 0.0)
            else:
                out_ref[o0:o0 + JR, :] = jnp.maximum(main, 0.0)
                # fused AvgPool2d(3, 2, 1) branch: same taps, same layout, contiguous
                accb = jnp.zeros((JR, Cp), f32)
                for off in tap_off:
                    accb = accb + x_ref[base + off:base + off + JR, :]
                br_ref[o0:o0 + JR, :] = accb * (1.0 / 9.0)

    return kernel


# --------------------------- ShuffleUnit forward ------------------------------

def shuffle_unit_pallas(x_nchw, raw, cfg, *, use_bf16=True, batch_tile=None):
    group, stride, k = cfg["group"], cfg["stride"], cfg["kernel"]
    first_group = cfg["first_group"]
    pad = k // 2
    g1 = 1 if first_group else group
    assert stride in (1, 2)
    if stride == 2:
        assert k == 3, "stride-2 ShuffleUnit requires kernel=3 (shared avg-pool halo)"

    n, cin, h, w = x_nchw.shape
    hout = (h + 2 * pad - k) // stride + 1
    wout = (w + 2 * pad - k) // stride + 1
    hp = _round_up(h + 2 * pad, stride)          # padded spatial dims, stride-aligned
    wp = _round_up(w + 2 * pad, stride)
    hc, wc = hp // stride, wp // stride
    q = wc                                        # accumulator row stride (== wp for s=1)
    jr = _round_up(hout * q, 8)                   # output rows per image (incl. garbage cols)

    # static tap offsets into one image's slab (contiguous slices in both cases)
    if stride == 1:
        tap_off = [kh * wp + kw for kh in range(k) for kw in range(k)]
    else:  # parity-block layout: blk = (row parity, col parity)
        tap_off = [((kh % 2) * 2 + (kw % 2)) * (hc * wc) + (kh // 2) * wc + (kw // 2)
                   for kh in range(k) for kw in range(k)]
    res_off = pad * wp + pad
    need = max([hp * wp] + [o + jr for o in tap_off]
               + ([res_off + jr] if stride == 1 else []))
    mpad = _round_up(need, 8)                     # per-image slab rows (zero slack)

    # ---- fold parameters at trace time (tiny) ----
    s1v, b1v = _bn_fold(*raw["bn1"])
    w1 = _dense_grouped_pointwise(raw["conv1_w"], g1) * s1v[None, :]
    b1 = b1v
    bneck = w1.shape[1]
    if group > 1:                                 # fold channel shuffle into conv1 cols
        perm = _shuffle_perm(bneck, group)
        w1 = w1[:, perm]
        b1 = b1[perm]

    s2v, b2v = _bn_fold(*raw["bn2"])
    wdw = jnp.transpose(raw["dw_w"][:, 0], (1, 2, 0)).reshape(k * k, bneck) * s2v[None, :]

    g3, be3, m3, v3 = raw["bn3"]
    s3v = g3 / jnp.sqrt(v3 + BN_EPS)
    w3 = _dense_grouped_pointwise(raw["conv3_w"], group) * s3v[None, :]
    b3 = be3 + (raw["conv3_b"] - m3) * s3v
    couts = w3.shape[1]
    if stride == 1:
        assert couts == cin

    # ---- lane padding: channels -> full 128-lane occupancy ----
    Cp = _round_up(cin + 1, LANE)                 # +1: last channel = valid mask
    Bp = _round_up(bneck, LANE)
    Np = _round_up(couts, LANE)
    mxu_dtype = jnp.bfloat16 if use_bf16 else jnp.float32

    w1p = jnp.zeros((Cp, Bp), jnp.float32).at[:cin, :bneck].set(w1).astype(mxu_dtype)
    b1p = jnp.zeros((1, Bp), jnp.float32).at[0, :bneck].set(b1)
    wdwp = jnp.zeros((k * k, Bp), jnp.float32).at[:, :bneck].set(wdw)
    b2p = jnp.zeros((1, Bp), jnp.float32).at[0, :bneck].set(b2v)
    w3p = jnp.zeros((Bp, Np), jnp.float32).at[:bneck, :couts].set(w3).astype(mxu_dtype)
    b3p = jnp.zeros((1, Np), jnp.float32).at[0, :couts].set(b3)

    # ---- input: NCHW -> zero-padded NHWC (+mask channel) -> flat per-image slab ----
    xf = x_nchw.astype(jnp.float32)
    xpad = jnp.pad(xf, ((0, 0), (0, 0), (pad, hp - h - pad), (pad, wp - w - pad)))
    nhwc = jnp.transpose(xpad, (0, 2, 3, 1))                             # (n, hp, wp, cin)
    maskimg = jnp.pad(jnp.ones((n, h, w, 1), jnp.float32),
                      ((0, 0), (pad, hp - h - pad), (pad, wp - w - pad), (0, 0)))
    img = jnp.concatenate(
        [nhwc, jnp.zeros((n, hp, wp, Cp - cin - 1), jnp.float32), maskimg], axis=-1)
    if stride == 1:
        flat = img.reshape(n, hp * wp, Cp)
    else:
        t = img.reshape(n, hc, 2, wc, 2, Cp)
        t = jnp.transpose(t, (0, 2, 4, 1, 3, 5))                         # (n, pr, pc, hc, wc, C)
        flat = t.reshape(n, 4 * hc * wc, Cp)
    flat = jnp.pad(flat, ((0, 0), (0, mpad - flat.shape[1]), (0, 0)))
    xslab = flat.reshape(n * mpad, Cp)

    # ---- grid / batch tile (keep >=2 grid steps for dual-TC chips when possible) ----
    if batch_tile is None:
        batch_tile = 2 if (n % 2 == 0 and n >= 4) else 1
    bt = batch_tile
    assert n % bt == 0
    grid = (n // bt,)

    kernel = _make_kernel(Bt=bt, mpad=mpad, JR=jr, tap_off=tap_off, res_off=res_off,
                          Cp=Cp, Bp=Bp, Np=Np, mxu_dtype=mxu_dtype,
                          has_branch=(stride == 2))

    main_shape = jax.ShapeDtypeStruct((n * jr, Np), jnp.float32)
    if stride == 2:
        out_shape = (jax.ShapeDtypeStruct((n * jr, Cp), jnp.float32), main_shape)
        out_specs = (pl.BlockSpec((bt * jr, Cp), lambda i: (i, 0)),
                     pl.BlockSpec((bt * jr, Np), lambda i: (i, 0)))
    else:
        out_shape = main_shape
        out_specs = pl.BlockSpec((bt * jr, Np), lambda i: (i, 0))

    in_specs = [
        pl.BlockSpec((bt * mpad, Cp), lambda i: (i, 0)),
        pl.BlockSpec((Cp, Bp), lambda i: (0, 0)),
        pl.BlockSpec((1, Bp), lambda i: (0, 0)),
        pl.BlockSpec((k * k, Bp), lambda i: (0, 0)),
        pl.BlockSpec((1, Bp), lambda i: (0, 0)),
        pl.BlockSpec((Bp, Np), lambda i: (0, 0)),
        pl.BlockSpec((1, Np), lambda i: (0, 0)),
    ]

    # rough VMEM budget: double-buffered blocks + scratch, with headroom (capped)
    esz = jnp.dtype(mxu_dtype).itemsize
    blk = (bt * mpad * Cp * 4 + Cp * Bp * esz + Bp * Np * esz + (k * k + 3) * Bp * 4) * 2
    outb = (bt * jr * Np * 4 + (bt * jr * Cp * 4 if stride == 2 else 0)) * 2
    scr = bt * mpad * Bp * 4
    vmem_limit = int(min(max(4 * (blk + outb + scr), 16 << 20), 32 << 20))

    flops_img = 2 * mpad * Cp * Bp + 2 * k * k * jr * Bp + 2 * jr * Bp * Np \
        + (k * k * jr * Cp if stride == 2 else 2 * jr * Np)
    cost = pl.CostEstimate(
        flops=int(n * flops_img),
        transcendentals=0,
        bytes_accessed=int(xslab.size * 4 + n * jr * (Np + (Cp if stride == 2 else 0)) * 4
                           + (Cp * Bp + Bp * Np) * esz + (k * k + 3) * Bp * 4))

    outs = pl.pallas_call(
        kernel,
        out_shape=out_shape,
        grid=grid,
        in_specs=in_specs,
        out_specs=out_specs,
        scratch_shapes=[pltpu.VMEM((bt * mpad, Bp), jnp.float32)],
        compiler_params=pltpu.CompilerParams(
            dimension_semantics=("parallel",),
            vmem_limit_bytes=vmem_limit),
        cost_estimate=cost,
    )(xslab, w1p, b1p, wdwp, b2p, w3p, b3p)

    # wrapper-side compaction: drop garbage rows/cols and padded lanes (free slice)
    def unpack(flat_out, nch):
        o = flat_out.reshape(n, jr, flat_out.shape[-1])[:, :hout * q]
        o = o.reshape(n, hout, q, flat_out.shape[-1])[:, :, :wout, :nch]
        return jnp.transpose(o, (0, 3, 1, 2))

    if stride == 1:
        return unpack(outs, cin)
    branch, main = outs
    return jnp.concatenate([unpack(branch, cin), unpack(main, couts)], axis=1)


# ------------------------- deterministic parameters --------------------------

def init_raw_params(key, cfg):
    inc, outc = cfg["inchannels"], cfg["outchannels"]
    bneck, k, group = cfg["bottleneck"], cfg["kernel"], cfg["group"]
    stride, first_group = cfg["stride"], cfg["first_group"]
    g1 = 1 if first_group else group
    couts = outc - inc if stride == 2 else outc

    ks = jax.random.split(key, 16)

    def bn(k0, k1, k2, k3, c):
        return (jax.random.uniform(k0, (c,), jnp.float32, 0.5, 1.5),   # gamma
                0.1 * jax.random.normal(k1, (c,), jnp.float32),        # beta
                0.1 * jax.random.normal(k2, (c,), jnp.float32),        # running_mean
                jax.random.uniform(k3, (c,), jnp.float32, 0.5, 1.5))   # running_var

    return {
        "conv1_w": 0.3 * jax.random.normal(ks[0], (bneck, inc // g1, 1, 1), jnp.float32),
        "bn1": bn(ks[1], ks[2], ks[3], ks[4], bneck),
        "dw_w": 0.3 * jax.random.normal(ks[5], (bneck, 1, k, k), jnp.float32),
        "bn2": bn(ks[6], ks[7], ks[8], ks[9], bneck),
        "conv3_w": 0.3 * jax.random.normal(ks[10], (couts, bneck // group, 1, 1), jnp.float32),
        "conv3_b": 0.1 * jax.random.normal(ks[11], (couts,), jnp.float32),
        "bn3": bn(ks[12], ks[13], ks[14], ks[15], couts),
    }


# ------------------------------ pure-JAX reference ---------------------------

def shuffle_unit_ref(x, raw, cfg):
    group, stride, k = cfg["group"], cfg["stride"], cfg["kernel"]
    first_group = cfg["first_group"]
    pad = k // 2
    g1 = 1 if first_group else group

    def conv(x, w, stride=1, pad=0, groups=1, bias=None):
        y = lax.conv_general_dilated(
            x, w, (stride, stride), [(pad, pad), (pad, pad)],
            feature_group_count=groups,
            dimension_numbers=("NCHW", "OIHW", "NCHW"),
            precision=lax.Precision.HIGHEST)
        if bias is not None:
            y = y + bias[None, :, None, None]
        return y

    def bn(x, p):
        g, b, m, v = p
        inv = g / jnp.sqrt(v + BN_EPS)
        return (x - m[None, :, None, None]) * inv[None, :, None, None] + b[None, :, None, None]

    residual = x
    y = jax.nn.relu(bn(conv(x, raw["conv1_w"], groups=g1), raw["bn1"]))
    if group > 1:
        n, c, h, w = y.shape
        cpg = c // group
        y = y.reshape(n, group, cpg, h, w).transpose(0, 2, 1, 3, 4).reshape(n, c, h, w)
    y = bn(conv(y, raw["dw_w"], stride=stride, pad=pad, groups=y.shape[1]), raw["bn2"])
    y = bn(conv(y, raw["conv3_w"], groups=group, bias=raw["conv3_b"]), raw["bn3"])
    if stride == 1:
        return jax.nn.relu(residual + y)
    branch = lax.reduce_window(residual, 0.0, lax.add, (1, 1, 3, 3), (1, 1, 2, 2),
                               [(0, 0), (0, 0), (1, 1), (1, 1)]) / 9.0
    return jnp.concatenate([branch, jax.nn.relu(y)], axis=1)


# ------------------------------------ main -----------------------------------

if __name__ == "__main__":
    key = jax.random.PRNGKey(0)
    kx, kp1, kp2, kx4 = jax.random.split(key, 4)
    x = jax.random.normal(kx, (2, 4, 16, 16), jnp.float32)

    # stride=1 unit (residual add path); inchannels == outchannels
    cfg1 = dict(inchannels=4, outchannels=4, kernel=3, stride=1,
                bottleneck=4, first_group=False, group=2)
    raw1 = init_raw_params(kp1, cfg1)
    ref1 = shuffle_unit_ref(x, raw1, cfg1)

    out1 = jax.block_until_ready(shuffle_unit_pallas(x, raw1, cfg1))      # bf16 MXU ops
    assert out1.shape == (2, 4, 16, 16)
    assert bool(jnp.allclose(out1, ref1, atol=5e-2, rtol=5e-2))

    out1f = jax.block_until_ready(shuffle_unit_pallas(x, raw1, cfg1, use_bf16=False))
    assert bool(jnp.allclose(out1f, ref1, atol=2e-3, rtol=2e-3))

    # stride=2 unit (fused avg-pool branch + channel concat path)
    cfg2 = dict(inchannels=4, outchannels=12, kernel=3, stride=2,
                bottleneck=4, first_group=False, group=2)
    raw2 = init_raw_params(kp2, cfg2)
    ref2 = shuffle_unit_ref(x, raw2, cfg2)

    out2 = jax.block_until_ready(shuffle_unit_pallas(x, raw2, cfg2))
    assert out2.shape == (2, 12, 8, 8)
    assert bool(jnp.allclose(out2, ref2, atol=5e-2, rtol=5e-2))

    out2f = jax.block_until_ready(shuffle_unit_pallas(x, raw2, cfg2, use_bf16=False))
    assert bool(jnp.allclose(out2f, ref2, atol=2e-3, rtol=2e-3))

    # batch-tile > 1 path (2 images per grid step, grid still length 2)
    x4 = jax.random.normal(kx4, (4, 4, 16, 16), jnp.float32)
    out4 = jax.block_until_ready(shuffle_unit_pallas(x4, raw1, cfg1))     # auto bt=2
    ref4 = shuffle_unit_ref(x4, raw1, cfg1)
    assert bool(jnp.allclose(out4, ref4, atol=5e-2, rtol=5e-2))

    print("KERNEL_OK")
</pallas_src>

<mosaic_0001>
module attributes {stable_mosaic.version = 11 : i64} {
  func.func @kernel(%arg0: i32, %arg1: memref<328x128xf32, #tpu.memory_space<vmem>>, %arg2: memref<128x128xbf16, #tpu.memory_space<vmem>>, %arg3: memref<1x128xf32, #tpu.memory_space<vmem>>, %arg4: memref<9x128xf32, #tpu.memory_space<vmem>>, %arg5: memref<1x128xf32, #tpu.memory_space<vmem>>, %arg6: memref<128x128xbf16, #tpu.memory_space<vmem>>, %arg7: memref<1x128xf32, #tpu.memory_space<vmem>>, %arg8: memref<288x128xf32, #tpu.memory_space<vmem>>, %arg9: memref<328x128xf32, #tpu.memory_space<vmem>>) attributes {dimension_semantics = [#tpu.dimension_semantics<parallel>], iteration_bounds = array<i64: 2>, scalar_prefetch = 0 : i64, scratch_operands = 1 : i64, tpu.core_type = #tpu.core_type<tc>, window_params = [{transform_indices = @transform_0, window_bounds = array<i64: 328, 128>}, {pipeline_mode = #tpu.pipeline_mode<synchronous>, transform_indices = @transform_1, window_bounds = array<i64: 128, 128>}, {pipeline_mode = #tpu.pipeline_mode<synchronous>, transform_indices = @transform_2, window_bounds = array<i64: 1, 128>}, {pipeline_mode = #tpu.pipeline_mode<synchronous>, transform_indices = @transform_3, window_bounds = array<i64: 9, 128>}, {pipeline_mode = #tpu.pipeline_mode<synchronous>, transform_indices = @transform_4, window_bounds = array<i64: 1, 128>}, {pipeline_mode = #tpu.pipeline_mode<synchronous>, transform_indices = @transform_5, window_bounds = array<i64: 128, 128>}, {pipeline_mode = #tpu.pipeline_mode<synchronous>, transform_indices = @transform_6, window_bounds = array<i64: 1, 128>}, {transform_indices = @transform_7, window_bounds = array<i64: 288, 128>}]} {
    %c0 = arith.constant 0 : index
    %c127 = arith.constant 127 : index
    %0 = vector.load %arg1[%c0, %c127] : memref<328x128xf32, #tpu.memory_space<vmem>>, vector<328x1xf32>
    %c0_0 = arith.constant 0 : index
    %c0_1 = arith.constant 0 : index
    %1 = vector.load %arg1[%c0_0, %c0_1] : memref<328x128xf32, #tpu.memory_space<vmem>>, vector<328x128xf32>
    %2 = arith.truncf %1 : vector<328x128xf32> to vector<328x128xbf16>
    %c0_2 = arith.constant 0 : index
    %c0_3 = arith.constant 0 : index
    %3 = vector.load %arg2[%c0_2, %c0_3] : memref<128x128xbf16, #tpu.memory_space<vmem>>, vector<128x128xbf16>
    %cst = arith.constant dense<0.000000e+00> : vector<328x128xf32>
    %4 = tpu.matmul %2, %3, %cst {dimension_numbers = #tpu.dot_dimension_numbers<[1], [0], [0], [1], [0, 0, 1, 1], [], []>} : vector<328x128xbf16>, vector<128x128xbf16>, vector<328x128xf32> -> vector<328x128xf32>
    %c0_4 = arith.constant 0 : index
    %c0_5 = arith.constant 0 : index
    %5 = vector.load %arg3[%c0_4, %c0_5] : memref<1x128xf32, #tpu.memory_space<vmem>>, vector<1x128xf32>
    %6 = vector.broadcast %5 : vector<1x128xf32> to vector<328x128xf32>
    %7 = arith.addf %4, %6 : vector<328x128xf32>
    %cst_6 = arith.constant 0.000000e+00 : f32
    %8 = vector.broadcast %cst_6 : f32 to vector<328x128xf32>
    %9 = arith.maximumf %7, %8 : vector<328x128xf32>
    %10 = vector.broadcast %0 : vector<328x1xf32> to vector<328x128xf32>
    %11 = arith.mulf %9, %10 : vector<328x128xf32>
    %c0_7 = arith.constant 0 : index
    %c0_8 = arith.constant 0 : index
    %12 = vector.load %arg9[%c0_7, %c0_8] : memref<328x128xf32, #tpu.memory_space<vmem>>, vector<328x128xf32>
    tpu.vector_store %arg9[%c0_7, %c0_8], %11 {strides = array<i32>} : memref<328x128xf32, #tpu.memory_space<vmem>>, vector<328x128xf32>,
    %c0_9 = arith.constant 0 : index
    %c0_10 = arith.constant 0 : index
    %13 = vector.load %arg4[%c0_9, %c0_10] : memref<9x128xf32, #tpu.memory_space<vmem>>, vector<9x128xf32>
    %c0_11 = arith.constant 0 : index
    %c0_12 = arith.constant 0 : index
    %14 = vector.load %arg5[%c0_11, %c0_12] : memref<1x128xf32, #tpu.memory_space<vmem>>, vector<1x128xf32>
    %c0_13 = arith.constant 0 : index
    %c0_14 = arith.constant 0 : index
    %15 = vector.load %arg6[%c0_13, %c0_14] : memref<128x128xbf16, #tpu.memory_space<vmem>>, vector<128x128xbf16>
    %c0_15 = arith.constant 0 : index
    %c0_16 = arith.constant 0 : index
    %16 = vector.load %arg7[%c0_15, %c0_16] : memref<1x128xf32, #tpu.memory_space<vmem>>, vector<1x128xf32>
    %cst_17 = arith.constant 0.000000e+00 : f32
    %17 = vector.broadcast %cst_17 : f32 to vector<288x128xf32>
    %c0_18 = arith.constant 0 : index
    %c0_19 = arith.constant 0 : index
    %18 = vector.load %arg9[%c0_18, %c0_19] : memref<328x128xf32, #tpu.memory_space<vmem>>, vector<288x128xf32>
    %19 = vector.extract_strided_slice %13 {offsets = [0, 0], sizes = [1, 128], strides = [1, 1]} : vector<9x128xf32> to vector<1x128xf32>
    %20 = vector.broadcast %19 : vector<1x128xf32> to vector<288x128xf32>
    %21 = arith.mulf %18, %20 : vector<288x128xf32>
    %22 = arith.addf %17, %21 : vector<288x128xf32>
    %c1 = arith.constant 1 : index
    %c0_20 = arith.constant 0 : index
    %23 = vector.load %arg9[%c1, %c0_20] : memref<328x128xf32, #tpu.memory_space<vmem>>, vector<288x128xf32>
    %24 = vector.extract_strided_slice %13 {offsets = [1, 0], sizes = [1, 128], strides = [1, 1]} : vector<9x128xf32> to vector<1x128xf32>
    %25 = vector.broadcast %24 : vector<1x128xf32> to vector<288x128xf32>
    %26 = arith.mulf %23, %25 : vector<288x128xf32>
    %27 = arith.addf %22, %26 : vector<288x128xf32>
    %c2 = arith.constant 2 : index
    %c0_21 = arith.constant 0 : index
    %28 = vector.load %arg9[%c2, %c0_21] : memref<328x128xf32, #tpu.memory_space<vmem>>, vector<288x128xf32>
    %29 = vector.extract_strided_slice %13 {offsets = [2, 0], sizes = [1, 128], strides = [1, 1]} : vector<9x128xf32> to vector<1x128xf32>
    %30 = vector.broadcast %29 : vector<1x128xf32> to vector<288x128xf32>
    %31 = arith.mulf %28, %30 : vector<288x128xf32>
    %32 = arith.addf %27, %31 : vector<288x128xf32>
    %c18 = arith.constant 18 : index
    %c0_22 = arith.constant 0 : index
    %33 = vector.load %arg9[%c18, %c0_22] : memref<328x128xf32, #tpu.memory_space<vmem>>, vector<288x128xf32>
    %34 = vector.extract_strided_slice %13 {offsets = [3, 0], sizes = [1, 128], strides = [1, 1]} : vector<9x128xf32> to vector<1x128xf32>
    %35 = vector.broadcast %34 : vector<1x128xf32> to vector<288x128xf32>
    %36 = arith.mulf %33, %35 : vector<288x128xf32>
    %37 = arith.addf %32, %36 : vector<288x128xf32>
    %c19 = arith.constant 19 : index
    %c0_23 = arith.constant 0 : index
    %38 = vector.load %arg9[%c19, %c0_23] : memref<328x128xf32, #tpu.memory_space<vmem>>, vector<288x128xf32>
    %39 = vector.extract_strided_slice %13 {offsets = [4, 0], sizes = [1, 128], strides = [1, 1]} : vector<9x128xf32> to vector<1x128xf32>
    %40 = vector.broadcast %39 : vector<1x128xf32> to vector<288x128xf32>
    %41 = arith.mulf %38, %40 : vector<288x128xf32>
    %42 = arith.addf %37, %41 : vector<288x128xf32>
    %c20 = arith.constant 20 : index
    %c0_24 = arith.constant 0 : index
    %43 = vector.load %arg9[%c20, %c0_24] : memref<328x128xf32, #tpu.memory_space<vmem>>, vector<288x128xf32>
    %44 = vector.extract_strided_slice %13 {offsets = [5, 0], sizes = [1, 128], strides = [1, 1]} : vector<9x128xf32> to vector<1x128xf32>
    %45 = vector.broadcast %44 : vector<1x128xf32> to vector<288x128xf32>
    %46 = arith.mulf %43, %45 : vector<288x128xf32>
    %47 = arith.addf %42, %46 : vector<288x128xf32>
    %c36 = arith.constant 36 : index
    %c0_25 = arith.constant 0 : index
    %48 = vector.load %arg9[%c36, %c0_25] : memref<328x128xf32, #tpu.memory_space<vmem>>, vector<288x128xf32>
    %49 = vector.extract_strided_slice %13 {offsets = [6, 0], sizes = [1, 128], strides = [1, 1]} : vector<9x128xf32> to vector<1x128xf32>
    %50 = vector.broadcast %49 : vector<1x128xf32> to vector<288x128xf32>
    %51 = arith.mulf %48, %50 : vector<288x128xf32>
    %52 = arith.addf %47, %51 : vector<288x128xf32>
    %c37 = arith.constant 37 : index
    %c0_26 = arith.constant 0 : index
    %53 = vector.load %arg9[%c37, %c0_26] : memref<328x128xf32, #tpu.memory_space<vmem>>, vector<288x128xf32>
    %54 = vector.extract_strided_slice %13 {offsets = [7, 0], sizes = [1, 128], strides = [1, 1]} : vector<9x128xf32> to vector<1x128xf32>
    %55 = vector.broadcast %54 : vector<1x128xf32> to vector<288x128xf32>
    %56 = arith.mulf %53, %55 : vector<288x128xf32>
    %57 = arith.addf %52, %56 : vector<288x128xf32>
    %c38 = arith.constant 38 : index
    %c0_27 = arith.constant 0 : index
    %58 = vector.load %arg9[%c38, %c0_27] : memref<328x128xf32, #tpu.memory_space<vmem>>, vector<288x128xf32>
    %59 = vector.extract_strided_slice %13 {offsets = [8, 0], sizes = [1, 128], strides = [1, 1]} : vector<9x128xf32> to vector<1x128xf32>
    %60 = vector.broadcast %59 : vector<1x128xf32> to vector<288x128xf32>
    %61 = arith.mulf %58, %60 : vector<288x128xf32>
    %62 = arith.addf %57, %61 : vector<288x128xf32>
    %63 = vector.broadcast %14 : vector<1x128xf32> to vector<288x128xf32>
    %64 = arith.addf %62, %63 : vector<288x128xf32>
    %65 = arith.truncf %64 : vector<288x128xf32> to vector<288x128xbf16>
    %cst_28 = arith.constant dense<0.000000e+00> : vector<288x128xf32>
    %66 = tpu.matmul %65, %15, %cst_28 {dimension_numbers = #tpu.dot_dimension_numbers<[1], [0], [0], [1], [0, 0, 1, 1], [], []>} : vector<288x128xbf16>, vector<128x128xbf16>, vector<288x128xf32> -> vector<288x128xf32>
    %67 = vector.broadcast %16 : vector<1x128xf32> to vector<288x128xf32>
    %68 = arith.addf %66, %67 : vector<288x128xf32>
    %c19_29 = arith.constant 19 : index
    %c0_30 = arith.constant 0 : index
    %69 = vector.load %arg1[%c19_29, %c0_30] : memref<328x128xf32, #tpu.memory_space<vmem>>, vector<288x128xf32>
    %70 = arith.addf %68, %69 : vector<288x128xf32>
    %cst_31 = arith.constant 0.000000e+00 : f32
    %71 = vector.broadcast %cst_31 : f32 to vector<288x128xf32>
    %72 = arith.maximumf %70, %71 : vector<288x128xf32>
    %c0_32 = arith.constant 0 : index
    %c0_33 = arith.constant 0 : index
    %73 = vector.load %arg8[%c0_32, %c0_33] : memref<288x128xf32, #tpu.memory_space<vmem>>, vector<288x128xf32>
    tpu.vector_store %arg8[%c0_32, %c0_33], %72 {strides = array<i32>} : memref<288x128xf32, #tpu.memory_space<vmem>>, vector<288x128xf32>,
    return
  }
  func.func @transform_0(%arg0: i32) -> (i32, i32) {
    %c0_i32 = arith.constant 0 : i32
    %c0_i32_0 = arith.constant 0 : i32
    return %arg0, %c0_i32 : i32, i32
  }
  func.func @transform_1(%arg0: i32) -> (i32, i32) {
    %c0_i32 = arith.constant 0 : i32
    %c0_i32_0 = arith.constant 0 : i32
    %c0_i32_1 = arith.constant 0 : i32
    return %c0_i32, %c0_i32_0 : i32, i32
  }
  func.func @transform_2(%arg0: i32) -> (i32, i32) {
    %c0_i32 = arith.constant 0 : i32
    %c0_i32_0 = arith.constant 0 : i32
    %c0_i32_1 = arith.constant 0 : i32
    return %c0_i32, %c0_i32_0 : i32, i32
  }
  func.func @transform_3(%arg0: i32) -> (i32, i32) {
    %c0_i32 = arith.constant 0 : i32
    %c0_i32_0 = arith.constant 0 : i32
    %c0_i32_1 = arith.constant 0 : i32
    return %c0_i32, %c0_i32_0 : i32, i32
  }
  func.func @transform_4(%arg0: i32) -> (i32, i32) {
    %c0_i32 = arith.constant 0 : i32
    %c0_i32_0 = arith.constant 0 : i32
    %c0_i32_1 = arith.constant 0 : i32
    return %c0_i32, %c0_i32_0 : i32, i32
  }
  func.func @transform_5(%arg0: i32) -> (i32, i32) {
    %c0_i32 = arith.constant 0 : i32
    %c0_i32_0 = arith.constant 0 : i32
    %c0_i32_1 = arith.constant 0 : i32
    return %c0_i32, %c0_i32_0 : i32, i32
  }
  func.func @transform_6(%arg0: i32) -> (i32, i32) {
    %c0_i32 = arith.constant 0 : i32
    %c0_i32_0 = arith.constant 0 : i32
    %c0_i32_1 = arith.constant 0 : i32
    return %c0_i32, %c0_i32_0 : i32, i32
  }
  func.func @transform_7(%arg0: i32) -> (i32, i32) {
    %c0_i32 = arith.constant 0 : i32
    %c0_i32_0 = arith.constant 0 : i32
    return %arg0, %c0_i32 : i32, i32
  }
}

</mosaic_0001>

<bundles_post_ra>
// kernel: tpu_custom_call.1
= control target key start
LH: loop header
LB: loop body
LE: loop exit
PB: predicated region body
PF: predicated region fallthrough
CT: control target
= control target key end

     0   :  { %s4578_s0 = inlined_call_operand.hbm [shape: f32[656,128], index: 0, kind: input, shape index: {}]   ;;  %s4579_s1 = inlined_call_operand.hbm [shape: bf16[128,128], index: 1, kind: input, shape index: {}]   ;;  %s4580_s2 = inlined_call_operand.vmem [shape: f32[1,128], index: 2, kind: input, shape index: {}]   ;;  %s4581_s3 = inlined_call_operand.hbm [shape: f32[9,128], index: 3, kind: input, shape index: {}]   ;;  %s4582_s4 = inlined_call_operand.vmem [shape: f32[1,128], index: 4, kind: input, shape index: {}]   ;;  %s4583_s5 = inlined_call_operand.hbm [shape: bf16[128,128], index: 5, kind: input, shape index: {}]   ;;  %s4584_s6 = inlined_call_operand.vmem [shape: f32[1,128], index: 6, kind: input, shape index: {}]   ;;  %s4585_s7 = inlined_call_operand.hbm [shape: f32[576,128], index: 7, kind: output, shape index: {}]  }
   0x1   :  { %4593 = sst [smem:[#allocation36_spill]] %s4579_s1 }
   0x2   :  { %12 = vsyncpa [#allocation4], 0 }
   0x3   :  { %14 = vsyncpa [#allocation4 + $0x1], 0 }
   0x4   :  { %15 = vsyncpa [#allocation7], 0 }
   0x5   :  { %16 = vsyncpa [#allocation10], 0 }
   0x6   :  { %17 = vsyncpa [#allocation5], 0 }
   0x7   :  { %19 = vsyncpa [#allocation5 + $0x1], 0  ;;  %s3133_s24 = smov 0   ;;  %s3135_s25 = smov 0  }
   0x8   :  { %s3137_s26 = smov 0   ;;  %s3139_s27 = smov 0  }
   0x9 LB: > { %s3154_s28 = sadd.s32 4294967295, %s3077_s27   ;;  %s2516_s29 = sadd.s32 4294967294, %s3077_s27   ;;  %s3077_s27 = sphi %s3139_s27, %s4657_s27   ;;  %s3073_s26 = sphi %s3137_s26, %s4656_s26   ;;  %s3069_s25 = sphi %s3135_s25, %s4655_s25   ;;  %s3065_s24 = sphi %s3133_s24, %s4654_s24  }
   0xa   : > { %p45_p0 = scmp.ne.s32.totalorder %s3069_s25, %s3065_s24  ;;  %p4586_p1 = scmp.eq.s32.totalorder %s3154_s28, 0 }
   0xb   : > { %p201_p3 = scmp.eq.s32.totalorder %s2516_s29, 1  ;;  %p2517_p5 = scmp.ge.s32.totalorder %s3077_s27, 1 }
   0xc   : > { %p3163_p4 = por %p4586_p1, %p45_p0  ;;  %p208_p7 = scmp.lt.s32.totalorder %s3077_s27, 3 }
   0xd   : > { %p3168_p6 = por %p201_p3, %p45_p0  ;;  %s3079_s10 = smov [#allocation6]  }
   0xe   : > { %s4594_s30 = scalar_select %p3163_p4, 1, 0 }
   0xf   : > { %s4595_s8 = scalar_select %p3168_p6, 1, 0 }
  0x10   : > { %p3173_p8 = pnand %p2517_p5, %p208_p7  ;;  %s220_s11 = sshll.u32 %s3079_s10, 4  ;;  %s3177_s11 = int_to_ptr.vmem [resolvable:$true] %s220_s11 }
  0x11   : > { %4596 = sst [smem:[#allocation16_spill]] %s4595_s8  ;;  %s3080_s13 = smov [#allocation8]  }
  0x12   : > { %s4597_s9 = scalar_select %p3173_p8, 1, 0 }
  0x13   : > { %p2794_p9 = pneg %p3173_p8  ;;  %s236_s14 = sshll.u32 %s3080_s13, 4  ;;  %s3188_s14 = int_to_ptr.vmem [resolvable:$true] %s236_s14 }
  0x14   : > { %s4599_s1 = sld [smem:[#allocation36_spill]] }
  0x15   : > { %p3184_p11 = pnand %p2794_p9, %p4586_p1 }
  0x17   : > { %p3198_p13 = pneg %p3184_p11 }
  0x1a   : > { %s2889_s17 = scalar_lea.hbm %s4599_s1, 1024 }
  0x1b   : > { %p2890_p12 = scmp.ne.s32.totalorder %s4599_s1, %s2889_s17  ;;  %p2896_p5 = scmp.lt.u32.totalorder %s2889_s17, %s4599_s1 }
  0x1d   : > { %p2892_p0 = pnand %p3198_p13, %p2890_p12 }
  0x1f   : > { %p2893_p3 = pneg %p2892_p0 }
  0x21   : > { %p2898_p7 = pnand %p2896_p5, %p2893_p3 }
  0x23   : > { %2901 = shalt.err (!%p2898_p7)
}
  0x24   : > { %s2902_s23 = scalar_lea.vmem %s3177_s11, 1024  ;;  %p2910_p2 = scmp.lt.s32.totalorder %s3177_s11, %s3177_s11 }
  0x25   : > { %p2903_p9 = scmp.ne.s32.totalorder %s3177_s11, %s2902_s23  ;;  %p2911_p6 = scmp.lt.s32.totalorder %s2902_s23, %s2902_s23 }
  0x27   : > { %p2905_p10 = pnand %p2903_p9, %p3198_p13  ;;  %p2912_p12 = por %p2911_p6, %p2910_p2 }
  0x29   : > { %p2906_p1 = pneg %p2905_p10 }
  0x2b   : > { %p2913_p0 = pnand %p2912_p12, %p2906_p1 }
  0x2d   : > { %2916 = shalt.err (!%p2913_p0)
}
  0x2e   : > { %s4587_s29 = smov 64   ;;  %s4588_s10 = smov 4  }
  0x2f   : > { %2797 = dma.hbm_to_vmem [thread:$0]  (!%p3184_p11), %s4599_s1, 1024, %s3177_s11, [#allocation7], %s4587_s29, %s4587_s29, %s4588_s10  }
  0x30   : > { %s2917_s18 = scalar_lea.hbm %s4581_s3, 256 }
  0x31   : > { %p2918_p1 = scmp.ne.s32.totalorder %s4581_s3, %s2917_s18  ;;  %p2924_p10 = scmp.lt.u32.totalorder %s2917_s18, %s4581_s3 }
  0x33   : > { %p2920_p2 = pnand %p2918_p1, %p3198_p13 }
  0x35   : > { %p2921_p6 = pneg %p2920_p2 }
  0x37   : > { %p2926_p3 = pnand %p2924_p10, %p2921_p6 }
  0x39   : > { %2929 = shalt.err (!%p2926_p3)
}
  0x3a   : > { %s2930_s11 = scalar_lea.vmem %s3188_s14, 256  ;;  %p2938_p12 = scmp.lt.s32.totalorder %s3188_s14, %s3188_s14 }
  0x3b   : > { %p2931_p5 = scmp.ne.s32.totalorder %s3188_s14, %s2930_s11  ;;  %p2939_p0 = scmp.lt.s32.totalorder %s2930_s11, %s2930_s11 }
  0x3d   : > { %p2933_p7 = pnand %p2931_p5, %p3198_p13  ;;  %p2940_p1 = por %p2939_p0, %p2938_p12 }
  0x3f   : > { %p2934_p9 = pneg %p2933_p7 }
  0x41   : > { %p2941_p2 = pnand %p2940_p1, %p2934_p9 }
  0x43   : > { %2944 = shalt.err (!%p2941_p2)
}
  0x44   : > { %s4592_s13 = smov 128   ;;  %s3084_s15 = smov 8  }
  0x45   : > { %2800 = dma.hbm_to_vmem [thread:$0]  (!%p3184_p11), %s4581_s3, 256, %s3188_s14, [#allocation7], %s4592_s13, %s4592_s13, %s3084_s15  }
  0x46   : > { %s3085_s18 = smov [#allocation9]   ;;  %s3249_s21 = sadd.s32 1, %s3077_s27  }
  0x47   : > { %s252_s19 = sshll.u32 %s3085_s18, 4  ;;  %s2945_s11 = scalar_lea.hbm %s4583_s5, 1024  ;;  %s253_s19 = int_to_ptr.vmem [resolvable:$true] %s252_s19 }
  0x48   : > { %p2946_p6 = scmp.ne.s32.totalorder %s4583_s5, %s2945_s11  ;;  %p2952_p5 = scmp.lt.u32.totalorder %s2945_s11, %s4583_s5 }
  0x4a   : > { %p2948_p10 = pnand %p2946_p6, %p3198_p13 }
  0x4c   : > { %p2949_p3 = pneg %p2948_p10 }
  0x4e   : > { %p2954_p7 = pnand %p2952_p5, %p2949_p3 }
  0x50   : > { %2957 = shalt.err (!%p2954_p7)
}
  0x51   : > { %s2958_s14 = scalar_lea.vmem %s253_s19, 1024  ;;  %p2966_p1 = scmp.lt.s32.totalorder %s253_s19, %s253_s19 }
  0x52   : > { %p2959_p9 = scmp.ne.s32.totalorder %s253_s19, %s2958_s14  ;;  %p2967_p2 = scmp.lt.s32.totalorder %s2958_s14, %s2958_s14 }
  0x54   : > { %p2961_p12 = pnand %p2959_p9, %p3198_p13  ;;  %p2968_p4 = por %p2967_p2, %p2966_p1 }
  0x56   : > { %p2962_p0 = pneg %p2961_p12 }
  0x58   : > { %p2969_p8 = pnand %p2968_p4, %p2962_p0 }
  0x5a   : > { %2972 = shalt.err (!%p2969_p8)
}
  0x5b   : > { %s4601_s29 = smov 4   ;;  %s4602_s10 = smov 64  }
  0x5c   : > { %2803 = dma.hbm_to_vmem [thread:$0]  (!%p3184_p11), %s4583_s5, 1024, %s253_s19, [#allocation10], %s4602_s10, %s4602_s10, %s4601_s29  }
  0x5d   : > { %s29_s20 = ssub.s32 %s3077_s27, %s3249_s21  ;;  %s32_s12 = sadd.s32 1, %s3073_s26 }
  0x5e   : > { %p30_p4 = scmp.eq.s32.totalorder %s29_s20, 0  ;;  %p39_p8 = scmp.ne.s32.totalorder %s3073_s26, %s3069_s25 }
  0x5f   : > { %p40_p13 = scmp.eq.s32.totalorder %s3077_s27, 0  ;;  %p2815_p6 = scmp.lt.s32.totalorder %s3077_s27, 2 }
  0x60   : > { %s3280_s16 = scalar_select %p30_p4, %s3073_s26, %s32_s12  }
  0x61   : > { %p41_p10 = por %p40_p13, %p39_p8  ;;  %p4603_p3 = scmp.eq.s32.totalorder %s3154_s28, 1 }
  0x62   : > { %s269_s18 = sand.u32 1, %s3073_s26   ;;  %s2550_s22 = smul.u32 5248, %s3077_s27 }
  0x63   : > { %p3284_p5 = por %p4603_p3, %p39_p8  ;;  %s2775_s23 = smul.u32 328, %s269_s18 }
  0x64   : > { %p3290_p7 = pnand %p2815_p6, %p41_p10  ;;  %s3297_s29 = scalar_lea.hbm %s4578_s0, %s2550_s22 }
  0x65   : > { %s273_s10 = scalar_lea.vmem [#allocation3], %s2775_s23  ;;  %s3301_s8 = scalar_lea.sflag [#allocation4], %s269_s18 }
  0x66   : > { %s280_s1 = sshll.u32 %s273_s10, 4  ;;  %s2973_s20 = scalar_lea.hbm %s3297_s29, 5248  ;;  %s3299_s1 = int_to_ptr.vmem [resolvable:$true] %s280_s1 }
  0x67   : > { %p2974_p11 = scmp.ne.s32.totalorder %s3297_s29, %s2973_s20  ;;  %p2975_p9 = pneg %p3290_p7 }
  0x68   : > { %s2978_s19 = scalar_lea.hbm %s4578_s0, 10496  ;;  %p2979_p1 = scmp.lt.u32.totalorder %s3297_s29, %s4578_s0 }
  0x69   : > { %p2976_p12 = pnand %p2975_p9, %p2974_p11  ;;  %p2980_p2 = scmp.lt.u32.totalorder %s2978_s19, %s2973_s20 }
  0x6a   : > { %p2982_p8 = scmp.lt.u32.totalorder %s2973_s20, %s3297_s29 }
  0x6b   : > { %p2977_p0 = pneg %p2976_p12  ;;  %p2981_p4 = por %p2980_p2, %p2979_p1 }
  0x6d   : > { %p2983_p13 = por %p2982_p8, %p2981_p4 }
  0x6f   : > { %p2984_p6 = pnand %p2983_p13, %p2977_p0 }
  0x71   : > { %2987 = shalt.err (!%p2984_p6)
}
  0x72   : > { %s2988_s18 = scalar_lea.vmem %s3299_s1, 5248  ;;  %s3086_s23 = smov [#allocation3]  }
  0x73   : > { %p2989_p10 = scmp.ne.s32.totalorder %s3299_s1, %s2988_s18  ;;  %s2993_s10 = sshll.u32 %s3086_s23, 4  ;;  %s2994_s10 = int_to_ptr.vmem [resolvable:$false] %s2993_s10 }
  0x74   : > { %s2995_s13 = scalar_lea.vmem %s2994_s10, 10496  ;;  %p2996_p12 = scmp.lt.s32.totalorder %s3299_s1, %s2994_s10 }
  0x75   : > { %p2991_p3 = pnand %p2989_p10, %p2975_p9  ;;  %p2997_p1 = scmp.lt.s32.totalorder %s2995_s13, %s2988_s18 }
  0x77   : > { %p2992_p11 = pneg %p2991_p3  ;;  %p2998_p2 = por %p2997_p1, %p2996_p12 }
  0x79   : > { %p2999_p4 = pnand %p2998_p2, %p2992_p11 }
  0x7b   : > { %3002 = shalt.err (!%p2999_p4)
}
  0x7c   : > { %s4606_s20 = smov 128   ;;  %p4607_p9 = scmp.ne.s32.totalorder %s4597_s9, 0 }
  0x7d   : > { %2807 = dma.hbm_to_vmem [thread:$0]  (!%p3290_p7), %s3297_s29, 5248, %s3299_s1, %s3301_s8, %s4606_s20, %s4606_s20, %s3084_s15  }
  0x7e   : > { %292 = sbr.rel (%p4607_p9) target bundleno = 846 (0x34e), region = 48 }
  0x85   : > { %s3335_s12 = sand.u32 1, %s3069_s25   ;;  %p4608_p0 = scmp.ne.s32.totalorder %s4594_s30, 0 }
  0x86   : > { %s2776_s22 = smul.u32 328, %s3335_s12  ;;  %s295_s19 = scalar_lea.sflag [#allocation4], %s3335_s12 }
  0x88   : > { %s3339_s14 = scalar_lea.vmem [#allocation3], %s2776_s22 }
  0x89   : > { %3048 = dma.done.wait (%p4608_p0), %s295_s19, 5248  }
  0x8a   : > { %3050 = vsyncadd (%p4608_p0), %s295_s19, 4294962048  ;;  %p4609_p7 = scmp.eq.s32.totalorder %s3154_s28, 0 }
  0x8c   : > { %3052 = dma.done.wait (%p4609_p7), [#allocation7], 1280   ;;  %p4610_p8 = pmov %p4609_p7 }
  0x8d   : > { %p4611_p13 = pmov %p4609_p7 }
  0x8e   : > { %3054 = vsyncadd (%p4610_p8), [#allocation7], 4294966016 }
  0x8f   : > { %3056 = dma.done.wait (%p4611_p13), [#allocation10], 1024   ;;  %p4612_p6 = pmov %p4609_p7 }
  0x90   : > { %v3087_v0 = vmov 0.0   ;;  %vm3088_vm0 = vmmov 0   ;;  %v3089_v1 = vmov 127   ;;  %v2866_v2 = vld [vmem:[#allocation6] sm:$0xff]   ;;  %v2867_v3 = vld [vmem:[#allocation6 + $0x8] sm:$0xff]   ;;  %v2868_v4 = vld [vmem:[#allocation6 + $0x10] sm:$0xff]  }
  0x91   : > { %3058 = vsyncadd (%p4612_p6), [#allocation10], 4294966272  ;;  %2607 = vmatprep.subr.bf16.mxu0 %v3087_v0  ;;  %2759 = vmatprep.subr.bf16.mxu1 %v3087_v0  ;;  %v3364_v5 = vld [vmem:[%s3339_s14] sm:$0xff]  ;;  %v3367_v6 = vld [vmem:[%s3339_s14 + $0x10] sm:$0xff]  ;;  %s2777_s13 = smul.u32 288, %s3335_s12  ;;  %s3090_s11 = smov [#allocation11]  }
  0x92   : > { %2623 = vmatprep.mubr.msk.bf16.mxu0 %vm3088_vm0, %v3087_v0  ;;  %2683 = vmatprep.mubr.msk.bf16.mxu1 %vm3088_vm0, %v3087_v0  ;;  %v2869_v7 = vld [vmem:[#allocation6 + $0x18] sm:$0xff]   ;;  %v3375_v9 = vld [vmem:[%s3339_s14 + $0x18] sm:$0xff]  ;;  %v2870_v10 = vld [vmem:[#allocation6 + $0x20] sm:$0xff]   ;;  %s2551_s22 = smul.u32 4608, %s3154_s28  ;;  %s2401_s28 = scalar_lea.sflag [#allocation5], %s3335_s12 }
  0x93   : > { %2864 = vset.pattern.permute.xlu0 %v3089_v1  ;;  %2865 = vset.pattern.permute.xlu1 %v3089_v1  ;;  %v345_v8 = vld [vmem:[%s3339_s14 + $0x8] sm:$0xff]  ;;  %v3381_v11 = vld [vmem:[%s3339_s14 + $0x20] sm:$0xff]  ;;  %v2871_v13 = vld [vmem:[#allocation6 + $0x28] sm:$0xff]   ;;  %v386_v42 = vpack.c.bf16 %v3375_v9, %v3367_v6  ;;  %s4425_s20 = scalar_lea.vmem [#allocation11], %s2777_s13  ;;  %s3007_s29 = sshll.u32 %s3090_s11, 4  ;;  %s3008_s29 = int_to_ptr.vmem [resolvable:$false] %s3007_s29 }
  0x94   : > { %2608 = vmatpush3.bf16.msra.mxu0 %v2866_v2  ;;  %2767 = vmatpush3.bf16.msra.mxu1 %v2866_v2  ;;  %v3384_v12 = vld [vmem:[%s3339_s14 + $0x28] sm:$0xff]  ;;  %v3389_v14 = vld [vmem:[%s3339_s14 + $0x30] sm:$0xff]  ;;  %v3392_v15 = vld [vmem:[%s3339_s14 + $0x38] sm:$0xff]  ;;  %v385_v36 = vpack.c.bf16 %v345_v8, %v3364_v5  ;;  %s2414_s19 = sshll.u32 %s4425_s20, 4  ;;  %s4529_s15 = scalar_lea.hbm %s4585_s7, %s2551_s22  ;;  %s4532_s19 = int_to_ptr.vmem [resolvable:$true] %s2414_s19 }
  0x95   : > { %2609 = vmatprep.subr.bf16.mxu0 %v3087_v0  ;;  %2760 = vmatprep.subr.bf16.mxu1 %v3087_v0  ;;  %v3397_v16 = vld [vmem:[%s3339_s14 + $0xb0] sm:$0xff]  ;;  %v3400_v17 = vld [vmem:[%s3339_s14 + $0xb8] sm:$0xff]  ;;  %v3403_v18 = vld [vmem:[%s3339_s14 + $0xc0] sm:$0xff]  ;;  %v387_v50 = vpack.c.bf16 %v3384_v12, %v3381_v11  ;;  %v388_v58 = vpack.c.bf16 %v3392_v15, %v3389_v14  ;;  %s3009_s1 = scalar_lea.vmem %s3008_s29, 9216  ;;  %p3010_p12 = scmp.lt.s32.totalorder %s4532_s19, %s3008_s29 }
  0x96   : > { %720 = vperm.xlu0 %2864, %v3364_v5   ;;  %730 = vperm.xlu1 %2865, %v3367_v6   ;;  %v2872_v19 = vld [vmem:[#allocation6 + $0x30] sm:$0xff]   ;;  %v396_v20 = vpack.c.bf16 %v3400_v17, %v3397_v16  ;;  %v3408_v21 = vld [vmem:[%s3339_s14 + $0xc8] sm:$0xff]  ;;  %v3411_v22 = vld [vmem:[%s3339_s14 + $0xd0] sm:$0xff] }
  0x97   : > { %v3414_v23 = vld [vmem:[%s3339_s14 + $0xd8] sm:$0xff]  ;;  %v397_v24 = vpack.c.bf16 %v3408_v21, %v3403_v18  ;;  %v3423_v26 = vld [vmem:[%s3339_s14 + $0xe0] sm:$0xff]  ;;  %v3426_v27 = vld [vmem:[%s3339_s14 + $0xe8] sm:$0xff] }
  0x98   : > { %2610 = vmatpush3.bf16.msra.mxu0 %v2867_v3  ;;  %2768 = vmatpush3.bf16.msra.mxu1 %v2867_v3  ;;  %v398_v25 = vpack.c.bf16 %v3414_v23, %v3411_v22  ;;  %v3429_v28 = vld [vmem:[%s3339_s14 + $0x40] sm:$0xff]  ;;  %v3432_v29 = vld [vmem:[%s3339_s14 + $0x48] sm:$0xff]  ;;  %v399_v30 = vpack.c.bf16 %v3426_v27, %v3423_v26  ;;  %v3439_v32 = vld [vmem:[%s3339_s14 + $0xf0] sm:$0xff] }
  0x99   : > { %2611 = vmatprep.subr.bf16.mxu0 %v3087_v0  ;;  %2761 = vmatprep.subr.bf16.mxu1 %v3087_v0  ;;  %v2873_v31 = vld [vmem:[#allocation6 + $0x38] sm:$0xff]   ;;  %v3442_v33 = vld [vmem:[%s3339_s14 + $0xf8] sm:$0xff]  ;;  %v3449_v34 = vld [vmem:[%s3339_s14 + $0x50] sm:$0xff]  ;;  %v389_v62 = vpack.c.bf16 %v3432_v29, %v3429_v28 }
  0x9a   : > { %725 = vperm.xlu0 %2864, %v345_v8   ;;  %735 = vperm.xlu1 %2865, %v3375_v9   ;;  %v3452_v35 = vld [vmem:[%s3339_s14 + $0x58] sm:$0xff]  ;;  %v400_v37 = vpack.c.bf16 %v3442_v33, %v3439_v32  ;;  %v3460_v38 = vld [vmem:[%s3339_s14 + $0x100] sm:$0xff]  ;;  %v3467_v39 = vld [vmem:[%s3339_s14 + $0x108] sm:$0xff] }
  0x9b   : > { %v3470_v40 = vld [vmem:[%s3339_s14 + $0x60] sm:$0xff]  ;;  %v3473_v41 = vld [vmem:[%s3339_s14 + $0x68] sm:$0xff]  ;;  %v401_v43 = vpack.c.bf16 %v3467_v39, %v3460_v38  ;;  %v3482_v44 = vld [vmem:[%s3339_s14 + $0x70] sm:$0xff]  ;;  %v390_v2 = vpack.c.bf16 %v3452_v35, %v3449_v34 }
  0x9c   : > { %2612 = vmatpush3.bf16.msra.mxu0 %v2868_v4  ;;  %2769 = vmatpush3.bf16.msra.mxu1 %v2868_v4  ;;  %v3485_v45 = vld [vmem:[%s3339_s14 + $0x78] sm:$0xff]  ;;  %v378_v46 = vld [vmem:[%s3339_s14 + $0x110] sm:$0xff]  ;;  %v3496_v48 = vld [vmem:[%s3339_s14 + $0x80] sm:$0xff]  ;;  %v391_v4 = vpack.c.bf16 %v3473_v41, %v3470_v40 }
  0x9d   : > { %2613 = vmatprep.subr.bf16.mxu0 %v3087_v0  ;;  %2762 = vmatprep.subr.bf16.mxu1 %v3087_v0  ;;  %v379_v47 = vld [vmem:[%s3339_s14 + $0x118] sm:$0xff]  ;;  %v3499_v49 = vld [vmem:[%s3339_s14 + $0x88] sm:$0xff]  ;;  %v3506_v52 = vld [vmem:[%s3339_s14 + $0x90] sm:$0xff]  ;;  %v392_v5 = vpack.c.bf16 %v3485_v45, %v3482_v44 }
  0x9e   : > { %740 = vperm.xlu0 %2864, %v3381_v11   ;;  %745 = vperm.xlu1 %2865, %v3384_v12   ;;  %v402_v51 = vpack.c.bf16 %v379_v47, %v378_v46  ;;  %v363_v53 = vld [vmem:[%s3339_s14 + $0x98] sm:$0xff]  ;;  %v380_v54 = vld [vmem:[%s3339_s14 + $0x120] sm:$0xff]  ;;  %v381_v55 = vld [vmem:[%s3339_s14 + $0x128] sm:$0xff]  ;;  %v393_v6 = vpack.c.bf16 %v3499_v49, %v3496_v48 }
  0x9f   : > { %v364_v56 = vld [vmem:[%s3339_s14 + $0xa0] sm:$0xff]  ;;  %v365_v57 = vld [vmem:[%s3339_s14 + $0xa8] sm:$0xff]  ;;  %v403_v59 = vpack.c.bf16 %v381_v55, %v380_v54  ;;  %v382_v60 = vld [vmem:[%s3339_s14 + $0x130] sm:$0xff] }
  0xa0   : > { %2614 = vmatpush3.bf16.msra.mxu0 %v2869_v7  ;;  %2770 = vmatpush3.bf16.msra.mxu1 %v2869_v7  ;;  %v383_v61 = vld [vmem:[%s3339_s14 + $0x138] sm:$0xff]  ;;  %v384_v1 = vld [vmem:[%s3339_s14 + $0x140] sm:$0xff]  ;;  %v394_v7 = vpack.c.bf16 %v363_v53, %v3506_v52  ;;  %v395_v8 = vpack.c.bf16 %v365_v57, %v364_v56  ;;  %v2876_v11 = vld [vmem:[#allocation9 + $0x10] sm:$0xff]  }
  0xa1   : > { %2615 = vmatprep.subr.bf16.mxu0 %v3087_v0  ;;  %2763 = vmatprep.subr.bf16.mxu1 %v3087_v0  ;;  %v404_v63 = vpack.c.bf16 %v383_v61, %v382_v60  ;;  %v405_v3 = vpack.c.bf16 %v384_v1, %v384_v1  ;;  %v2874_v9 = vld [vmem:[#allocation9] sm:$0xff]  }
  0xa2   : > { %750 = vperm.xlu0 %2864, %v3389_v14   ;;  %755 = vperm.xlu1 %2865, %v3392_v15   ;;  %v2878_v14 = vld [vmem:[#allocation9 + $0x20] sm:$0xff]  }
  0xa4   : > { %2616 = vmatpush3.bf16.msra.mxu0 %v2870_v10  ;;  %2771 = vmatpush3.bf16.msra.mxu1 %v2870_v10  ;;  %v2875_v10 = vld [vmem:[#allocation9 + $0x8] sm:$0xff]  }
  0xa5   : > { %2617 = vmatprep.subr.bf16.mxu0 %v3087_v0  ;;  %2764 = vmatprep.subr.bf16.mxu1 %v3087_v0 }
  0xa6   : > { %760 = vperm.xlu0 %2864, %v3429_v28   ;;  %765 = vperm.xlu1 %2865, %v3432_v29  }
  0xa8   : > { %2618 = vmatpush3.bf16.msra.mxu0 %v2871_v13  ;;  %2772 = vmatpush3.bf16.msra.mxu1 %v2871_v13  ;;  %v2877_v13 = vld [vmem:[#allocation9 + $0x18] sm:$0xff]  }
  0xa9   : > { %2619 = vmatprep.subr.bf16.mxu0 %v3087_v0  ;;  %2765 = vmatprep.subr.bf16.mxu1 %v3087_v0 }
  0xaa   : > { %770 = vperm.xlu0 %2864, %v3449_v34   ;;  %775 = vperm.xlu1 %2865, %v3452_v35  }
  0xac   : > { %2620 = vmatpush3.bf16.msra.mxu0 %v2872_v19  ;;  %2773 = vmatpush3.bf16.msra.mxu1 %v2872_v19  ;;  %v2880_v19 = vld [vmem:[#allocation9 + $0x30] sm:$0xff]  }
  0xad   : > { %2621 = vmatprep.subr.bf16.mxu0 %v3087_v0  ;;  %2766 = vmatprep.subr.bf16.mxu1 %v3087_v0 }
  0xae   : > { %780 = vperm.xlu0 %2864, %v3470_v40   ;;  %785 = vperm.xlu1 %2865, %v3473_v41  }
  0xb0   : > { %2622 = vmatpush3.bf16.msra.mxu0 %v2873_v31  ;;  %2774 = vmatpush3.bf16.msra.mxu1 %v2873_v31 }
  0xb1   : > { %2707 = vmatprep.subr.bf16.mxu1 %v2874_v9 }
  0xb2   : > { %790 = vperm.xlu0 %2864, %v3482_v44   ;;  %795 = vperm.xlu1 %2865, %v3485_v45   ;;  %v3645_v45 = vld [vmem:[%s4580_s2] ss:$0 sm:$0xff] }
  0xb3   : > { %2624 = vmatmul.mubr.bf16.vlgmr.msra.gmra.mrb[0].mxu0 %v385_v36  ;;  %2684 = vmatmul.mubr.bf16.vlgmr.msra.gmra.mrb[0].mxu1 %v400_v37 }
  0xb4   : > { %2627 = vmatprep.mubr.msk.bf16.mxu0 %vm3088_vm0, %v3087_v0  ;;  %2687 = vmatprep.mubr.msk.bf16.mxu1 %vm3088_vm0, %v3087_v0 }
  0xb5   : > { %2708 = vmatpush3.bf16.msra.mxu1 %v2874_v9 }
  0xb6   : > { %800 = vperm.xlu0 %2864, %v3496_v48   ;;  %805 = vperm.xlu1 %2865, %v3499_v49  }
  0xb7   : > { %2709 = vmatprep.subr.bf16.mxu1 %v2875_v10 }
  0xb9   : > { %2710 = vmatpush3.bf16.msra.mxu1 %v2875_v10 }
  0xba   : > { %810 = vperm.xlu0 %2864, %v3506_v52   ;;  %815 = vperm.xlu1 %2865, %v363_v53  }
  0xbb   : > { %2628 = vmatmul.mubr.bf16.gmra.mrb[4].mxu0 %v386_v42  ;;  %2688 = vmatmul.mubr.bf16.gmra.mrb[4].mxu1 %v401_v43 }
  0xbc   : > { %2631 = vmatprep.mubr.msk.bf16.mxu0 %vm3088_vm0, %v3087_v0  ;;  %2691 = vmatprep.mubr.msk.bf16.mxu1 %vm3088_vm0, %v3087_v0 }
  0xbd   : > { %2711 = vmatprep.subr.bf16.mxu1 %v2876_v11 }
  0xbe   : > { %820 = vperm.xlu0 %2864, %v364_v56   ;;  %825 = vperm.xlu1 %2865, %v365_v57  }
  0xbf   : > { %2712 = vmatpush3.bf16.msra.mxu1 %v2876_v11  ;;  %v1005_v11 = vld [vmem:[#allocation8] sm:$0xff] }
  0xc0   : > { %2713 = vmatprep.subr.bf16.mxu1 %v2877_v13 }
  0xc2   : > { %830 = vperm.xlu0 %2864, %v3397_v16   ;;  %835 = vperm.xlu1 %2865, %v3400_v17   ;;  %v2879_v16 = vld [vmem:[#allocation9 + $0x28] sm:$0xff]  }
  0xc3   : > { %2632 = vmatmul.mubr.bf16.gmra.mrb[8].mxu0 %v387_v50  ;;  %2692 = vmatmul.mubr.bf16.gmra.mrb[8].mxu1 %v402_v51 }
  0xc4   : > { %2635 = vmatprep.mubr.msk.bf16.mxu0 %vm3088_vm0, %v3087_v0  ;;  %2695 = vmatprep.mubr.msk.bf16.mxu1 %vm3088_vm0, %v3087_v0 }
  0xc5   : > { %2714 = vmatpush3.bf16.msra.mxu1 %v2877_v13 }
  0xc6   : > { %840 = vperm.xlu0 %2864, %v3403_v18   ;;  %845 = vperm.xlu1 %2865, %v3408_v21  }
  0xc7   : > { %2715 = vmatprep.subr.bf16.mxu1 %v2878_v14 }
  0xc9   : > { %2716 = vmatpush3.bf16.msra.mxu1 %v2878_v14 }
  0xca   : > { %850 = vperm.xlu0 %2864, %v3411_v22   ;;  %855 = vperm.xlu1 %2865, %v3414_v23   ;;  %v2881_v22 = vld [vmem:[#allocation9 + $0x38] sm:$0xff]  }
  0xcb   : > { %2636 = vmatmul.mubr.bf16.gmra.mrb[12].mxu0 %v388_v58  ;;  %2696 = vmatmul.mubr.bf16.gmra.mrb[12].mxu1 %v403_v59 }
  0xcc   : > { %2639 = vmatprep.mubr.msk.bf16.mxu0 %vm3088_vm0, %v3087_v0  ;;  %2699 = vmatprep.mubr.msk.bf16.mxu1 %vm3088_vm0, %v3087_v0 }
  0xcd   : > { %2717 = vmatprep.subr.bf16.mxu1 %v2879_v16 }
  0xce   : > { %860 = vperm.xlu0 %2864, %v3423_v26   ;;  %865 = vperm.xlu1 %2865, %v3426_v27  }
  0xcf   : > { %2718 = vmatpush3.bf16.msra.mxu1 %v2879_v16 }
  0xd0   : > { %2719 = vmatprep.subr.bf16.mxu1 %v2880_v19 }
  0xd2   : > { %870 = vperm.xlu0 %2864, %v3439_v32   ;;  %875 = vperm.xlu1 %2865, %v3442_v33  }
  0xd3   : > { %2640 = vmatmul.mubr.bf16.gmra.mrb[16].mxu0 %v389_v62  ;;  %2700 = vmatmul.mubr.bf16.gmra.mrb[16].mxu1 %v404_v63 }
  0xd4   : > { %2643 = vmatprep.mubr.msk.bf16.mxu0 %vm3088_vm0, %v3087_v0  ;;  %2703 = vmatprep.mubr.msk.bf16.mxu1 %vm3088_vm0, %v3087_v0 }
  0xd5   : > { %2720 = vmatpush3.bf16.msra.mxu1 %v2880_v19 }
  0xd6   : > { %880 = vperm.xlu0 %2864, %v3460_v38   ;;  %885 = vperm.xlu1 %2865, %v3467_v39  }
  0xd7   : > { %2721 = vmatprep.subr.bf16.mxu1 %v2881_v22 }
  0xd9   : > { %2722 = vmatpush3.bf16.msra.mxu1 %v2881_v22 }
  0xda   : > { %890 = vperm.xlu0 %2864, %v378_v46   ;;  %895 = vperm.xlu1 %2865, %v379_v47   ;;  %v1061_v46 = vlaneseq }
  0xdb   : > { %2644 = vmatmul.mubr.bf16.gmra.mrb[20].mxu0 %v390_v2  ;;  %2704 = vmatmul.mubr.bf16.gmra.mrb[20].mxu1 %v405_v3 }
  0xdc   : > { %2647 = vmatprep.mubr.msk.bf16.mxu0 %vm3088_vm0, %v3087_v0  ;;  %v3651_v57 = vshrl.u32 %v1061_v46, 7 }
  0xde   : > { %900 = vperm.xlu0 %2864, %v380_v54   ;;  %905 = vperm.xlu1 %2865, %v381_v55  }
  0xe2   : > { %910 = vperm.xlu0 %2864, %v382_v60   ;;  %915 = vperm.xlu1 %2865, %v383_v61  }
  0xe3   : > { %2648 = vmatmul.mubr.bf16.gmra.mrb[24].mxu0 %v391_v4 }
  0xe4   : > { %2651 = vmatprep.mubr.msk.bf16.mxu0 %vm3088_vm0, %v3087_v0 }
  0xe6   : > { %920 = vperm.xlu0 %2864, %v384_v1  }
  0xeb   : > { %2652 = vmatmul.mubr.bf16.gmra.mrb[28].mxu0 %v392_v5 }
  0xec   : > { %2655 = vmatprep.mubr.msk.bf16.mxu0 %vm3088_vm0, %v3087_v0 }
  0xf3   : > { %2656 = vmatmul.mubr.bf16.gmra.mrb[32].mxu0 %v393_v6  ;;  %v1063_v6 = vsub.s32 0, %v3651_v57 }
  0xf4   : > { %2659 = vmatprep.mubr.msk.bf16.mxu0 %vm3088_vm0, %v3087_v0 }
  0xfb   : > { %2660 = vmatmul.mubr.bf16.gmra.mrb[36].mxu0 %v394_v7  ;;  %v1175_v7 = vsub.s32 1, %v3651_v57 }
  0xfc   : > { %2663 = vmatprep.mubr.msk.bf16.mxu0 %vm3088_vm0, %v3087_v0 }
 0x103   : > { %2664 = vmatmul.mubr.bf16.gmra.mrb[40].mxu0 %v395_v8 }
 0x104   : > { %2667 = vmatprep.mubr.msk.bf16.mxu0 %vm3088_vm0, %v3087_v0 }
 0x10b   : > { %2668 = vmatmul.mubr.bf16.gmra.mrb[44].mxu0 %v396_v20 }
 0x10c   : > { %2671 = vmatprep.mubr.msk.bf16.mxu0 %vm3088_vm0, %v3087_v0 }
 0x113   : > { %2672 = vmatmul.mubr.bf16.gmra.mrb[48].mxu0 %v397_v24 }
 0x114   : > { %2675 = vmatprep.mubr.msk.bf16.mxu0 %vm3088_vm0, %v3087_v0 }
 0x115   : > { %v3584_v12 = vpop.permute.xlu0 %720 }
 0x119   : > { %v3588_v15 = vpop.permute.xlu0 %725 }
 0x11b   : > { %2676 = vmatmul.mubr.bf16.gmra.mrb[52].mxu0 %v398_v25 }
 0x11c   : > { %2679 = vmatprep.mubr.msk.bf16.mxu0 %vm3088_vm0, %v3087_v0  ;;  %v3586_v0 = vpop.permute.xlu1 %730 }
 0x11d   : > { %v3592_v18 = vpop.permute.xlu0 %740 }
 0x120   : > { %v3590_v17 = vpop.permute.xlu1 %735 }
 0x121   : > { %v3596_v21 = vpop.permute.xlu0 %750 }
 0x123   : > { %2680 = vmatmul.mubr.bf16.gmra.mrb[56].mxu0 %v399_v30 }
 0x124   : > { %v3594_v20 = vpop.permute.xlu1 %745 }
 0x125   : > { %v3600_v24 = vpop.permute.xlu0 %760 }
 0x128   : > { %v3598_v23 = vpop.permute.xlu1 %755 }
 0x129   : > { %v3604_v26 = vpop.permute.xlu0 %770 }
 0x12c   : > { %v3602_v25 = vpop.permute.xlu1 %765 }
 0x12d   : > { %v3608_v28 = vpop.permute.xlu0 %780 }
 0x130   : > { %v3606_v27 = vpop.permute.xlu1 %775 }
 0x131   : > { %v3612_v30 = vpop.permute.xlu0 %790 }
 0x134   : > { %v3610_v29 = vpop.permute.xlu1 %785 }
 0x135   : > { %v3616_v32 = vpop.permute.xlu0 %800 }
 0x138   : > { %v3614_v31 = vpop.permute.xlu1 %795 }
 0x139   : > { %v3620_v34 = vpop.permute.xlu0 %810 }
 0x13c   : > { %v3618_v33 = vpop.permute.xlu1 %805 }
 0x13d   : > { %v3624_v36 = vpop.permute.xlu0 %820 }
 0x140   : > { %v3622_v35 = vpop.permute.xlu1 %815 }
 0x141   : > { %v3628_v38 = vpop.permute.xlu0 %830 }
 0x142   : > { %4613 = vst [vmem:[#allocation17_spill] sm:$0xff] %v3628_v38 }
 0x144   : > { %v3626_v37 = vpop.permute.xlu1 %825 }
 0x145   : > { %v3632_v40 = vpop.permute.xlu0 %840 }
 0x146   : > { %4615 = vst [vmem:[#allocation19_spill] sm:$0xff] %v3632_v40 }
 0x148   : > { %v3630_v39 = vpop.permute.xlu1 %835 }
 0x149   : > { %4614 = vst [vmem:[#allocation18_spill] sm:$0xff] %v3630_v39  ;;  %v3636_v42 = vpop.permute.xlu0 %850 }
 0x14a   : > { %4617 = vst [vmem:[#allocation21_spill] sm:$0xff] %v3636_v42 }
 0x14c   : > { %v3634_v41 = vpop.permute.xlu1 %845 }
 0x14d   : > { %4616 = vst [vmem:[#allocation20_spill] sm:$0xff] %v3634_v41  ;;  %v3640_v44 = vpop.permute.xlu0 %860 }
 0x14e   : > { %4619 = vst [vmem:[#allocation23_spill] sm:$0xff] %v3640_v44 }
 0x150   : > { %v3638_v43 = vpop.permute.xlu1 %855 }
 0x151   : > { %4618 = vst [vmem:[#allocation22_spill] sm:$0xff] %v3638_v43  ;;  %v871_v48 = vpop.permute.xlu0 %870 }
 0x154   : > { %v3647_v47 = vpop.permute.xlu1 %865 }
 0x155   : > { %4620 = vst [vmem:[#allocation24_spill] sm:$0xff] %v3647_v47  ;;  %v881_v10 = vpop.permute.xlu0 %880 }
 0x158   : > { %v876_v5 = vpop.permute.xlu1 %875 }
 0x186   : > { %v511_v49 = vpop.f32.mrb[0].mxu0  ;;  %v631_v50 = vpop.f32.mrb[0].mxu1 }
 0x187   : > { %v512_v51 = vadd.f32 %v3645_v45, %v511_v49  ;;  %v2625_v52 = vpop.f32.mrb[1].mxu0  ;;  %v632_v53 = vadd.f32 %v3645_v45, %v631_v50  ;;  %v2685_v54 = vpop.f32.mrb[1].mxu1  ;;  %v3667_v49 = vrot.slane %v1005_v11, %v1063_v6  ;;  %v1287_v50 = vsub.s32 2, %v3651_v57 }
 0x188   : > { %v514_v55 = vpop.f32.mrb[2].mxu0  ;;  %v634_v56 = vpop.f32.mrb[2].mxu1 }
 0x189   : > { %v677_v58 = vmax.f32 %v512_v51, 0.0  ;;  %v515_v59 = vadd.f32 %v3645_v45, %v514_v55  ;;  %v2626_v60 = vpop.f32.mrb[3].mxu0  ;;  %v707_v61 = vmax.f32 %v632_v53, 0.0  ;;  %v635_v62 = vadd.f32 %v3645_v45, %v634_v56  ;;  %v2686_v63 = vpop.f32.mrb[3].mxu1 }
 0x18a   : > { %v1365_v51 = vsub.s32 3, %v3651_v57  ;;  %v1589_v60 = vsub.s32 5, %v3651_v57  ;;  %v3680_v6 = vrot.slane %v1005_v11, %v1287_v50 }
 0x18b   : > { %v3656_v1 = vmul.f32 %v3584_v12, %v677_v58  ;;  %v678_v2 = vmax.f32 %v515_v59, 0.0  ;;  %v708_v3 = vmax.f32 %v635_v62, 0.0  ;;  %v953_v4 = vmul.f32 %v871_v48, %v707_v61 }
 0x18c   : > { %v1477_v59 = vsub.s32 4, %v3651_v57  ;;  %v1667_v61 = vsub.s32 6, %v3651_v57  ;;  %v1779_v62 = vsub.s32 7, %v3651_v57 }
 0x18d   : > { %964 = vst [vmem:[#allocation2] sm:$0xff] %v3656_v1  ;;  %v3662_v8 = vmul.f32 %v3588_v15, %v678_v2  ;;  %994 = vst [vmem:[#allocation2 + $0xf0] sm:$0xff] %v953_v4  ;;  %v954_v9 = vmul.f32 %v876_v5, %v708_v3  ;;  %v3669_v15 = vrot.slane %v1005_v11, %v1175_v7  ;;  %v886_v5 = vpop.permute.xlu1 %885 }
 0x18e   : > { %v519_v13 = vpop.f32.mrb[4].mxu0  ;;  %v639_v12 = vpop.f32.mrb[4].mxu1 }
 0x18f   : > { %965 = vst [vmem:[#allocation2 + $0x8] sm:$0xff] %v3662_v8  ;;  %v520_v14 = vadd.f32 %v3645_v45, %v519_v13  ;;  %v2629_v16 = vpop.f32.mrb[5].mxu0  ;;  %v640_v19 = vadd.f32 %v3645_v45, %v639_v12  ;;  %v2689_v22 = vpop.f32.mrb[5].mxu1  ;;  %995 = vst [vmem:[#allocation2 + $0xf8] sm:$0xff] %v954_v9  ;;  %v3683_v12 = vrot.slane %v1005_v11, %v1365_v51 }
 0x190   : > { %v522_v46 = vpop.f32.mrb[6].mxu0  ;;  %v642_v48 = vpop.f32.mrb[6].mxu1  ;;  %v3685_v22 = vrot.slane %v1005_v11, %v1477_v59 }
 0x191   : > { %v679_v52 = vmax.f32 %v520_v14, 0.0  ;;  %v523_v53 = vadd.f32 %v3645_v45, %v522_v46  ;;  %v2630_v54 = vpop.f32.mrb[7].mxu0  ;;  %v709_v55 = vmax.f32 %v640_v19, 0.0  ;;  %v643_v56 = vadd.f32 %v3645_v45, %v642_v48  ;;  %v2690_v58 = vpop.f32.mrb[7].mxu1 }
 0x192   : > { %v891_v13 = vpop.permute.xlu0 %890  ;;  %v3691_v46 = vrot.slane %v1005_v11, %v1779_v62 }
 0x193   : > { %v925_v63 = vmul.f32 %v3586_v0, %v679_v52  ;;  %v680_v2 = vmax.f32 %v523_v53, 0.0  ;;  %v710_v3 = vmax.f32 %v643_v56, 0.0  ;;  %v955_v4 = vmul.f32 %v881_v10, %v709_v55 }
 0x194   : > { %v3687_v0 = vrot.slane %v1005_v11, %v1589_v60  ;;  %v3689_v10 = vrot.slane %v1005_v11, %v1667_v61  ;;  %v1065_v52 = vmul.f32 %v3667_v49, %v3656_v1  ;;  %v3698_v11 = vld [vmem:[#allocation8 + $0x8] ss:$0 sm:$0xff]  ;;  %v1066_v60 = vmul.f32 %v3667_v49, %v3662_v8 }
 0x195   : > { %966 = vst [vmem:[#allocation2 + $0x10] sm:$0xff] %v925_v63  ;;  %v926_v7 = vmul.f32 %v3590_v17, %v680_v2  ;;  %996 = vst [vmem:[#allocation2 + $0x100] sm:$0xff] %v955_v4  ;;  %v956_v9 = vmul.f32 %v886_v5, %v710_v3  ;;  %v3703_v61 = vmul.f32 %v3667_v49, %v925_v63 }
 0x196   : > { %v527_v14 = vpop.f32.mrb[8].mxu0  ;;  %v647_v16 = vpop.f32.mrb[8].mxu1  ;;  %v1137_v19 = vld [vmem:[#allocation2 + $0x1] sm:$0xff]  ;;  %v1579_v54 = vld [vmem:[#allocation2 + $0xf4] sm:$0xff] }
 0x197   : > { %v1249_v57 = vld [vmem:[#allocation2 + $0x2] sm:$0xff]  ;;  %967 = vst [vmem:[#allocation2 + $0x18] sm:$0xff] %v926_v7  ;;  %v528_v17 = vadd.f32 %v3645_v45, %v527_v14  ;;  %v2633_v48 = vpop.f32.mrb[9].mxu0  ;;  %v648_v50 = vadd.f32 %v3645_v45, %v647_v16  ;;  %v2693_v51 = vpop.f32.mrb[9].mxu1  ;;  %997 = vst [vmem:[#allocation2 + $0x108] sm:$0xff] %v956_v9  ;;  %v1177_v53 = vmul.f32 %v3669_v15, %v1137_v19  ;;  %v1767_v55 = vld [vmem:[#allocation2 + $0xf5] sm:$0xff] }
 0x198   : > { %v1879_v56 = vld [vmem:[#allocation2 + $0xf6] sm:$0xff]  ;;  %v530_v58 = vpop.f32.mrb[10].mxu0  ;;  %v650_v59 = vpop.f32.mrb[10].mxu1  ;;  %v3706_v62 = vmul.f32 %v3667_v49, %v926_v7  ;;  %v1289_v1 = vmul.f32 %v3680_v6, %v1249_v57  ;;  %v3712_v8 = vmul.f32 %v3689_v10, %v1579_v54  ;;  %v3715_v63 = vmul.f32 %v3691_v46, %v1767_v55 }
 0x199   : > { %v681_v2 = vmax.f32 %v528_v17, 0.0  ;;  %v531_v3 = vadd.f32 %v3645_v45, %v530_v58  ;;  %v2634_v4 = vpop.f32.mrb[11].mxu0  ;;  %v711_v5 = vmax.f32 %v648_v50, 0.0  ;;  %v651_v9 = vadd.f32 %v3645_v45, %v650_v59  ;;  %v2694_v14 = vpop.f32.mrb[11].mxu1  ;;  %v1467_v16 = vld [vmem:[#allocation2 + $0xf3] sm:$0xff] }
 0x19a   : > { %v896_v19 = vpop.permute.xlu1 %895  ;;  %v1213_v48 = vadd.f32 %v1177_v53, %v1065_v52  ;;  %4621 = vst [vmem:[#allocation25_spill] sm:$0xff] %v3712_v8  ;;  %4622 = vst [vmem:[#allocation26_spill] sm:$0xff] %v3715_v63  ;;  %v3718_v7 = vmul.f32 %v3698_v11, %v1879_v56  ;;  %v1279_v58 = vld [vmem:[#allocation2 + $0xf2] sm:$0xff]  ;;  %v3725_v53 = vmul.f32 %v3685_v22, %v1467_v16 }
 0x19b   : > { %v927_v57 = vmul.f32 %v3592_v18, %v681_v2  ;;  %v682_v17 = vmax.f32 %v531_v3, 0.0  ;;  %v712_v51 = vmax.f32 %v651_v9, 0.0  ;;  %v957_v50 = vmul.f32 %v891_v13, %v711_v5  ;;  %v901_v13 = vpop.permute.xlu0 %900 }
 0x19c   : > { %4623 = vst [vmem:[#allocation27_spill] sm:$0xff] %v3718_v7  ;;  %v1138_v59 = vld [vmem:[#allocation2 + $0x9] sm:$0xff]  ;;  %v1325_v14 = vadd.f32 %v1289_v1, %v1213_v48  ;;  %v1580_v47 = vld [vmem:[#allocation2 + $0xfc] sm:$0xff]  ;;  %v3722_v52 = vmul.f32 %v3683_v12, %v1279_v58  ;;  %4625 = vst [vmem:[#allocation29_spill] sm:$0xff] %v3725_v53  ;;  %v3728_v55 = vmul.f32 %v3687_v0, %v1579_v54 }
 0x19d   : > { %v1250_v4 = vld [vmem:[#allocation2 + $0xa] sm:$0xff]  ;;  %968 = vst [vmem:[#allocation2 + $0x20] sm:$0xff] %v927_v57  ;;  %v928_v18 = vmul.f32 %v3594_v20, %v682_v17  ;;  %998 = vst [vmem:[#allocation2 + $0x110] sm:$0xff] %v957_v50  ;;  %v958_v56 = vmul.f32 %v896_v19, %v712_v51  ;;  %v1178_v2 = vmul.f32 %v3669_v15, %v1138_v59  ;;  %v1768_v3 = vld [vmem:[#allocation2 + $0xfd] sm:$0xff] }
 0x19e   : > { %4624 = vst [vmem:[#allocation28_spill] sm:$0xff] %v3722_v52  ;;  %4626 = vst [vmem:[#allocation30_spill] sm:$0xff] %v3728_v55  ;;  %v1290_v1 = vmul.f32 %v3680_v6, %v1250_v4  ;;  %v1880_v5 = vld [vmem:[#allocation2 + $0xfe] sm:$0xff]  ;;  %v535_v9 = vpop.f32.mrb[12].mxu0  ;;  %v655_v48 = vpop.f32.mrb[12].mxu1  ;;  %v1139_v58 = vld [vmem:[#allocation2 + $0x11] sm:$0xff]  ;;  %v3734_v54 = vmul.f32 %v3667_v49, %v927_v57  ;;  %v3737_v55 = vmul.f32 %v3689_v10, %v1580_v47 }
 0x19f   : > { %v1251_v16 = vld [vmem:[#allocation2 + $0x12] sm:$0xff]  ;;  %v3740_v20 = vmul.f32 %v3691_v46, %v1768_v3  ;;  %v3743_v19 = vmul.f32 %v3698_v11, %v1880_v5  ;;  %969 = vst [vmem:[#allocation2 + $0x28] sm:$0xff] %v928_v18  ;;  %v536_v17 = vadd.f32 %v3645_v45, %v535_v9  ;;  %v2637_v51 = vpop.f32.mrb[13].mxu0  ;;  %v656_v50 = vadd.f32 %v3645_v45, %v655_v48  ;;  %v2697_v59 = vpop.f32.mrb[13].mxu1 }
 0x1a0   : > { %v1439_v7 = vld [vmem:[#allocation2 + $0x13] sm:$0xff]  ;;  %4627 = vst [vmem:[#allocation31_spill] sm:$0xff] %v3737_v55  ;;  %999 = vst [vmem:[#allocation2 + $0x118] sm:$0xff] %v958_v56  ;;  %v1179_v57 = vmul.f32 %v3669_v15, %v1139_v58  ;;  %v1214_v4 = vadd.f32 %v1178_v2, %v1066_v60  ;;  %v538_v47 = vpop.f32.mrb[14].mxu0  ;;  %v658_v63 = vpop.f32.mrb[14].mxu1  ;;  %v1291_v3 = vmul.f32 %v3680_v6, %v1251_v16  ;;  %v1468_v60 = vld [vmem:[#allocation2 + $0xfb] sm:$0xff] }
 0x1a1   : > { %4628 = vst [vmem:[#allocation32_spill] sm:$0xff] %v3740_v20  ;;  %4629 = vst [vmem:[#allocation33_spill] sm:$0xff] %v3743_v19  ;;  %v1551_v53 = vld [vmem:[#allocation2 + $0x14] sm:$0xff]  ;;  %v1367_v20 = vmul.f32 %v3683_v12, %v1251_v16  ;;  %v1479_v5 = vmul.f32 %v3685_v22, %v1439_v7  ;;  %v683_v9 = vmax.f32 %v536_v17, 0.0  ;;  %v539_v51 = vadd.f32 %v3645_v45, %v538_v47  ;;  %v2638_v48 = vpop.f32.mrb[15].mxu0  ;;  %v2698_v58 = vpop.f32.mrb[15].mxu1 }
 0x1a2   : > { %v1591_v19 = vmul.f32 %v3687_v0, %v1551_v53  ;;  %v713_v59 = vmax.f32 %v656_v50, 0.0  ;;  %v659_v56 = vadd.f32 %v3645_v45, %v658_v63  ;;  %v906_v2 = vpop.permute.xlu1 %905  ;;  %v1215_v52 = vadd.f32 %v1179_v57, %v3703_v61  ;;  %v1280_v48 = vld [vmem:[#allocation2 + $0xfa] sm:$0xff] }
 0x1a3   : > { %v1326_v55 = vadd.f32 %v1290_v1, %v1214_v4  ;;  %v1403_v8 = vadd.f32 %v1367_v20, %v1325_v14  ;;  %v3756_v16 = vmul.f32 %v3667_v49, %v928_v18  ;;  %v3759_v7 = vmul.f32 %v3596_v21, %v683_v9  ;;  %v911_v18 = vpop.permute.xlu0 %910 }
 0x1a4   : > { %v684_v53 = vmax.f32 %v539_v51, 0.0  ;;  %v714_v17 = vmax.f32 %v659_v56, 0.0  ;;  %v959_v47 = vmul.f32 %v901_v13, %v713_v59  ;;  %v1140_v50 = vld [vmem:[#allocation2 + $0x19] sm:$0xff]  ;;  %v1327_v63 = vadd.f32 %v1291_v3, %v1215_v52 }
 0x1a5   : > { %v1252_v44 = vld [vmem:[#allocation2 + $0x1a] sm:$0xff]  ;;  %v1515_v43 = vadd.f32 %v1479_v5, %v1403_v8  ;;  %v3762_v42 = vmul.f32 %v3683_v12, %v1280_v48  ;;  %v3765_v61 = vmul.f32 %v3685_v22, %v1468_v60  ;;  %970 = vst [vmem:[#allocation2 + $0x30] sm:$0xff] %v3759_v7  ;;  %v1180_v13 = vmul.f32 %v3669_v15, %v1140_v50 }
 0x1a6   : > { %v1440_v58 = vld [vmem:[#allocation2 + $0x1b] sm:$0xff]  ;;  %v3769_v21 = vmul.f32 %v3598_v23, %v684_v53  ;;  %1000 = vst [vmem:[#allocation2 + $0x120] sm:$0xff] %v959_v47  ;;  %v960_v14 = vmul.f32 %v906_v2, %v714_v17  ;;  %v1292_v52 = vmul.f32 %v3680_v6, %v1252_v44  ;;  %v543_v8 = vpop.f32.mrb[16].mxu0  ;;  %v663_v20 = vpop.f32.mrb[16].mxu1  ;;  %v1368_v4 = vmul.f32 %v3683_v12, %v1252_v44  ;;  %v1441_v3 = vld [vmem:[#allocation2 + $0x23] sm:$0xff] }
 0x1a7   : > { %4630 = vst [vmem:[#allocation34_spill] sm:$0xff] %v3762_v42  ;;  %4631 = vst [vmem:[#allocation35_spill] sm:$0xff] %v3765_v61  ;;  %v1552_v1 = vld [vmem:[#allocation2 + $0x1c] sm:$0xff]  ;;  %v1480_v5 = vmul.f32 %v3685_v22, %v1440_v58  ;;  %v1553_v9 = vld [vmem:[#allocation2 + $0x24] sm:$0xff]  ;;  %v1627_v51 = vadd.f32 %v1591_v19, %v1515_v43  ;;  %v544_v59 = vadd.f32 %v3645_v45, %v543_v8  ;;  %v2641_v56 = vpop.f32.mrb[17].mxu0  ;;  %v2701_v2 = vpop.f32.mrb[17].mxu1 }
 0x1a8   : > { %v3773_v57 = vld [vmem:[#allocation2 + $0x22] sm:$0xff]  ;;  %v1592_v23 = vmul.f32 %v3687_v0, %v1552_v1  ;;  %971 = vst [vmem:[#allocation2 + $0x38] sm:$0xff] %v3769_v21  ;;  %v664_v60 = vadd.f32 %v3645_v45, %v663_v20  ;;  %1001 = vst [vmem:[#allocation2 + $0x128] sm:$0xff] %v960_v14  ;;  %v1216_v53 = vadd.f32 %v1180_v13, %v3706_v62  ;;  %v546_v17 = vpop.f32.mrb[18].mxu0  ;;  %v666_v47 = vpop.f32.mrb[18].mxu1 }
 0x1a9   : > { %v1369_v44 = vmul.f32 %v3683_v12, %v3773_v57  ;;  %v1404_v48 = vadd.f32 %v1368_v4, %v1326_v55  ;;  %v1481_v50 = vmul.f32 %v3685_v22, %v1441_v3  ;;  %v1593_v43 = vmul.f32 %v3687_v0, %v1553_v9  ;;  %v2642_v8 = vpop.f32.mrb[19].mxu0  ;;  %v2702_v62 = vpop.f32.mrb[19].mxu1  ;;  %v1741_v13 = vld [vmem:[#allocation2 + $0x25] sm:$0xff] }
 0x1aa   : > { %v1669_v19 = vmul.f32 %v3689_v10, %v1553_v9  ;;  %v685_v58 = vmax.f32 %v544_v59, 0.0  ;;  %v547_v1 = vadd.f32 %v3645_v45, %v546_v17  ;;  %v715_v20 = vmax.f32 %v664_v60, 0.0  ;;  %v1853_v56 = vld [vmem:[#allocation2 + $0x26] sm:$0xff] }
 0x1ab   : > { %v667_v14 = vadd.f32 %v3645_v45, %v666_v47  ;;  %v1328_v2 = vadd.f32 %v1292_v52, %v1216_v53  ;;  %v1405_v61 = vadd.f32 %v1369_v44, %v1327_v63  ;;  %v1516_v42 = vadd.f32 %v1480_v5, %v1404_v48 }
 0x1ac   : > { %v1705_v55 = vadd.f32 %v1669_v19, %v1627_v51  ;;  %v3790_v4 = vmul.f32 %v3600_v24, %v685_v58  ;;  %v686_v3 = vmax.f32 %v547_v1, 0.0  ;;  %v961_v9 = vmul.f32 %v911_v18, %v715_v20  ;;  %v3792_v59 = vld [vmem:[#allocation2 + $0x2a] sm:$0xff]  ;;  %v3813_v20 = vld [vmem:[%s4582_s4] ss:$0 sm:$0xff] }
 0x1ad   : > { %v716_v41 = vmax.f32 %v667_v14, 0.0  ;;  %v1442_v17 = vld [vmem:[#allocation2 + $0x2b] sm:$0xff]  ;;  %v1517_v8 = vadd.f32 %v1481_v50, %v1405_v61  ;;  %v1628_v40 = vadd.f32 %v1592_v23, %v1516_v42  ;;  %v1781_v47 = vmul.f32 %v3691_v46, %v1741_v13  ;;  %v916_v42 = vpop.permute.xlu1 %915  ;;  %v921_v23 = vpop.permute.xlu0 %920 }
 0x1ae   : > { %v1554_v60 = vld [vmem:[#allocation2 + $0x2c] sm:$0xff]  ;;  %v1893_v62 = vmul.f32 %v3698_v11, %v1853_v56  ;;  %972 = vst [vmem:[#allocation2 + $0x40] sm:$0xff] %v3790_v4  ;;  %v3798_v63 = vmul.f32 %v3602_v25, %v686_v3  ;;  %1002 = vst [vmem:[#allocation2 + $0x130] sm:$0xff] %v961_v9  ;;  %v1370_v24 = vmul.f32 %v3683_v12, %v3792_v59  ;;  %v551_v51 = vpop.f32.mrb[20].mxu0  ;;  %v671_v50 = vpop.f32.mrb[20].mxu1 }
 0x1af   : > { %v1482_v18 = vmul.f32 %v3685_v22, %v1442_v17  ;;  %v1594_v52 = vmul.f32 %v3687_v0, %v1554_v60  ;;  %v1742_v61 = vld [vmem:[#allocation2 + $0x2d] sm:$0xff]  ;;  %v1629_v53 = vadd.f32 %v1593_v43, %v1517_v8  ;;  %v1670_v44 = vmul.f32 %v3689_v10, %v1554_v60  ;;  %v2645_v1 = vpop.f32.mrb[21].mxu0  ;;  %v1743_v56 = vld [vmem:[#allocation2 + $0x35] sm:$0xff] }
 0x1b0   : > { %v1854_v5 = vld [vmem:[#allocation2 + $0x2e] sm:$0xff]  ;;  %v1782_v48 = vmul.f32 %v3691_v46, %v1742_v61  ;;  %v1817_v25 = vadd.f32 %v1781_v47, %v1705_v55  ;;  %973 = vst [vmem:[#allocation2 + $0x48] sm:$0xff] %v3798_v63  ;;  %v552_v58 = vadd.f32 %v3645_v45, %v551_v51  ;;  %v1406_v14 = vadd.f32 %v1370_v24, %v1328_v2  ;;  %v2705_v55 = vpop.f32.mrb[21].mxu1  ;;  %v554_v3 = vpop.f32.mrb[22].mxu0  ;;  %v1855_v24 = vld [vmem:[#allocation2 + $0x36] sm:$0xff] }
 0x1b1   : > { %v3806_v19 = vld [vmem:[#allocation2 + $0x34] sm:$0xff]  ;;  %v1894_v43 = vmul.f32 %v3698_v11, %v1854_v5  ;;  %v672_v13 = vadd.f32 %v3645_v45, %v671_v50  ;;  %v1706_v9 = vadd.f32 %v1670_v44, %v1628_v40  ;;  %v962_v8 = vmul.f32 %v916_v42, %v716_v41  ;;  %v674_v47 = vpop.f32.mrb[22].mxu1  ;;  %v2646_v1 = vpop.f32.mrb[23].mxu0  ;;  %v1141_v5 = vld [vmem:[#allocation2 + $0x21] sm:$0xff] }
 0x1b2   : > { %v1929_v17 = vadd.f32 %v1893_v62, %v1817_v25  ;;  %v1671_v60 = vmul.f32 %v3689_v10, %v3806_v19  ;;  %v687_v61 = vmax.f32 %v552_v58, 0.0  ;;  %v555_v51 = vadd.f32 %v3645_v45, %v554_v3  ;;  %v2706_v38 = vpop.f32.mrb[23].mxu1  ;;  %v1142_v58 = vld [vmem:[#allocation2 + $0x29] sm:$0xff] }
 0x1b3   : > { %v1518_v39 = vadd.f32 %v1482_v18, %v1406_v14  ;;  %v717_v2 = vmax.f32 %v672_v13, 0.0  ;;  %v1818_v50 = vadd.f32 %v1782_v48, %v1706_v9  ;;  %1003 = vst [vmem:[#allocation2 + $0x138] sm:$0xff] %v962_v8  ;;  %v1783_v41 = vmul.f32 %v3691_v46, %v1743_v56 }
 0x1b4   : > { %v1971_v55 = vadd.f32 %v3813_v20, %v1929_v17  ;;  %v1707_v40 = vadd.f32 %v1671_v60, %v1629_v53  ;;  %v3823_v62 = vmul.f32 %v3604_v26, %v687_v61  ;;  %v688_v42 = vmax.f32 %v555_v51, 0.0 }
 0x1b5   : > { %v1630_v44 = vadd.f32 %v1594_v52, %v1518_v39  ;;  %v963_v25 = vmul.f32 %v921_v23, %v717_v2  ;;  %v1930_v3 = vadd.f32 %v1894_v43, %v1818_v50  ;;  %v1556_v18 = vld [vmem:[#allocation2 + $0x3c] sm:$0xff]  ;;  %v1895_v38 = vmul.f32 %v3698_v11, %v1855_v24  ;;  %v3834_v23 = vld [vmem:[#allocation2 + $0x32] sm:$0xff] }
 0x1b6   : > { %v1744_v14 = vld [vmem:[#allocation2 + $0x3d] sm:$0xff]  ;;  %v1819_v13 = vadd.f32 %v1783_v41, %v1707_v40  ;;  %v1181_v48 = vmul.f32 %v3669_v15, %v1141_v5  ;;  %974 = vst [vmem:[#allocation2 + $0x50] sm:$0xff] %v3823_v62  ;;  %v3829_v53 = vmul.f32 %v3606_v27, %v688_v42  ;;  %v1672_v26 = vmul.f32 %v3689_v10, %v1556_v18  ;;  %v559_v43 = vpop.f32.mrb[24].mxu0  ;;  %v1443_v24 = vld [vmem:[#allocation2 + $0x33] sm:$0xff] }
 0x1b7   : > { %v1856_v47 = vld [vmem:[#allocation2 + $0x3e] sm:$0xff]  ;;  %1004 = vst [vmem:[#allocation2 + $0x140] sm:$0xff] %v963_v25  ;;  %v1784_v39 = vmul.f32 %v3691_v46, %v1744_v14  ;;  %v1972_v56 = vadd.f32 %v3813_v20, %v1930_v3  ;;  %v1182_v17 = vmul.f32 %v3669_v15, %v1142_v58  ;;  %v560_v27 = vadd.f32 %v3645_v45, %v559_v43  ;;  %v2649_v60 = vpop.f32.mrb[25].mxu0 }
 0x1b8   : > { %v1896_v52 = vmul.f32 %v3698_v11, %v1856_v47  ;;  %v1931_v9 = vadd.f32 %v1895_v38, %v1819_v13  ;;  %v1217_v8 = vadd.f32 %v1181_v48, %v3734_v54  ;;  %975 = vst [vmem:[#allocation2 + $0x58] sm:$0xff] %v3829_v53  ;;  %v1708_v61 = vadd.f32 %v1672_v26, %v1630_v44  ;;  %v3841_v51 = vld [vmem:[#allocation2 + $0x3a] sm:$0xff]  ;;  %v562_v50 = vpop.f32.mrb[26].mxu0  ;;  %v3852_v14 = vld [vmem:[#allocation2 + $0x44] sm:$0xff] }
 0x1b9   : > { %v1293_v1 = vmul.f32 %v3680_v6, %v3773_v57  ;;  %v1294_v2 = vmul.f32 %v3680_v6, %v3792_v59  ;;  %v1444_v5 = vld [vmem:[#allocation2 + $0x3b] sm:$0xff]  ;;  %v2007_v40 = vpack.c.bf16 %v1972_v56, %v1971_v55  ;;  %v1218_v41 = vadd.f32 %v1182_v17, %v3756_v16  ;;  %v2650_v58 = vpop.f32.mrb[27].mxu0  ;;  %v1745_v43 = vld [vmem:[#allocation2 + $0x45] sm:$0xff] }
 0x1ba   : > { %v1973_v54 = vadd.f32 %v3813_v20, %v1931_v9  ;;  %v1371_v42 = vmul.f32 %v3683_v12, %v3834_v23  ;;  %v689_v44 = vmax.f32 %v560_v27, 0.0  ;;  %v563_v25 = vadd.f32 %v3645_v45, %v562_v50 }
 0x1bb   : > { %v1820_v3 = vadd.f32 %v1784_v39, %v1708_v61  ;;  %v1329_v57 = vadd.f32 %v1293_v1, %v1217_v8  ;;  %2723 = vmatprep.mubr.bf16.mxu1 %v2007_v40  ;;  %v1330_v59 = vadd.f32 %v1294_v2, %v1218_v41  ;;  %v1372_v55 = vmul.f32 %v3683_v12, %v3841_v51  ;;  %v1857_v39 = vld [vmem:[#allocation2 + $0x46] sm:$0xff]  ;;  %v1144_v41 = vld [vmem:[#allocation2 + $0x39] sm:$0xff] }
 0x1bc   : > { %v1483_v13 = vmul.f32 %v3685_v22, %v1443_v24  ;;  %v1484_v16 = vmul.f32 %v3685_v22, %v1444_v5  ;;  %v3859_v47 = vmul.f32 %v3608_v28, %v689_v44  ;;  %v690_v38 = vmax.f32 %v563_v25, 0.0  ;;  %v1143_v24 = vld [vmem:[#allocation2 + $0x31] sm:$0xff] }
 0x1bd   : > { %v1932_v48 = vadd.f32 %v1896_v52, %v1820_v3  ;;  %v1407_v26 = vadd.f32 %v1371_v42, %v1329_v57  ;;  %v1408_v56 = vadd.f32 %v1372_v55, %v1330_v59  ;;  %v3861_v9 = vld [vmem:[#allocation2 + $0x4c] sm:$0xff]  ;;  %v1595_v17 = vmul.f32 %v3687_v0, %v3806_v19 }
 0x1be   : > { %v1596_v8 = vmul.f32 %v3687_v0, %v1556_v18  ;;  %v1673_v27 = vmul.f32 %v3689_v10, %v3852_v14  ;;  %v1746_v60 = vld [vmem:[#allocation2 + $0x4d] sm:$0xff]  ;;  %976 = vst [vmem:[#allocation2 + $0x60] sm:$0xff] %v3859_v47  ;;  %v3870_v28 = vmul.f32 %v3610_v29, %v690_v38  ;;  %v1674_v2 = vmul.f32 %v3689_v10, %v3861_v9  ;;  %v567_v19 = vpop.f32.mrb[28].mxu0 }
 0x1bf   : > { %v1858_v61 = vld [vmem:[#allocation2 + $0x4e] sm:$0xff]  ;;  %v1974_v52 = vadd.f32 %v3813_v20, %v1932_v48  ;;  %v1519_v1 = vadd.f32 %v1483_v13, %v1407_v26  ;;  %v1520_v5 = vadd.f32 %v1484_v16, %v1408_v56  ;;  %v1785_v18 = vmul.f32 %v3691_v46, %v1745_v43  ;;  %v2653_v42 = vpop.f32.mrb[29].mxu0  ;;  %v3888_v43 = vld [vmem:[#allocation2 + $0x42] sm:$0xff] }
 0x1c0   : > { %v1786_v50 = vmul.f32 %v3691_v46, %v1746_v60  ;;  %v1897_v40 = vmul.f32 %v3698_v11, %v1857_v39  ;;  %977 = vst [vmem:[#allocation2 + $0x68] sm:$0xff] %v3870_v28  ;;  %v568_v29 = vadd.f32 %v3645_v45, %v567_v19  ;;  %v1898_v58 = vmul.f32 %v3698_v11, %v1858_v61  ;;  %v570_v3 = vpop.f32.mrb[30].mxu0  ;;  %v3890_v39 = vld [vmem:[#allocation2 + $0x4a] sm:$0xff] }
 0x1c1   : > { %v2008_v44 = vpack.c.bf16 %v1974_v52, %v1973_v54  ;;  %v1631_v25 = vadd.f32 %v1595_v17, %v1519_v1  ;;  %v1632_v57 = vadd.f32 %v1596_v8, %v1520_v5  ;;  %v1071_v59 = vmul.f32 %v3667_v49, %v3759_v7  ;;  %v2654_v48 = vpop.f32.mrb[31].mxu0  ;;  %v1445_v8 = vld [vmem:[#allocation2 + $0x43] sm:$0xff]  ;;  %v1446_v1 = vld [vmem:[#allocation2 + $0x4b] sm:$0xff] }
 0x1c2   : > { %v1072_v55 = vmul.f32 %v3667_v49, %v3769_v21  ;;  %v1183_v13 = vmul.f32 %v3669_v15, %v1143_v24  ;;  %v691_v16 = vmax.f32 %v568_v29, 0.0  ;;  %v571_v38 = vadd.f32 %v3645_v45, %v570_v3 }
 0x1c3   : > { %2724 = vmatmul.mubr.bf16.vlgmr.msra.gmra.mrb[24].mxu1 %v2008_v44  ;;  %v1709_v26 = vadd.f32 %v1673_v27, %v1631_v25  ;;  %v1184_v54 = vmul.f32 %v3669_v15, %v1144_v41  ;;  %v1710_v56 = vadd.f32 %v1674_v2, %v1632_v57  ;;  %v1295_v7 = vmul.f32 %v3680_v6, %v3834_v23  ;;  %v1747_v57 = vld [vmem:[#allocation2 + $0x55] sm:$0xff] }
 0x1c4   : > { %v1219_v17 = vadd.f32 %v1183_v13, %v1071_v59  ;;  %v1296_v21 = vmul.f32 %v3680_v6, %v3841_v51  ;;  %v3897_v60 = vmul.f32 %v3612_v30, %v691_v16  ;;  %v692_v61 = vmax.f32 %v571_v38, 0.0 }
 0x1c5   : > { %v1821_v27 = vadd.f32 %v1785_v18, %v1709_v26  ;;  %v1220_v52 = vadd.f32 %v1184_v54, %v1072_v55  ;;  %v1822_v24 = vadd.f32 %v1786_v50, %v1710_v56  ;;  %v1373_v2 = vmul.f32 %v3683_v12, %v3888_v43  ;;  %v3908_v18 = vld [vmem:[#allocation2 + $0x54] sm:$0xff]  ;;  %v3910_v29 = vld [vmem:[#allocation2 + $0x5c] sm:$0xff] }
 0x1c6   : > { %v1331_v19 = vadd.f32 %v1295_v7, %v1219_v17  ;;  %v1374_v5 = vmul.f32 %v3683_v12, %v3890_v39  ;;  %978 = vst [vmem:[#allocation2 + $0x70] sm:$0xff] %v3897_v60  ;;  %v3905_v23 = vmul.f32 %v3614_v31, %v692_v61  ;;  %v1485_v41 = vmul.f32 %v3685_v22, %v1445_v8  ;;  %v575_v50 = vpop.f32.mrb[32].mxu0  ;;  %v1748_v16 = vld [vmem:[#allocation2 + $0x5d] sm:$0xff] }
 0x1c7   : > { %v1933_v51 = vadd.f32 %v1897_v40, %v1821_v27  ;;  %v1332_v30 = vadd.f32 %v1296_v21, %v1220_v52  ;;  %v1934_v42 = vadd.f32 %v1898_v58, %v1822_v24  ;;  %v1486_v25 = vmul.f32 %v3685_v22, %v1446_v1  ;;  %v2657_v40 = vpop.f32.mrb[33].mxu0  ;;  %v1859_v58 = vld [vmem:[#allocation2 + $0x56] sm:$0xff]  ;;  %v1860_v56 = vld [vmem:[#allocation2 + $0x5e] sm:$0xff] }
 0x1c8   : > { %v1409_v44 = vadd.f32 %v1373_v2, %v1331_v19  ;;  %v1597_v3 = vmul.f32 %v3687_v0, %v3852_v14  ;;  %979 = vst [vmem:[#allocation2 + $0x78] sm:$0xff] %v3905_v23  ;;  %v576_v31 = vadd.f32 %v3645_v45, %v575_v50  ;;  %v1598_v13 = vmul.f32 %v3687_v0, %v3861_v9  ;;  %v578_v38 = vpop.f32.mrb[34].mxu0  ;;  %v1145_v61 = vld [vmem:[#allocation2 + $0x41] sm:$0xff]  ;;  %v1146_v19 = vld [vmem:[#allocation2 + $0x49] sm:$0xff] }
 0x1c9   : > { %v1975_v59 = vadd.f32 %v3813_v20, %v1933_v51  ;;  %v1410_v55 = vadd.f32 %v1374_v5, %v1332_v30  ;;  %v1976_v48 = vadd.f32 %v3813_v20, %v1934_v42  ;;  %v1675_v14 = vmul.f32 %v3689_v10, %v3908_v18  ;;  %v2658_v21 = vpop.f32.mrb[35].mxu0 }
 0x1ca   : > { %v1521_v26 = vadd.f32 %v1485_v41, %v1409_v44  ;;  %v1676_v54 = vmul.f32 %v3689_v10, %v3910_v29  ;;  %v693_v17 = vmax.f32 %v576_v31, 0.0  ;;  %v579_v7 = vadd.f32 %v3645_v45, %v578_v38  ;;  %v3933_v41 = vld [vmem:[#allocation2 + $0x52] sm:$0xff] }
 0x1cb   : > { %v1522_v8 = vadd.f32 %v1486_v25, %v1410_v55  ;;  %v1787_v9 = vmul.f32 %v3691_v46, %v1747_v57  ;;  %v2009_v27 = vpack.c.bf16 %v1976_v48, %v1975_v59  ;;  %v1788_v1 = vmul.f32 %v3691_v46, %v1748_v16  ;;  %v1447_v59 = vld [vmem:[#allocation2 + $0x53] sm:$0xff] }
 0x1cc   : > { %v1633_v52 = vadd.f32 %v1597_v3, %v1521_v26  ;;  %v1899_v24 = vmul.f32 %v3698_v11, %v1859_v58  ;;  %v3930_v2 = vmul.f32 %v3616_v32, %v693_v17  ;;  %v694_v5 = vmax.f32 %v579_v7, 0.0  ;;  %v3940_v3 = vld [vmem:[#allocation2 + $0x5a] sm:$0xff] }
 0x1cd   : > { %v1634_v51 = vadd.f32 %v1598_v13, %v1522_v8  ;;  %v1900_v30 = vmul.f32 %v3698_v11, %v1860_v56  ;;  %2727 = vmatprep.mubr.bf16.mxu1 %v2009_v27  ;;  %v1073_v42 = vmul.f32 %v3667_v49, %v3790_v4  ;;  %v1074_v44 = vmul.f32 %v3667_v49, %v3798_v63  ;;  %v1448_v4 = vld [vmem:[#allocation2 + $0x5b] sm:$0xff]  ;;  %v3960_v27 = vld [vmem:[#allocation2 + $0x64] sm:$0xff] }
 0x1ce   : > { %v1711_v50 = vadd.f32 %v1675_v14, %v1633_v52  ;;  %v1185_v25 = vmul.f32 %v3669_v15, %v1145_v61  ;;  %980 = vst [vmem:[#allocation2 + $0x80] sm:$0xff] %v3930_v2  ;;  %v3944_v32 = vmul.f32 %v3618_v33, %v694_v5  ;;  %v1186_v31 = vmul.f32 %v3669_v15, %v1146_v19  ;;  %v583_v55 = vpop.f32.mrb[36].mxu0  ;;  %v3962_v52 = vld [vmem:[#allocation2 + $0x6c] sm:$0xff] }
 0x1cf   : > { %v1712_v57 = vadd.f32 %v1676_v54, %v1634_v51  ;;  %v1297_v40 = vmul.f32 %v3680_v6, %v3888_v43  ;;  %v1298_v16 = vmul.f32 %v3680_v6, %v3890_v39  ;;  %v1375_v58 = vmul.f32 %v3683_v12, %v3933_v41  ;;  %v2661_v38 = vpop.f32.mrb[37].mxu0 }
 0x1d0   : > { %v1823_v13 = vadd.f32 %v1787_v9, %v1711_v50  ;;  %v1221_v63 = vadd.f32 %v1185_v25, %v1073_v42  ;;  %981 = vst [vmem:[#allocation2 + $0x88] sm:$0xff] %v3944_v32  ;;  %v584_v33 = vadd.f32 %v3645_v45, %v583_v55  ;;  %v1222_v26 = vadd.f32 %v1186_v31, %v1074_v44  ;;  %v586_v14 = vpop.f32.mrb[38].mxu0  ;;  %v1750_v50 = vld [vmem:[#allocation2 + $0x6d] sm:$0xff] }
 0x1d1   : > { %v1824_v48 = vadd.f32 %v1788_v1, %v1712_v57  ;;  %v1376_v43 = vmul.f32 %v3683_v12, %v3940_v3  ;;  %v1487_v17 = vmul.f32 %v3685_v22, %v1447_v59  ;;  %v1488_v39 = vmul.f32 %v3685_v22, %v1448_v4  ;;  %v2662_v8 = vpop.f32.mrb[39].mxu0  ;;  %v1749_v1 = vld [vmem:[#allocation2 + $0x65] sm:$0xff]  ;;  %v1862_v31 = vld [vmem:[#allocation2 + $0x6e] sm:$0xff] }
 0x1d2   : > { %v1935_v54 = vadd.f32 %v1899_v24, %v1823_v13  ;;  %v1333_v56 = vadd.f32 %v1297_v40, %v1221_v63  ;;  %v695_v7 = vmax.f32 %v584_v33, 0.0  ;;  %v587_v21 = vadd.f32 %v3645_v45, %v586_v14  ;;  %v1861_v57 = vld [vmem:[#allocation2 + $0x66] sm:$0xff] }
 0x1d3   : > { %v1936_v9 = vadd.f32 %v1900_v30, %v1824_v48  ;;  %v1334_v61 = vadd.f32 %v1298_v16, %v1222_v26  ;;  %v1599_v24 = vmul.f32 %v3687_v0, %v3908_v18  ;;  %v1600_v51 = vmul.f32 %v3687_v0, %v3910_v29  ;;  %v1147_v29 = vld [vmem:[#allocation2 + $0x51] sm:$0xff]  ;;  %v1148_v16 = vld [vmem:[#allocation2 + $0x59] sm:$0xff] }
 0x1d4   : > { %v1977_v19 = vadd.f32 %v3813_v20, %v1935_v54  ;;  %v1411_v5 = vadd.f32 %v1375_v58, %v1333_v56  ;;  %v3970_v42 = vmul.f32 %v3620_v34, %v695_v7  ;;  %v696_v30 = vmax.f32 %v587_v21, 0.0 }
 0x1d5   : > { %v1978_v44 = vadd.f32 %v3813_v20, %v1936_v9  ;;  %v1412_v25 = vadd.f32 %v1376_v43, %v1334_v61  ;;  %v1677_v59 = vmul.f32 %v3689_v10, %v3960_v27  ;;  %v1678_v18 = vmul.f32 %v3689_v10, %v3962_v52 }
 0x1d6   : > { %v1523_v40 = vadd.f32 %v1487_v17, %v1411_v5  ;;  %v1789_v4 = vmul.f32 %v3691_v46, %v1749_v1  ;;  %982 = vst [vmem:[#allocation2 + $0x90] sm:$0xff] %v3970_v42  ;;  %v3980_v34 = vmul.f32 %v3622_v35, %v696_v30  ;;  %v1790_v63 = vmul.f32 %v3691_v46, %v1750_v50  ;;  %v591_v58 = vpop.f32.mrb[40].mxu0  ;;  %v3992_v17 = vld [vmem:[#allocation2 + $0x62] sm:$0xff] }
 0x1d7   : > { %v2010_v55 = vpack.c.bf16 %v1978_v44, %v1977_v19  ;;  %v1524_v13 = vadd.f32 %v1488_v39, %v1412_v25  ;;  %v1901_v38 = vmul.f32 %v3698_v11, %v1861_v57  ;;  %v1902_v48 = vmul.f32 %v3698_v11, %v1862_v31  ;;  %v2665_v43 = vpop.f32.mrb[41].mxu0  ;;  %v3994_v39 = vld [vmem:[#allocation2 + $0x6a] sm:$0xff] }
 0x1d8   : > { %v1635_v33 = vadd.f32 %v1599_v24, %v1523_v40  ;;  %v1075_v26 = vmul.f32 %v3667_v49, %v3823_v62  ;;  %983 = vst [vmem:[#allocation2 + $0x98] sm:$0xff] %v3980_v34  ;;  %v592_v35 = vadd.f32 %v3645_v45, %v591_v58  ;;  %v1076_v54 = vmul.f32 %v3667_v49, %v3829_v53  ;;  %v594_v7 = vpop.f32.mrb[42].mxu0  ;;  %v1449_v24 = vld [vmem:[#allocation2 + $0x63] sm:$0xff] }
 0x1d9   : > { %2728 = vmatmul.mubr.bf16.gmra.mrb[28].mxu1 %v2010_v55  ;;  %v1636_v14 = vadd.f32 %v1600_v51, %v1524_v13  ;;  %v1187_v56 = vmul.f32 %v3669_v15, %v1147_v29  ;;  %v1188_v62 = vmul.f32 %v3669_v15, %v1148_v16  ;;  %v1299_v8 = vmul.f32 %v3680_v6, %v3933_v41  ;;  %v2666_v53 = vpop.f32.mrb[43].mxu0  ;;  %v1450_v51 = vld [vmem:[#allocation2 + $0x6b] sm:$0xff]  ;;  %v4013_v29 = vld [vmem:[#allocation2 + $0x7c] sm:$0xff] }
 0x1da   : > { %v1713_v21 = vadd.f32 %v1677_v59, %v1635_v33  ;;  %v1300_v9 = vmul.f32 %v3680_v6, %v3940_v3  ;;  %v697_v61 = vmax.f32 %v592_v35, 0.0  ;;  %v595_v1 = vadd.f32 %v3645_v45, %v594_v7  ;;  %v4009_v45 = vld [vmem:[#allocation2 + $0x74] sm:$0xff]  ;;  %v1752_v58 = vld [vmem:[#allocation2 + $0x7d] sm:$0xff] }
 0x1db   : > { %v1714_v19 = vadd.f32 %v1678_v18, %v1636_v14  ;;  %v1223_v5 = vadd.f32 %v1187_v56, %v1075_v26  ;;  %v1224_v30 = vadd.f32 %v1188_v62, %v1076_v54  ;;  %v1377_v44 = vmul.f32 %v3683_v12, %v3992_v17  ;;  %v1751_v16 = vld [vmem:[#allocation2 + $0x75] sm:$0xff] }
 0x1dc   : > { %v1825_v50 = vadd.f32 %v1789_v4, %v1713_v21  ;;  %v1378_v25 = vmul.f32 %v3683_v12, %v3994_v39  ;;  %v4007_v41 = vmul.f32 %v3624_v36, %v697_v61  ;;  %v698_v3 = vmax.f32 %v595_v1, 0.0  ;;  %v1863_v33 = vld [vmem:[#allocation2 + $0x76] sm:$0xff]  ;;  %v1149_v1 = vld [vmem:[#allocation2 + $0x61] sm:$0xff] }
 0x1dd   : > { %v1826_v57 = vadd.f32 %v1790_v63, %v1714_v19  ;;  %v1335_v31 = vadd.f32 %v1299_v8, %v1223_v5  ;;  %v1336_v59 = vadd.f32 %v1300_v9, %v1224_v30  ;;  %v1489_v18 = vmul.f32 %v3685_v22, %v1449_v24 }
 0x1de   : > { %v1937_v40 = vadd.f32 %v1901_v38, %v1825_v50  ;;  %v1490_v4 = vmul.f32 %v3685_v22, %v1450_v51  ;;  %984 = vst [vmem:[#allocation2 + $0xa0] sm:$0xff] %v4007_v41  ;;  %v4017_v55 = vmul.f32 %v3626_v37, %v698_v3  ;;  %v1601_v63 = vmul.f32 %v3687_v0, %v3960_v27  ;;  %v599_v26 = vpop.f32.mrb[44].mxu0  ;;  %v4031_v27 = vld [vmem:[%s4580_s2] ss:$0 sm:$0xff]  ;;  %v1150_v50 = vld [vmem:[#allocation2 + $0x69] sm:$0xff] }
 0x1df   : > { %v1938_v36 = vadd.f32 %v1902_v48, %v1826_v57  ;;  %v1413_v13 = vadd.f32 %v1377_v44, %v1335_v31  ;;  %v1414_v35 = vadd.f32 %v1378_v25, %v1336_v59  ;;  %v1602_v43 = vmul.f32 %v3687_v0, %v3962_v52  ;;  %v2669_v54 = vpop.f32.mrb[45].mxu0  ;;  %v1864_v52 = vld [vmem:[#allocation2 + $0x7e] sm:$0xff]  ;;  %v4045_v57 = vld [vmem:[#allocation2 + $0x72] sm:$0xff]  ;;  %v4632_v31 = vld [vmem:[#allocation17_spill] sm:$0xff] }
 0x1e0   : > { %v1979_v38 = vadd.f32 %v3813_v20, %v1937_v40  ;;  %v1679_v14 = vmul.f32 %v3689_v10, %v4009_v45  ;;  %985 = vst [vmem:[#allocation2 + $0xa8] sm:$0xff] %v4017_v55  ;;  %v600_v48 = vadd.f32 %v4031_v27, %v599_v26  ;;  %v1680_v7 = vmul.f32 %v3689_v10, %v4013_v29  ;;  %v602_v21 = vpop.f32.mrb[46].mxu0 }
 0x1e1   : > { %v1980_v37 = vadd.f32 %v3813_v20, %v1938_v36  ;;  %v1525_v56 = vadd.f32 %v1489_v18, %v1413_v13  ;;  %v1526_v62 = vadd.f32 %v1490_v4, %v1414_v35  ;;  %v1791_v8 = vmul.f32 %v3691_v46, %v1751_v16  ;;  %v2670_v24 = vpop.f32.mrb[47].mxu0  ;;  %v4051_v36 = vld [vmem:[#allocation2 + $0x7a] sm:$0xff] }
 0x1e2   : > { %v1792_v9 = vmul.f32 %v3691_v46, %v1752_v58  ;;  %v1903_v61 = vmul.f32 %v3698_v11, %v1863_v33  ;;  %v699_v19 = vmax.f32 %v600_v48, 0.0  ;;  %v603_v5 = vadd.f32 %v4031_v27, %v602_v21  ;;  %v1451_v13 = vld [vmem:[#allocation2 + $0x73] sm:$0xff]  ;;  %v1452_v16 = vld [vmem:[#allocation2 + $0x7b] sm:$0xff]  ;;  %v4070_v21 = vld [vmem:[#allocation2 + $0x84] sm:$0xff] }
 0x1e3   : > { %v2011_v53 = vpack.c.bf16 %v1980_v37, %v1979_v38  ;;  %v1637_v51 = vadd.f32 %v1601_v63, %v1525_v56  ;;  %v1638_v30 = vadd.f32 %v1602_v43, %v1526_v62  ;;  %v1904_v44 = vmul.f32 %v3698_v11, %v1864_v52  ;;  %v4633_v58 = vld [vmem:[#allocation18_spill] sm:$0xff] }
 0x1e4   : > { %v1077_v25 = vmul.f32 %v3667_v49, %v3859_v47  ;;  %v1078_v3 = vmul.f32 %v3667_v49, %v3870_v28  ;;  %v4048_v40 = vmul.f32 %v4632_v31, %v699_v19  ;;  %v700_v59 = vmax.f32 %v603_v5, 0.0  ;;  %v4072_v62 = vld [vmem:[#allocation2 + $0x8c] sm:$0xff] }
 0x1e5   : > { %2731 = vmatprep.mubr.bf16.mxu1 %v2011_v53  ;;  %v1715_v18 = vadd.f32 %v1679_v14, %v1637_v51  ;;  %v1189_v4 = vmul.f32 %v3669_v15, %v1149_v1  ;;  %v1716_v11 = vadd.f32 %v1680_v7, %v1638_v30  ;;  %v1190_v63 = vmul.f32 %v3669_v15, %v1150_v50 }
 0x1e6   : > { %v1301_v47 = vmul.f32 %v3680_v6, %v3992_v17  ;;  %v1302_v28 = vmul.f32 %v3680_v6, %v3994_v39  ;;  %986 = vst [vmem:[#allocation2 + $0xb0] sm:$0xff] %v4048_v40  ;;  %v4060_v33 = vmul.f32 %v4633_v58, %v700_v59  ;;  %v1379_v35 = vmul.f32 %v3683_v12, %v4045_v57  ;;  %v607_v14 = vpop.f32.mrb[48].mxu0 }
 0x1e7   : > { %v1827_v38 = vadd.f32 %v1791_v8, %v1715_v18  ;;  %v1225_v26 = vadd.f32 %v1189_v4, %v1077_v25  ;;  %v1828_v43 = vadd.f32 %v1792_v9, %v1716_v11  ;;  %v1226_v37 = vadd.f32 %v1190_v63, %v1078_v3  ;;  %v2673_v56 = vpop.f32.mrb[49].mxu0  ;;  %v1754_v25 = vld [vmem:[#allocation2 + $0x8d] sm:$0xff]  ;;  %v4634_v18 = vld [vmem:[#allocation19_spill] sm:$0xff] }
 0x1e8   : > { %v1380_v17 = vmul.f32 %v3683_v12, %v4051_v36  ;;  %v1491_v48 = vmul.f32 %v3685_v22, %v1451_v13  ;;  %987 = vst [vmem:[#allocation2 + $0xb8] sm:$0xff] %v4060_v33  ;;  %v608_v54 = vadd.f32 %v4031_v27, %v607_v14  ;;  %v1492_v52 = vmul.f32 %v3685_v22, %v1452_v16  ;;  %v610_v9 = vpop.f32.mrb[50].mxu0  ;;  %v1865_v3 = vld [vmem:[#allocation2 + $0x86] sm:$0xff] }
 0x1e9   : > { %v1939_v39 = vadd.f32 %v1903_v61, %v1827_v38  ;;  %v1337_v7 = vadd.f32 %v1301_v47, %v1225_v26  ;;  %v1940_v8 = vadd.f32 %v1904_v44, %v1828_v43  ;;  %v1338_v1 = vadd.f32 %v1302_v28, %v1226_v37  ;;  %v1753_v61 = vld [vmem:[#allocation2 + $0x85] sm:$0xff]  ;;  %v2674_v50 = vpop.f32.mrb[51].mxu0  ;;  %v1151_v47 = vld [vmem:[#allocation2 + $0x71] sm:$0xff]  ;;  %v1152_v28 = vld [vmem:[#allocation2 + $0x79] sm:$0xff] }
 0x1ea   : > { %v1603_v53 = vmul.f32 %v3687_v0, %v4009_v45  ;;  %v1604_v19 = vmul.f32 %v3687_v0, %v4013_v29  ;;  %v701_v24 = vmax.f32 %v608_v54, 0.0  ;;  %v611_v51 = vadd.f32 %v4031_v27, %v610_v9  ;;  %v1866_v29 = vld [vmem:[#allocation2 + $0x8e] sm:$0xff]  ;;  %v4090_v26 = vld [vmem:[#allocation8 + $0x8] ss:$0 sm:$0xff] }
 0x1eb   : > { %v1981_v5 = vadd.f32 %v3813_v20, %v1939_v39  ;;  %v1415_v30 = vadd.f32 %v1379_v35, %v1337_v7  ;;  %v1982_v44 = vadd.f32 %v3813_v20, %v1940_v8  ;;  %v1416_v31 = vadd.f32 %v1380_v17, %v1338_v1  ;;  %v4635_v43 = vld [vmem:[#allocation20_spill] sm:$0xff]  ;;  %v4106_v9 = vld [vmem:[#allocation2 + $0x8a] sm:$0xff] }
 0x1ec   : > { %v1681_v59 = vmul.f32 %v3689_v10, %v4070_v21  ;;  %v1682_v45 = vmul.f32 %v3689_v10, %v4072_v62  ;;  %v4086_v4 = vmul.f32 %v4634_v18, %v701_v24  ;;  %v702_v13 = vmax.f32 %v611_v51, 0.0  ;;  %v4100_v39 = vld [vmem:[#allocation2 + $0x82] sm:$0xff] }
 0x1ed   : > { %v1527_v11 = vadd.f32 %v1491_v48, %v1415_v30  ;;  %v1793_v63 = vmul.f32 %v3691_v46, %v1753_v61  ;;  %v2012_v16 = vpack.c.bf16 %v1982_v44, %v1981_v5  ;;  %v1528_v58 = vadd.f32 %v1492_v52, %v1416_v31  ;;  %v1453_v5 = vld [vmem:[#allocation2 + $0x83] sm:$0xff] }
 0x1ee   : > { %v1794_v38 = vmul.f32 %v3691_v46, %v1754_v25  ;;  %v1905_v35 = vmul.f32 %v4090_v26, %v1865_v3  ;;  %988 = vst [vmem:[#allocation2 + $0xc0] sm:$0xff] %v4086_v4  ;;  %v4095_v14 = vmul.f32 %v4635_v43, %v702_v13  ;;  %v1906_v17 = vmul.f32 %v4090_v26, %v1866_v29  ;;  %v615_v56 = vpop.f32.mrb[52].mxu0  ;;  %v1454_v25 = vld [vmem:[#allocation2 + $0x8b] sm:$0xff]  ;;  %v4120_v13 = vld [vmem:[#allocation2 + $0x94] sm:$0xff] }
 0x1ef   : > { %v1639_v37 = vadd.f32 %v1603_v53, %v1527_v11  ;;  %v1079_v48 = vmul.f32 %v3667_v49, %v3897_v60  ;;  %2732 = vmatmul.mubr.bf16.gmra.mrb[32].mxu1 %v2012_v16  ;;  %v1640_v54 = vadd.f32 %v1604_v19, %v1528_v58  ;;  %v1080_v7 = vmul.f32 %v3667_v49, %v3905_v23  ;;  %v2677_v60 = vpop.f32.mrb[53].mxu0  ;;  %v4126_v58 = vld [vmem:[#allocation2 + $0x9c] sm:$0xff] }
 0x1f0   : > { %v1191_v52 = vmul.f32 %v3669_v15, %v1151_v47  ;;  %v1192_v8 = vmul.f32 %v3669_v15, %v1152_v28  ;;  %989 = vst [vmem:[#allocation2 + $0xc8] sm:$0xff] %v4095_v14  ;;  %v616_v53 = vadd.f32 %v4031_v27, %v615_v56  ;;  %v1303_v61 = vmul.f32 %v3680_v6, %v4045_v57  ;;  %v618_v24 = vpop.f32.mrb[54].mxu0  ;;  %v4636_v47 = vld [vmem:[#allocation21_spill] sm:$0xff]  ;;  %v1755_v43 = vld [vmem:[#allocation2 + $0x95] sm:$0xff]  ;;  %v1756_v56 = vld [vmem:[#allocation2 + $0x9d] sm:$0xff] }
 0x1f1   : > { %v1717_v1 = vadd.f32 %v1681_v59, %v1639_v37  ;;  %v1304_v19 = vmul.f32 %v3680_v6, %v4051_v36  ;;  %v1718_v23 = vadd.f32 %v1682_v45, %v1640_v54  ;;  %v1381_v30 = vmul.f32 %v3683_v12, %v4100_v39  ;;  %v2678_v59 = vpop.f32.mrb[55].mxu0 }
 0x1f2   : > { %v1227_v51 = vadd.f32 %v1191_v52, %v1079_v48  ;;  %v1228_v50 = vadd.f32 %v1192_v8, %v1080_v7  ;;  %v703_v44 = vmax.f32 %v616_v53, 0.0  ;;  %v619_v31 = vadd.f32 %v4031_v27, %v618_v24  ;;  %v1867_v7 = vld [vmem:[#allocation2 + $0x96] sm:$0xff]  ;;  %v1868_v52 = vld [vmem:[#allocation2 + $0x9e] sm:$0xff] }
 0x1f3   : > { %v1829_v3 = vadd.f32 %v1793_v63, %v1717_v1  ;;  %v1382_v57 = vmul.f32 %v3683_v12, %v4106_v9  ;;  %v1830_v29 = vadd.f32 %v1794_v38, %v1718_v23  ;;  %v1493_v45 = vmul.f32 %v3685_v22, %v1453_v5  ;;  %v4637_v8 = vld [vmem:[#allocation22_spill] sm:$0xff]  ;;  %v1153_v23 = vld [vmem:[#allocation2 + $0x81] sm:$0xff] }
 0x1f4   : > { %v1339_v18 = vadd.f32 %v1303_v61, %v1227_v51  ;;  %v1340_v36 = vadd.f32 %v1304_v19, %v1228_v50  ;;  %v4123_v28 = vmul.f32 %v4636_v47, %v703_v44  ;;  %v704_v16 = vmax.f32 %v619_v31, 0.0 }
 0x1f5   : > { %v1941_v11 = vadd.f32 %v1905_v35, %v1829_v3  ;;  %v1494_v63 = vmul.f32 %v3685_v22, %v1454_v25  ;;  %v1942_v37 = vadd.f32 %v1906_v17, %v1830_v29  ;;  %v1605_v38 = vmul.f32 %v3687_v0, %v4070_v21  ;;  %v1154_v25 = vld [vmem:[#allocation2 + $0x89] sm:$0xff] }
 0x1f6   : > { %v1417_v48 = vadd.f32 %v1381_v30, %v1339_v18  ;;  %v1418_v54 = vadd.f32 %v1382_v57, %v1340_v36  ;;  %990 = vst [vmem:[#allocation2 + $0xd0] sm:$0xff] %v4123_v28  ;;  %v4133_v1 = vmul.f32 %v4637_v8, %v704_v16  ;;  %v1606_v53 = vmul.f32 %v3687_v0, %v4072_v62  ;;  %v623_v5 = vpop.f32.mrb[56].mxu0 }
 0x1f7   : > { %v1983_v35 = vadd.f32 %v3813_v20, %v1941_v11  ;;  %v1683_v17 = vmul.f32 %v3689_v10, %v4120_v13  ;;  %v1984_v60 = vadd.f32 %v3813_v20, %v1942_v37  ;;  %v1684_v19 = vmul.f32 %v3689_v10, %v4126_v58  ;;  %v2681_v30 = vpop.f32.mrb[57].mxu0  ;;  %v1267_v37 = vld [vmem:[#allocation2 + $0x92] sm:$0xff] }
 0x1f8   : > { %v1529_v61 = vadd.f32 %v1493_v45, %v1417_v48  ;;  %v1530_v21 = vadd.f32 %v1494_v63, %v1418_v54  ;;  %991 = vst [vmem:[#allocation2 + $0xd8] sm:$0xff] %v4133_v1  ;;  %v1795_v24 = vmul.f32 %v3691_v46, %v1755_v43  ;;  %v1796_v51 = vmul.f32 %v3691_v46, %v1756_v56  ;;  %v626_v57 = vpop.f32.mrb[58].mxu0  ;;  %v1268_v48 = vld [vmem:[#allocation2 + $0x9a] sm:$0xff]  ;;  %v1757_v30 = vld [vmem:[#allocation2 + $0xa5] sm:$0xff] }
 0x1f9   : > { %v1907_v62 = vmul.f32 %v4090_v26, %v1867_v7  ;;  %v1908_v50 = vmul.f32 %v4090_v26, %v1868_v52  ;;  %v2013_v3 = vpack.c.bf16 %v1984_v60, %v1983_v35  ;;  %v624_v59 = vadd.f32 %v4031_v27, %v623_v5  ;;  %v2682_v18 = vpop.f32.mrb[59].mxu0  ;;  %v1455_v56 = vld [vmem:[#allocation2 + $0x93] sm:$0xff] }
 0x1fa   : > { %v1641_v44 = vadd.f32 %v1605_v38, %v1529_v61  ;;  %v1642_v31 = vadd.f32 %v1606_v53, %v1530_v21  ;;  %v627_v29 = vadd.f32 %v4031_v27, %v626_v57  ;;  %v1081_v36 = vmul.f32 %v3667_v49, %v3930_v2  ;;  %v4638_v52 = vld [vmem:[#allocation23_spill] sm:$0xff] }
 0x1fb   : > { %v1082_v45 = vmul.f32 %v3667_v49, %v3944_v32  ;;  %v1193_v11 = vmul.f32 %v3669_v15, %v1153_v23  ;;  %2735 = vmatprep.mubr.bf16.mxu1 %v2013_v3  ;;  %v705_v63 = vmax.f32 %v624_v59, 0.0  ;;  %v1194_v43 = vmul.f32 %v3669_v15, %v1154_v25  ;;  %v1456_v53 = vld [vmem:[#allocation2 + $0x9b] sm:$0xff]  ;;  %v1758_v25 = vld [vmem:[#allocation2 + $0xad] sm:$0xff] }
 0x1fc   : > { %v1719_v47 = vadd.f32 %v1683_v17, %v1641_v44  ;;  %v1720_v16 = vadd.f32 %v1684_v19, %v1642_v31  ;;  %v706_v54 = vmax.f32 %v627_v29, 0.0  ;;  %v1305_v27 = vmul.f32 %v3680_v6, %v4100_v39  ;;  %v4639_v17 = vld [vmem:[#allocation24_spill] sm:$0xff]  ;;  %v1870_v59 = vld [vmem:[#allocation2 + $0xae] sm:$0xff] }
 0x1fd   : > { %v1229_v38 = vadd.f32 %v1193_v11, %v1081_v36  ;;  %v1306_v2 = vmul.f32 %v3680_v6, %v4106_v9  ;;  %v4160_v35 = vmul.f32 %v4638_v52, %v705_v63  ;;  %v1230_v8 = vadd.f32 %v1194_v43, %v1082_v45  ;;  %v1569_v39 = vld [vmem:[#allocation2 + $0xa4] sm:$0xff]  ;;  %v1155_v45 = vld [vmem:[#allocation2 + $0x91] sm:$0xff]  ;;  %v1156_v63 = vld [vmem:[#allocation2 + $0x99] sm:$0xff] }
 0x1fe   : > { %v1831_v32 = vadd.f32 %v1795_v24, %v1719_v47  ;;  %v1832_v7 = vadd.f32 %v1796_v51, %v1720_v16  ;;  %v4163_v60 = vmul.f32 %v4639_v17, %v706_v54  ;;  %v1383_v21 = vmul.f32 %v3683_v12, %v1267_v37  ;;  %v1570_v51 = vld [vmem:[#allocation2 + $0xac] sm:$0xff]  ;;  %v1457_v52 = vld [vmem:[#allocation2 + $0xa3] sm:$0xff] }
 0x1ff   : > { %v1341_v61 = vadd.f32 %v1305_v27, %v1229_v38  ;;  %v1384_v19 = vmul.f32 %v3683_v12, %v1268_v48  ;;  %992 = vst [vmem:[#allocation2 + $0xe0] sm:$0xff] %v4160_v35  ;;  %v1342_v9 = vadd.f32 %v1306_v2, %v1230_v8  ;;  %v1495_v24 = vmul.f32 %v3685_v22, %v1455_v56  ;;  %v1269_v27 = vld [vmem:[#allocation2 + $0xa2] sm:$0xff]  ;;  %v1458_v8 = vld [vmem:[#allocation2 + $0xab] sm:$0xff] }
 0x200   : > { %v1943_v5 = vadd.f32 %v1907_v62, %v1831_v32  ;;  %v1944_v23 = vadd.f32 %v1908_v50, %v1832_v7  ;;  %993 = vst [vmem:[#allocation2 + $0xe8] sm:$0xff] %v4163_v60  ;;  %v1496_v44 = vmul.f32 %v3685_v22, %v1456_v53  ;;  %v1607_v31 = vmul.f32 %v3687_v0, %v4120_v13  ;;  %v1869_v50 = vld [vmem:[#allocation2 + $0xa6] sm:$0xff] }
 0x201   : > { %v1419_v3 = vadd.f32 %v1383_v21, %v1341_v61  ;;  %v1608_v62 = vmul.f32 %v3687_v0, %v4126_v58  ;;  %v1420_v18 = vadd.f32 %v1384_v19, %v1342_v9  ;;  %v1685_v36 = vmul.f32 %v3689_v10, %v1569_v39  ;;  %v1571_v9 = vld [vmem:[#allocation2 + $0xb4] sm:$0xff] }
 0x202   : > { %v1985_v57 = vadd.f32 %v3813_v20, %v1943_v5  ;;  %v1986_v29 = vadd.f32 %v3813_v20, %v1944_v23  ;;  %v1686_v47 = vmul.f32 %v3689_v10, %v1570_v51  ;;  %v1797_v16 = vmul.f32 %v3691_v46, %v1757_v30  ;;  %v1270_v20 = vld [vmem:[#allocation2 + $0xaa] sm:$0xff] }
 0x203   : > { %v1531_v11 = vadd.f32 %v1495_v24, %v1419_v3  ;;  %v1798_v13 = vmul.f32 %v3691_v46, %v1758_v25  ;;  %v1532_v58 = vadd.f32 %v1496_v44, %v1420_v18  ;;  %v1909_v54 = vmul.f32 %v4090_v26, %v1869_v50  ;;  %v1759_v44 = vld [vmem:[#allocation2 + $0xb5] sm:$0xff] }
 0x204   : > { %v2014_v43 = vpack.c.bf16 %v1986_v29, %v1985_v57  ;;  %v1910_v38 = vmul.f32 %v4090_v26, %v1870_v59  ;;  %v1083_v56 = vmul.f32 %v3667_v49, %v3970_v42  ;;  %v1084_v32 = vmul.f32 %v3667_v49, %v3980_v34  ;;  %v4193_v34 = vld [vmem:[#allocation2 + $0xbc] sm:$0xff] }
 0x205   : > { %v1643_v2 = vadd.f32 %v1607_v31, %v1531_v11  ;;  %v1195_v7 = vmul.f32 %v3669_v15, %v1155_v45  ;;  %v1644_v53 = vadd.f32 %v1608_v62, %v1532_v58  ;;  %v1196_v17 = vmul.f32 %v3669_v15, %v1156_v63  ;;  %v1760_v31 = vld [vmem:[#allocation2 + $0xbd] sm:$0xff]  ;;  %v1158_v58 = vld [vmem:[#allocation2 + $0xa9] sm:$0xff] }
 0x206   : > { %2736 = vmatmul.mubr.bf16.gmra.mrb[36].mxu1 %v2014_v43  ;;  %v1307_v61 = vmul.f32 %v3680_v6, %v1267_v37  ;;  %v1308_v21 = vmul.f32 %v3680_v6, %v1268_v48  ;;  %v1385_v23 = vmul.f32 %v3683_v12, %v1269_v27  ;;  %v1386_v42 = vmul.f32 %v3683_v12, %v1270_v20  ;;  %v1871_v59 = vld [vmem:[#allocation2 + $0xb6] sm:$0xff]  ;;  %v1872_v57 = vld [vmem:[#allocation2 + $0xbe] sm:$0xff] }
 0x207   : > { %v1721_v19 = vadd.f32 %v1685_v36, %v1643_v2  ;;  %v1231_v5 = vadd.f32 %v1195_v7, %v1083_v56  ;;  %v1722_v24 = vadd.f32 %v1686_v47, %v1644_v53  ;;  %v1232_v30 = vadd.f32 %v1196_v17, %v1084_v32  ;;  %v1157_v43 = vld [vmem:[#allocation2 + $0xa1] sm:$0xff]  ;;  %v4206_v56 = vld [vmem:[#allocation2 + $0xb2] sm:$0xff]  ;;  %v4211_v32 = vld [vmem:[%s4582_s4] ss:$0 sm:$0xff] }
 0x208   : > { %v1497_v25 = vmul.f32 %v3685_v22, %v1457_v52  ;;  %v1498_v3 = vmul.f32 %v3685_v22, %v1458_v8  ;;  %v1609_v48 = vmul.f32 %v3687_v0, %v1569_v39  ;;  %v1610_v50 = vmul.f32 %v3687_v0, %v1570_v51 }
 0x209   : > { %v1833_v37 = vadd.f32 %v1797_v16, %v1721_v19  ;;  %v1343_v62 = vadd.f32 %v1307_v61, %v1231_v5  ;;  %v1834_v29 = vadd.f32 %v1798_v13, %v1722_v24  ;;  %v1344_v18 = vadd.f32 %v1308_v21, %v1232_v30  ;;  %v1272_v21 = vld [vmem:[#allocation2 + $0xba] sm:$0xff] }
 0x20a   : > { %v1687_v36 = vmul.f32 %v3689_v10, %v1571_v9  ;;  %v1688_v45 = vmul.f32 %v3689_v10, %v4193_v34  ;;  %v1799_v63 = vmul.f32 %v3691_v46, %v1759_v44  ;;  %v1800_v16 = vmul.f32 %v3691_v46, %v1760_v31  ;;  %v1459_v19 = vld [vmem:[#allocation2 + $0xb3] sm:$0xff]  ;;  %v1460_v5 = vld [vmem:[#allocation2 + $0xbb] sm:$0xff] }
 0x20b   : > { %v1945_v11 = vadd.f32 %v1909_v54, %v1833_v37  ;;  %v1421_v47 = vadd.f32 %v1385_v23, %v1343_v62  ;;  %v1946_v39 = vadd.f32 %v1910_v38, %v1834_v29  ;;  %v1422_v2 = vadd.f32 %v1386_v42, %v1344_v18  ;;  %v4227_v31 = vld [vmem:[#allocation2 + $0xcc] sm:$0xff] }
 0x20c   : > { %v1911_v51 = vmul.f32 %v4090_v26, %v1871_v59  ;;  %v1912_v13 = vmul.f32 %v4090_v26, %v1872_v57  ;;  %v1085_v52 = vmul.f32 %v3667_v49, %v4007_v41  ;;  %v1086_v38 = vmul.f32 %v3667_v49, %v4017_v55  ;;  %v1761_v59 = vld [vmem:[#allocation2 + $0xc5] sm:$0xff]  ;;  %v1762_v18 = vld [vmem:[#allocation2 + $0xcd] sm:$0xff] }
 0x20d   : > { %v1987_v54 = vadd.f32 %v4211_v32, %v1945_v11  ;;  %v1533_v7 = vadd.f32 %v1497_v25, %v1421_v47  ;;  %v1988_v8 = vadd.f32 %v4211_v32, %v1946_v39  ;;  %v1534_v53 = vadd.f32 %v1498_v3, %v1422_v2  ;;  %v4225_v3 = vld [vmem:[#allocation2 + $0xc4] sm:$0xff]  ;;  %v1874_v47 = vld [vmem:[#allocation2 + $0xce] sm:$0xff] }
 0x20e   : > { %v1197_v17 = vmul.f32 %v3669_v15, %v1157_v43  ;;  %v1198_v61 = vmul.f32 %v3669_v15, %v1158_v58  ;;  %v1309_v42 = vmul.f32 %v3680_v6, %v1269_v27  ;;  %v1310_v24 = vmul.f32 %v3680_v6, %v1270_v20  ;;  %v1873_v11 = vld [vmem:[#allocation2 + $0xc6] sm:$0xff] }
 0x20f   : > { %v1645_v23 = vadd.f32 %v1609_v48, %v1533_v7  ;;  %v1387_v41 = vmul.f32 %v3683_v12, %v4206_v56  ;;  %v2015_v30 = vpack.c.bf16 %v1988_v8, %v1987_v54  ;;  %v1646_v55 = vadd.f32 %v1610_v50, %v1534_v53 }
 0x210   : > { %v1233_v25 = vadd.f32 %v1197_v17, %v1085_v52  ;;  %v1234_v44 = vadd.f32 %v1198_v61, %v1086_v38  ;;  %v1388_v62 = vmul.f32 %v3683_v12, %v1272_v21  ;;  %v1499_v48 = vmul.f32 %v3685_v22, %v1459_v19  ;;  %v1159_v52 = vld [vmem:[#allocation2 + $0xb1] sm:$0xff] }
 0x211   : > { %v1723_v37 = vadd.f32 %v1687_v36, %v1645_v23  ;;  %v1500_v27 = vmul.f32 %v3685_v22, %v1460_v5  ;;  %2739 = vmatprep.mubr.bf16.mxu1 %v2015_v30  ;;  %v1724_v20 = vadd.f32 %v1688_v45, %v1646_v55  ;;  %v1611_v50 = vmul.f32 %v3687_v0, %v1571_v9  ;;  %v1160_v9 = vld [vmem:[#allocation2 + $0xb9] sm:$0xff] }
 0x212   : > { %v1345_v57 = vadd.f32 %v1309_v42, %v1233_v25  ;;  %v1346_v29 = vadd.f32 %v1310_v24, %v1234_v44  ;;  %v1612_v36 = vmul.f32 %v3687_v0, %v4193_v34  ;;  %v1689_v58 = vmul.f32 %v3689_v10, %v4225_v3  ;;  %v1274_v24 = vld [vmem:[#allocation2 + $0xca] sm:$0xff] }
 0x213   : > { %v1835_v43 = vadd.f32 %v1799_v63, %v1723_v37  ;;  %v1690_v39 = vmul.f32 %v3689_v10, %v4227_v31  ;;  %v1836_v2 = vadd.f32 %v1800_v16, %v1724_v20  ;;  %v1801_v7 = vmul.f32 %v3691_v46, %v1761_v59  ;;  %v1273_v16 = vld [vmem:[#allocation2 + $0xc2] sm:$0xff] }
 0x214   : > { %v1423_v54 = vadd.f32 %v1387_v41, %v1345_v57  ;;  %v1424_v45 = vadd.f32 %v1388_v62, %v1346_v29  ;;  %v1802_v8 = vmul.f32 %v3691_v46, %v1762_v18  ;;  %v1913_v63 = vmul.f32 %v4090_v26, %v1873_v11  ;;  %v1461_v25 = vld [vmem:[#allocation2 + $0xc3] sm:$0xff]  ;;  %v1575_v57 = vld [vmem:[#allocation2 + $0xd4] sm:$0xff] }
 0x215   : > { %v1947_v38 = vadd.f32 %v1911_v51, %v1835_v43  ;;  %v1914_v34 = vmul.f32 %v4090_v26, %v1874_v47  ;;  %v1948_v53 = vadd.f32 %v1912_v13, %v1836_v2  ;;  %v1087_v19 = vmul.f32 %v3667_v49, %v4048_v40  ;;  %v1462_v40 = vld [vmem:[#allocation2 + $0xcb] sm:$0xff]  ;;  %v4256_v29 = vld [vmem:[#allocation2 + $0xdc] sm:$0xff] }
 0x216   : > { %v1535_v17 = vadd.f32 %v1499_v48, %v1423_v54  ;;  %v1536_v61 = vadd.f32 %v1500_v27, %v1424_v45  ;;  %v1088_v23 = vmul.f32 %v3667_v49, %v4060_v33  ;;  %v1199_v51 = vmul.f32 %v3669_v15, %v1159_v52  ;;  %v1763_v47 = vld [vmem:[#allocation2 + $0xd5] sm:$0xff]  ;;  %v1764_v43 = vld [vmem:[#allocation2 + $0xdd] sm:$0xff] }
 0x217   : > { %v1989_v5 = vadd.f32 %v4211_v32, %v1947_v38  ;;  %v1200_v42 = vmul.f32 %v3669_v15, %v1160_v9  ;;  %v1990_v41 = vadd.f32 %v4211_v32, %v1948_v53  ;;  %v1311_v55 = vmul.f32 %v3680_v6, %v4206_v56  ;;  %v1875_v2 = vld [vmem:[#allocation2 + $0xd6] sm:$0xff]  ;;  %v1876_v54 = vld [vmem:[#allocation2 + $0xde] sm:$0xff] }
 0x218   : > { %v1647_v30 = vadd.f32 %v1611_v50, %v1535_v17  ;;  %v1648_v13 = vadd.f32 %v1612_v36, %v1536_v61  ;;  %v1235_v44 = vadd.f32 %v1199_v51, %v1087_v19  ;;  %v1312_v62 = vmul.f32 %v3680_v6, %v1272_v21  ;;  %v1161_v61 = vld [vmem:[#allocation2 + $0xc1] sm:$0xff]  ;;  %v1275_v51 = vld [vmem:[#allocation2 + $0xd2] sm:$0xff] }
 0x219   : > { %v1236_v37 = vadd.f32 %v1200_v42, %v1088_v23  ;;  %v1389_v33 = vmul.f32 %v3683_v12, %v1273_v16  ;;  %v2016_v48 = vpack.c.bf16 %v1990_v41, %v1989_v5  ;;  %v1390_v20 = vmul.f32 %v3683_v12, %v1274_v24 }
 0x21a   : > { %v1725_v27 = vadd.f32 %v1689_v58, %v1647_v30  ;;  %v1726_v59 = vadd.f32 %v1690_v39, %v1648_v13  ;;  %v1347_v50 = vadd.f32 %v1311_v55, %v1235_v44  ;;  %v1501_v56 = vmul.f32 %v3685_v22, %v1461_v25  ;;  %v1463_v44 = vld [vmem:[#allocation2 + $0xd3] sm:$0xff] }
 0x21b   : > { %v1348_v18 = vadd.f32 %v1312_v62, %v1236_v37  ;;  %v1502_v11 = vmul.f32 %v3685_v22, %v1462_v40  ;;  %2740 = vmatmul.mubr.bf16.gmra.mrb[40].mxu1 %v2016_v48  ;;  %v1613_v58 = vmul.f32 %v3687_v0, %v4225_v3  ;;  %v1614_v39 = vmul.f32 %v3687_v0, %v4227_v31  ;;  %v1162_v3 = vld [vmem:[#allocation2 + $0xc9] sm:$0xff]  ;;  %v1276_v40 = vld [vmem:[#allocation2 + $0xda] sm:$0xff] }
 0x21c   : > { %v1837_v21 = vadd.f32 %v1801_v7, %v1725_v27  ;;  %v1838_v36 = vadd.f32 %v1802_v8, %v1726_v59  ;;  %v1425_v45 = vadd.f32 %v1389_v33, %v1347_v50  ;;  %v1691_v9 = vmul.f32 %v3689_v10, %v1575_v57  ;;  %v1464_v37 = vld [vmem:[#allocation2 + $0xdb] sm:$0xff]  ;;  %v1577_v50 = vld [vmem:[#allocation2 + $0xe4] sm:$0xff] }
 0x21d   : > { %v1426_v52 = vadd.f32 %v1390_v20, %v1348_v18  ;;  %v1692_v38 = vmul.f32 %v3689_v10, %v4256_v29  ;;  %v1803_v7 = vmul.f32 %v3691_v46, %v1763_v47  ;;  %v1804_v8 = vmul.f32 %v3691_v46, %v1764_v43  ;;  %v1578_v18 = vld [vmem:[#allocation2 + $0xec] sm:$0xff] }
 0x21e   : > { %v1949_v53 = vadd.f32 %v1913_v63, %v1837_v21  ;;  %v1950_v17 = vadd.f32 %v1914_v34, %v1838_v36  ;;  %v1537_v19 = vadd.f32 %v1501_v56, %v1425_v45  ;;  %v1915_v31 = vmul.f32 %v4090_v26, %v1875_v2  ;;  %v1765_v56 = vld [vmem:[#allocation2 + $0xe5] sm:$0xff] }
 0x21f   : > { %v1538_v5 = vadd.f32 %v1502_v11, %v1426_v52  ;;  %v1916_v23 = vmul.f32 %v4090_v26, %v1876_v54  ;;  %v1089_v63 = vmul.f32 %v3667_v49, %v4086_v4  ;;  %v1090_v34 = vmul.f32 %v3667_v49, %v4095_v14  ;;  %v1877_v2 = vld [vmem:[#allocation2 + $0xe6] sm:$0xff]  ;;  %v1878_v54 = vld [vmem:[#allocation2 + $0xee] sm:$0xff] }
 0x220   : > { %v1991_v42 = vadd.f32 %v4211_v32, %v1949_v53  ;;  %v1992_v41 = vadd.f32 %v4211_v32, %v1950_v17  ;;  %v1649_v30 = vadd.f32 %v1613_v58, %v1537_v19  ;;  %v1201_v55 = vmul.f32 %v3669_v15, %v1161_v61 }
 0x221   : > { %v1650_v13 = vadd.f32 %v1614_v39, %v1538_v5  ;;  %v1202_v25 = vmul.f32 %v3669_v15, %v1162_v3  ;;  %v1313_v33 = vmul.f32 %v3680_v6, %v1273_v16  ;;  %v1314_v48 = vmul.f32 %v3680_v6, %v1274_v24  ;;  %v1766_v39 = vld [vmem:[#allocation2 + $0xed] sm:$0xff] }
 0x222   : > { %v2017_v62 = vpack.c.bf16 %v1992_v41, %v1991_v42  ;;  %v1391_v27 = vmul.f32 %v3683_v12, %v1275_v51  ;;  %v1727_v4 = vadd.f32 %v1691_v9, %v1649_v30  ;;  %v1237_v20 = vadd.f32 %v1201_v55, %v1089_v63 }
 0x223   : > { %v1728_v59 = vadd.f32 %v1692_v38, %v1650_v13  ;;  %v1238_v14 = vadd.f32 %v1202_v25, %v1090_v34  ;;  %v1392_v11 = vmul.f32 %v3683_v12, %v1276_v40  ;;  %v1503_v47 = vmul.f32 %v3685_v22, %v1463_v44  ;;  %v1278_v34 = vld [vmem:[#allocation2 + $0xea] sm:$0xff] }
 0x224   : > { %2743 = vmatprep.mubr.bf16.mxu1 %v2017_v62  ;;  %v1504_v43 = vmul.f32 %v3685_v22, %v1464_v37  ;;  %v1615_v16 = vmul.f32 %v3687_v0, %v1575_v57  ;;  %v1839_v21 = vadd.f32 %v1803_v7, %v1727_v4  ;;  %v1349_v36 = vadd.f32 %v1313_v33, %v1237_v20  ;;  %v1163_v7 = vld [vmem:[#allocation2 + $0xd1] sm:$0xff]  ;;  %v1465_v44 = vld [vmem:[#allocation2 + $0xe3] sm:$0xff] }
 0x225   : > { %v1840_v24 = vadd.f32 %v1804_v8, %v1728_v59  ;;  %v1350_v58 = vadd.f32 %v1314_v48, %v1238_v14  ;;  %v1616_v45 = vmul.f32 %v3687_v0, %v4256_v29  ;;  %v1693_v52 = vmul.f32 %v3689_v10, %v1577_v50  ;;  %v1164_v8 = vld [vmem:[#allocation2 + $0xd9] sm:$0xff]  ;;  %v1466_v37 = vld [vmem:[#allocation2 + $0xeb] sm:$0xff] }
 0x226   : > { %v1694_v9 = vmul.f32 %v3689_v10, %v1578_v18  ;;  %v1805_v38 = vmul.f32 %v3691_v46, %v1765_v56  ;;  %v1951_v53 = vadd.f32 %v1915_v31, %v1839_v21  ;;  %v1427_v61 = vadd.f32 %v1391_v27, %v1349_v36 }
 0x227   : > { %v1952_v17 = vadd.f32 %v1916_v23, %v1840_v24  ;;  %v1428_v57 = vadd.f32 %v1392_v11, %v1350_v58  ;;  %v1806_v3 = vmul.f32 %v3691_v46, %v1766_v39  ;;  %v1917_v19 = vmul.f32 %v4090_v26, %v1877_v2  ;;  %v1277_v23 = vld [vmem:[#allocation2 + $0xe2] sm:$0xff] }
 0x228   : > { %v1918_v5 = vmul.f32 %v4090_v26, %v1878_v54  ;;  %v1091_v29 = vmul.f32 %v3667_v49, %v4123_v28  ;;  %v1993_v42 = vadd.f32 %v4211_v32, %v1951_v53  ;;  %v1539_v63 = vadd.f32 %v1503_v47, %v1427_v61  ;;  %v1165_v11 = vld [vmem:[#allocation2 + $0xe1] sm:$0xff]  ;;  %v1166_v47 = vld [vmem:[#allocation2 + $0xe9] sm:$0xff] }
 0x229   : > { %v1994_v41 = vadd.f32 %v4211_v32, %v1952_v17  ;;  %v1540_v31 = vadd.f32 %v1504_v43, %v1428_v57  ;;  %v1092_v30 = vmul.f32 %v3667_v49, %v4133_v1  ;;  %v1203_v13 = vmul.f32 %v3669_v15, %v1163_v7  ;;  %v1769_v7 = vld [vmem:[#allocation2 + $0x105] sm:$0xff] }
 0x22a   : > { %v1204_v55 = vmul.f32 %v3669_v15, %v1164_v8  ;;  %v1315_v25 = vmul.f32 %v3680_v6, %v1275_v51  ;;  %v1651_v62 = vadd.f32 %v1615_v16, %v1539_v63  ;;  %v1316_v48 = vmul.f32 %v3680_v6, %v1276_v40 }
 0x22b   : > { %v2018_v28 = vpack.c.bf16 %v1994_v41, %v1993_v42  ;;  %v1652_v33 = vadd.f32 %v1616_v45, %v1540_v31  ;;  %v1239_v27 = vadd.f32 %v1203_v13, %v1091_v29  ;;  %v1393_v59 = vmul.f32 %v3683_v12, %v1277_v23  ;;  %v4322_v29 = vld [vmem:[#allocation2 + $0x10c] sm:$0xff] }
 0x22c   : > { %v1240_v4 = vadd.f32 %v1204_v55, %v1092_v30  ;;  %v1394_v20 = vmul.f32 %v3683_v12, %v1278_v34  ;;  %v1729_v1 = vadd.f32 %v1693_v52, %v1651_v62  ;;  %v1505_v56 = vmul.f32 %v3685_v22, %v1465_v44  ;;  %v1055_v41 = vld [vmem:[#allocation2 + $0xf0] sm:$0xff]  ;;  %v1881_v30 = vld [vmem:[#allocation2 + $0x106] sm:$0xff]  ;;  %v1056_v55 = vld [vmem:[#allocation2 + $0xf8] sm:$0xff] }
 0x22d   : > { %2744 = vmatmul.mubr.bf16.gmra.mrb[44].mxu1 %v2018_v28  ;;  %v1730_v14 = vadd.f32 %v1694_v9, %v1652_v33  ;;  %v1506_v51 = vmul.f32 %v3685_v22, %v1466_v37  ;;  %v1351_v43 = vadd.f32 %v1315_v25, %v1239_v27  ;;  %v1617_v21 = vmul.f32 %v3687_v0, %v1577_v50  ;;  %v1882_v13 = vld [vmem:[#allocation2 + $0x10e] sm:$0xff] }
 0x22e   : > { %v1352_v16 = vadd.f32 %v1316_v48, %v1240_v4  ;;  %v1618_v40 = vmul.f32 %v3687_v0, %v1578_v18  ;;  %v1841_v24 = vadd.f32 %v1805_v38, %v1729_v1  ;;  %v1093_v58 = vmul.f32 %v3667_v49, %v4160_v35  ;;  %v4318_v35 = vld [vmem:[#allocation2 + $0x104] sm:$0xff]  ;;  %v4641_v48 = vld [vmem:[#allocation31_spill] sm:$0xff] }
 0x22f   : > { %v1842_v36 = vadd.f32 %v1806_v3, %v1730_v14  ;;  %v1094_v39 = vmul.f32 %v3667_v49, %v4163_v60  ;;  %v1429_v2 = vadd.f32 %v1393_v59, %v1351_v43  ;;  %v1205_v45 = vmul.f32 %v3669_v15, %v1165_v11  ;;  %v1770_v60 = vld [vmem:[#allocation2 + $0x10d] sm:$0xff]  ;;  %v4642_v4 = vld [vmem:[#allocation28_spill] sm:$0xff] }
 0x230   : > { %v1430_v54 = vadd.f32 %v1394_v20, %v1352_v16  ;;  %v1206_v52 = vmul.f32 %v3669_v15, %v1166_v47  ;;  %v1953_v9 = vadd.f32 %v1917_v19, %v1841_v24  ;;  %v1317_v50 = vmul.f32 %v3680_v6, %v1277_v23  ;;  %v2885_v19 = vld [vmem:[#allocation2 + $0xfc] sm:$0xff]  ;;  %v4640_v62 = vld [vmem:[#allocation25_spill] sm:$0xff]  ;;  %v4643_v20 = vld [vmem:[#allocation34_spill] sm:$0xff] }
 0x231   : > { %v1954_v53 = vadd.f32 %v1918_v5, %v1842_v36  ;;  %v1318_v18 = vmul.f32 %v3680_v6, %v1278_v34  ;;  %v1541_v38 = vadd.f32 %v1505_v56, %v1429_v2  ;;  %v1241_v61 = vadd.f32 %v1205_v45, %v1093_v58  ;;  %v1167_v14 = vld [vmem:[#allocation2 + $0xf1] sm:$0xff]  ;;  %v1168_v56 = vld [vmem:[#allocation2 + $0xf9] sm:$0xff]  ;;  %v4646_v36 = vld [vmem:[#allocation29_spill] sm:$0xff] }
 0x232   : > { %v1542_v17 = vadd.f32 %v1506_v51, %v1430_v54  ;;  %v1242_v57 = vadd.f32 %v1206_v52, %v1094_v39  ;;  %v1995_v8 = vadd.f32 %v4211_v32, %v1953_v9  ;;  %v1620_v5 = vmul.f32 %v2885_v19, %v3687_v0  ;;  %v4644_v16 = vld [vmem:[#allocation26_spill] sm:$0xff]  ;;  %v4647_v39 = vld [vmem:[#allocation35_spill] sm:$0xff]  ;;  %v4345_v52 = vld [vmem:[#allocation2 + $0x102] sm:$0xff] }
 0x233   : > { %v1996_v3 = vadd.f32 %v4211_v32, %v1954_v53  ;;  %v1697_v42 = vmul.f32 %v3689_v10, %v4318_v35  ;;  %v1653_v63 = vadd.f32 %v1617_v21, %v1541_v38  ;;  %v1353_v23 = vadd.f32 %v1317_v50, %v1241_v61  ;;  %v2886_v9 = vld [vmem:[#allocation2 + $0xf2] sm:$0xff]  ;;  %v2887_v50 = vld [vmem:[#allocation2 + $0xfa] sm:$0xff]  ;;  %v4649_v61 = vld [vmem:[#allocation33_spill] sm:$0xff] }
 0x234   : > { %v1654_v31 = vadd.f32 %v1618_v40, %v1542_v17  ;;  %v1354_v34 = vadd.f32 %v1318_v18, %v1242_v57  ;;  %v1698_v44 = vmul.f32 %v3689_v10, %v4322_v29  ;;  %v1809_v37 = vmul.f32 %v3691_v46, %v1769_v7  ;;  %v4645_v40 = vld [vmem:[#allocation32_spill] sm:$0xff]  ;;  %v4648_v38 = vld [vmem:[#allocation27_spill] sm:$0xff]  ;;  %v4650_v7 = vld [vmem:[#allocation30_spill] sm:$0xff] }
 0x235   : > { %v2019_v25 = vpack.c.bf16 %v1996_v3, %v1995_v8  ;;  %v1810_v28 = vmul.f32 %v3691_v46, %v1770_v60  ;;  %v1731_v33 = vadd.f32 %v4640_v62, %v1653_v63  ;;  %v1431_v59 = vadd.f32 %v4642_v4, %v1353_v23  ;;  %v1282_v3 = vld [vmem:[#allocation2 + $0x10a] sm:$0xff] }
 0x236   : > { %v1732_v27 = vadd.f32 %v4641_v48, %v1654_v31  ;;  %v1432_v1 = vadd.f32 %v4643_v20, %v1354_v34  ;;  %v1921_v51 = vmul.f32 %v4090_v26, %v1881_v30  ;;  %v1922_v11 = vmul.f32 %v4090_v26, %v1882_v13  ;;  %v1469_v19 = vld [vmem:[#allocation2 + $0x103] sm:$0xff] }
 0x237   : > { %2747 = vmatprep.mubr.bf16.mxu1 %v2019_v25  ;;  %v1095_v47 = vmul.f32 %v3667_v49, %v1055_v41  ;;  %v1096_v43 = vmul.f32 %v3667_v49, %v1056_v55  ;;  %v1843_v21 = vadd.f32 %v4644_v16, %v1731_v33  ;;  %v1543_v58 = vadd.f32 %v4646_v36, %v1431_v59  ;;  %v1470_v41 = vld [vmem:[#allocation2 + $0x10b] sm:$0xff] }
 0x238   : > { %v1844_v24 = vadd.f32 %v4645_v40, %v1732_v27  ;;  %v1544_v2 = vadd.f32 %v4647_v39, %v1432_v1  ;;  %v1207_v54 = vmul.f32 %v3669_v15, %v1167_v14  ;;  %v1208_v45 = vmul.f32 %v3669_v15, %v1168_v56  ;;  %v1771_v27 = vld [vmem:[#allocation2 + $0x115] sm:$0xff]  ;;  %v1772_v56 = vld [vmem:[#allocation2 + $0x11d] sm:$0xff] }
 0x239   : > { %v1319_v53 = vmul.f32 %v2886_v9, %v3680_v6  ;;  %v1320_v18 = vmul.f32 %v2887_v50, %v3680_v6  ;;  %v1955_v17 = vadd.f32 %v4648_v38, %v1843_v21  ;;  %v1655_v60 = vadd.f32 %v4650_v7, %v1543_v58  ;;  %v1583_v1 = vld [vmem:[#allocation2 + $0x114] sm:$0xff]  ;;  %v1884_v40 = vld [vmem:[#allocation2 + $0x11e] sm:$0xff] }
 0x23a   : > { %v1956_v57 = vadd.f32 %v4649_v61, %v1844_v24  ;;  %v1656_v8 = vadd.f32 %v1620_v5, %v1544_v2  ;;  %v1243_v63 = vadd.f32 %v1207_v54, %v1095_v47  ;;  %v1244_v31 = vadd.f32 %v1208_v45, %v1096_v43  ;;  %v1883_v47 = vld [vmem:[#allocation2 + $0x116] sm:$0xff]  ;;  %v1057_v24 = vld [vmem:[#allocation2 + $0x100] sm:$0xff] }
 0x23b   : > { %v1397_v23 = vmul.f32 %v3683_v12, %v4345_v52  ;;  %v1398_v34 = vmul.f32 %v3683_v12, %v1282_v3  ;;  %v1997_v30 = vadd.f32 %v4211_v32, %v1955_v17  ;;  %v1733_v55 = vadd.f32 %v1697_v42, %v1655_v60  ;;  %v1584_v42 = vld [vmem:[#allocation2 + $0x11c] sm:$0xff] }
 0x23c   : > { %v1998_v13 = vadd.f32 %v4211_v32, %v1956_v57  ;;  %v1734_v25 = vadd.f32 %v1698_v44, %v1656_v8  ;;  %v1355_v62 = vadd.f32 %v1319_v53, %v1243_v63  ;;  %v1356_v33 = vadd.f32 %v1320_v18, %v1244_v31  ;;  %v1169_v39 = vld [vmem:[#allocation2 + $0x101] sm:$0xff]  ;;  %v1471_v57 = vld [vmem:[#allocation2 + $0x113] sm:$0xff] }
 0x23d   : > { %v1509_v5 = vmul.f32 %v3685_v22, %v1469_v19  ;;  %v1510_v48 = vmul.f32 %v3685_v22, %v1470_v41  ;;  %v1845_v59 = vadd.f32 %v1809_v37, %v1733_v55  ;;  %v1621_v14 = vmul.f32 %v3687_v0, %v4318_v35  ;;  %v1058_v35 = vld [vmem:[#allocation2 + $0x108] sm:$0xff]  ;;  %v1283_v8 = vld [vmem:[#allocation2 + $0x112] sm:$0xff]  ;;  %v1472_v63 = vld [vmem:[#allocation2 + $0x11b] sm:$0xff] }
 0x23e   : > { %v2020_v4 = vpack.c.bf16 %v1998_v13, %v1997_v30  ;;  %v1846_v20 = vadd.f32 %v1810_v28, %v1734_v25  ;;  %v1433_v43 = vadd.f32 %v1397_v23, %v1355_v62  ;;  %v1434_v16 = vadd.f32 %v1398_v34, %v1356_v33  ;;  %v1284_v30 = vld [vmem:[#allocation2 + $0x11a] sm:$0xff]  ;;  %v1585_v33 = vld [vmem:[#allocation2 + $0x124] sm:$0xff] }
 0x23f   : > { %v1622_v44 = vmul.f32 %v3687_v0, %v4322_v29  ;;  %v1699_v21 = vmul.f32 %v3689_v10, %v1583_v1  ;;  %v1957_v36 = vadd.f32 %v1921_v51, %v1845_v59  ;;  %v1700_v28 = vmul.f32 %v3689_v10, %v1584_v42  ;;  %v1170_v29 = vld [vmem:[#allocation2 + $0x109] sm:$0xff] }
 0x240   : > { %2748 = vmatmul.mubr.bf16.gmra.mrb[48].mxu1 %v2020_v4  ;;  %v1958_v37 = vadd.f32 %v1922_v11, %v1846_v20  ;;  %v1811_v58 = vmul.f32 %v3691_v46, %v1771_v27  ;;  %v1545_v2 = vadd.f32 %v1509_v5, %v1433_v43  ;;  %v1546_v54 = vadd.f32 %v1510_v48, %v1434_v16  ;;  %v1774_v4 = vld [vmem:[#allocation2 + $0x12d] sm:$0xff] }
 0x241   : > { %v1812_v45 = vmul.f32 %v3691_v46, %v1772_v56  ;;  %v1923_v9 = vmul.f32 %v4090_v26, %v1883_v47  ;;  %v1999_v53 = vadd.f32 %v4211_v32, %v1957_v36  ;;  %v1924_v51 = vmul.f32 %v4090_v26, %v1884_v40  ;;  %v1885_v59 = vld [vmem:[#allocation2 + $0x126] sm:$0xff]  ;;  %v1059_v16 = vld [vmem:[#allocation2 + $0x110] sm:$0xff]  ;;  %v1060_v36 = vld [vmem:[#allocation2 + $0x118] sm:$0xff] }
 0x242   : > { %v2000_v50 = vadd.f32 %v4211_v32, %v1958_v37  ;;  %v1097_v11 = vmul.f32 %v3667_v49, %v1057_v24  ;;  %v1657_v18 = vadd.f32 %v1621_v14, %v1545_v2  ;;  %v1658_v38 = vadd.f32 %v1622_v44, %v1546_v54  ;;  %v1586_v14 = vld [vmem:[#allocation2 + $0x12c] sm:$0xff] }
 0x243   : > { %v1098_v17 = vmul.f32 %v3667_v49, %v1058_v35  ;;  %v1209_v61 = vmul.f32 %v3669_v15, %v1169_v39  ;;  %v1210_v60 = vmul.f32 %v3669_v15, %v1170_v29  ;;  %v1321_v19 = vmul.f32 %v3680_v6, %v4345_v52  ;;  %v1171_v37 = vld [vmem:[#allocation2 + $0x111] sm:$0xff] }
 0x244   : > { %v2021_v7 = vpack.c.bf16 %v2000_v50, %v1999_v53  ;;  %v1322_v41 = vmul.f32 %v3680_v6, %v1282_v3  ;;  %v1735_v31 = vadd.f32 %v1699_v21, %v1657_v18  ;;  %v1736_v23 = vadd.f32 %v1700_v28, %v1658_v38  ;;  %v1773_v3 = vld [vmem:[#allocation2 + $0x125] sm:$0xff]  ;;  %v1172_v28 = vld [vmem:[#allocation2 + $0x119] sm:$0xff]  ;;  %v1886_v53 = vld [vmem:[#allocation2 + $0x12e] sm:$0xff] }
 0x245   : > { %v1245_v34 = vadd.f32 %v1209_v61, %v1097_v11  ;;  %v1399_v13 = vmul.f32 %v3683_v12, %v1283_v8  ;;  %v1246_v55 = vadd.f32 %v1210_v60, %v1098_v17  ;;  %v1400_v25 = vmul.f32 %v3683_v12, %v1284_v30  ;;  %v1362_v18 = vld [vmem:[#allocation2 + $0x12a] sm:$0xff] }
 0x246   : > { %2751 = vmatprep.mubr.bf16.mxu1 %v2021_v7  ;;  %v1511_v62 = vmul.f32 %v3685_v22, %v1471_v57  ;;  %v1847_v5 = vadd.f32 %v1811_v58, %v1735_v31  ;;  %v1848_v48 = vadd.f32 %v1812_v45, %v1736_v23  ;;  %v1512_v52 = vmul.f32 %v3685_v22, %v1472_v63  ;;  %v1473_v38 = vld [vmem:[#allocation2 + $0x123] sm:$0xff]  ;;  %v1474_v7 = vld [vmem:[#allocation2 + $0x12b] sm:$0xff]  ;;  %v2888_v31 = vld [vmem:[#allocation8 + $0x8] ss:$0 sm:$0xff] }
 0x247   : > { %v1357_v27 = vadd.f32 %v1321_v19, %v1245_v34  ;;  %v1358_v20 = vadd.f32 %v1322_v41, %v1246_v55  ;;  %v1623_v56 = vmul.f32 %v3687_v0, %v1583_v1  ;;  %v1624_v47 = vmul.f32 %v3687_v0, %v1584_v42 }
 0x248   : > { %v1701_v43 = vmul.f32 %v3689_v10, %v1585_v33  ;;  %v1959_v44 = vadd.f32 %v1923_v9, %v1847_v5  ;;  %v1960_v21 = vadd.f32 %v1924_v51, %v1848_v48  ;;  %v1702_v24 = vmul.f32 %v3689_v10, %v1586_v14  ;;  %v1361_v9 = vld [vmem:[#allocation2 + $0x122] sm:$0xff] }
 0x249   : > { %v1435_v40 = vadd.f32 %v1399_v13, %v1357_v27  ;;  %v1436_v58 = vadd.f32 %v1400_v25, %v1358_v20  ;;  %v1813_v35 = vmul.f32 %v3691_v46, %v1773_v3  ;;  %v1814_v39 = vmul.f32 %v3691_v46, %v1774_v4  ;;  %v1664_v5 = vld [vmem:[#allocation2 + $0x13c] sm:$0xff] }
 0x24a   : > { %v1925_v1 = vmul.f32 %v4090_v26, %v1885_v59  ;;  %v2001_v42 = vadd.f32 %v4211_v32, %v1959_v44  ;;  %v2002_v2 = vadd.f32 %v4211_v32, %v1960_v21  ;;  %v1099_v45 = vmul.f32 %v3667_v49, %v1059_v16  ;;  %v1775_v4 = vld [vmem:[#allocation2 + $0x135] sm:$0xff]  ;;  %v1776_v20 = vld [vmem:[#allocation2 + $0x13d] sm:$0xff] }
 0x24b   : > { %v1547_v54 = vadd.f32 %v1511_v62, %v1435_v40  ;;  %v1548_v29 = vadd.f32 %v1512_v52, %v1436_v58  ;;  %v1100_v50 = vmul.f32 %v3667_v49, %v1060_v36  ;;  %v1211_v51 = vmul.f32 %v3669_v15, %v1171_v37  ;;  %v1887_v16 = vld [vmem:[#allocation2 + $0x136] sm:$0xff]  ;;  %v1888_v21 = vld [vmem:[#allocation2 + $0x13e] sm:$0xff] }
 0x24c   : > { %v1212_v11 = vmul.f32 %v3669_v15, %v1172_v28  ;;  %v2022_v17 = vpack.c.bf16 %v2002_v2, %v2001_v42  ;;  %v1323_v61 = vmul.f32 %v3680_v6, %v1283_v8  ;;  %v1324_v57 = vmul.f32 %v3680_v6, %v1284_v30  ;;  %v1663_v6 = vld [vmem:[#allocation2 + $0x134] sm:$0xff] }
 0x24d   : > { %v1659_v26 = vadd.f32 %v1623_v56, %v1547_v54  ;;  %v1660_v60 = vadd.f32 %v1624_v47, %v1548_v29  ;;  %v1247_v19 = vadd.f32 %v1211_v51, %v1099_v45  ;;  %v1401_v63 = vmul.f32 %v3683_v12, %v1361_v9  ;;  %v4414_v45 = vld [vmem:[%s4584_s6] ss:$0 sm:$0xff]  ;;  %v2258_v29 = vld [vmem:[%s3339_s14 + $0x23] sm:$0xff] }
 0x24e   : > { %v1248_v41 = vadd.f32 %v1212_v11, %v1100_v50  ;;  %2752 = vmatmul.mubr.bf16.gmra.mrb[52].mxu1 %v2022_v17  ;;  %v1926_v23 = vmul.f32 %v2888_v31, %v1886_v53  ;;  %v1402_v15 = vmul.f32 %v3683_v12, %v1362_v18  ;;  %v1513_v34 = vmul.f32 %v3685_v22, %v1473_v38  ;;  %v2256_v51 = vld [vmem:[%s3339_s14 + $0x13] sm:$0xff]  ;;  %v2259_v38 = vld [vmem:[%s3339_s14 + $0x2b] sm:$0xff] }
 0x24f   : > { %v1737_v49 = vadd.f32 %v1701_v43, %v1659_v26  ;;  %v1738_v13 = vadd.f32 %v1702_v24, %v1660_v60  ;;  %v1359_v55 = vadd.f32 %v1323_v61, %v1247_v19  ;;  %v1514_v8 = vmul.f32 %v3685_v22, %v1474_v7  ;;  %v2257_v61 = vld [vmem:[%s3339_s14 + $0x1b] sm:$0xff] }
 0x250   : > { %v1360_v25 = vadd.f32 %v1324_v57, %v1248_v41  ;;  %v1625_v62 = vmul.f32 %v3687_v0, %v1585_v33  ;;  %v1626_v3 = vmul.f32 %v3687_v0, %v1586_v14  ;;  %v1703_v12 = vmul.f32 %v3689_v10, %v1663_v6  ;;  %v2263_v6 = vld [vmem:[%s3339_s14 + $0x4b] sm:$0xff] }
 0x251   : > { %v1849_v30 = vadd.f32 %v1813_v35, %v1737_v49  ;;  %v1850_v48 = vadd.f32 %v1814_v39, %v1738_v13  ;;  %v1437_v27 = vadd.f32 %v1401_v63, %v1359_v55  ;;  %v1704_v22 = vmul.f32 %v3689_v10, %v1664_v5  ;;  %v2260_v55 = vld [vmem:[%s3339_s14 + $0x33] sm:$0xff] }
 0x252   : > { %v1438_v52 = vadd.f32 %v1402_v15, %v1360_v25  ;;  %v1815_v33 = vmul.f32 %v3691_v46, %v1775_v4  ;;  %v1816_v14 = vmul.f32 %v3691_v46, %v1776_v20  ;;  %v1927_v36 = vmul.f32 %v2888_v31, %v1887_v16  ;;  %v2262_v15 = vld [vmem:[%s3339_s14 + $0x43] sm:$0xff] }
 0x253   : > { %v1961_v59 = vadd.f32 %v1925_v1, %v1849_v30  ;;  %v1962_v56 = vadd.f32 %v1926_v23, %v1850_v48  ;;  %v1549_v47 = vadd.f32 %v1513_v34, %v1437_v27  ;;  %v1928_v35 = vmul.f32 %v2888_v31, %v1888_v21  ;;  %v2261_v48 = vld [vmem:[%s3339_s14 + $0x3b] sm:$0xff] }
 0x254   : > { %v1550_v43 = vadd.f32 %v1514_v8, %v1438_v52 }
 0x255   : > { %v2003_v44 = vadd.f32 %v4211_v32, %v1961_v59  ;;  %v2004_v40 = vadd.f32 %v4211_v32, %v1962_v56  ;;  %v1661_v24 = vadd.f32 %v1625_v62, %v1549_v47 }
 0x256   : > { %v1662_v0 = vadd.f32 %v1626_v3, %v1550_v43  ;;  %v2266_v43 = vld [vmem:[%s3339_s14 + $0x63] sm:$0xff] }
 0x257   : > { %v2023_v37 = vpack.c.bf16 %v2004_v40, %v2003_v44  ;;  %v1739_v28 = vadd.f32 %v1703_v12, %v1661_v24  ;;  %v2264_v44 = vld [vmem:[%s3339_s14 + $0x53] sm:$0xff]  ;;  %v2267_v40 = vld [vmem:[%s3339_s14 + $0x6b] sm:$0xff] }
 0x258   : > { %v1740_v58 = vadd.f32 %v1704_v22, %v1662_v0 }
 0x259   : > { %2755 = vmatprep.mubr.bf16.mxu1 %v2023_v37  ;;  %v1851_v10 = vadd.f32 %v1815_v33, %v1739_v28 }
 0x25a   : > { %v1852_v39 = vadd.f32 %v1816_v14, %v1740_v58 }
 0x25b   : > { %v1963_v1 = vadd.f32 %v1927_v36, %v1851_v10  ;;  %v2265_v36 = vld [vmem:[%s3339_s14 + $0x5b] sm:$0xff] }
 0x25c   : > { %v1964_v42 = vadd.f32 %v1928_v35, %v1852_v39 }
 0x25d   : > { %v2005_v2 = vadd.f32 %v4211_v32, %v1963_v1 }
 0x25e   : > { %v2006_v54 = vadd.f32 %v4211_v32, %v1964_v42 }
 0x260   : > { %v2024_v46 = vpack.c.bf16 %v2006_v54, %v2005_v2  ;;  %v2270_v54 = vld [vmem:[%s3339_s14 + $0x83] sm:$0xff] }
 0x262   : > { %2756 = vmatmul.mubr.bf16.gmra.mrb[56].mxu1 %v2024_v46 }
 0x296   : > { %v2725_v9 = vpop.f32.mrb[24].mxu1 }
 0x297   : > { %v2122_v53 = vadd.f32 %v2725_v9, %v4414_v45  ;;  %v2113_v50 = vpop.f32.mrb[25].mxu1 }
 0x298   : > { %v2114_v11 = vadd.f32 %v4414_v45, %v2113_v50  ;;  %v2726_v18 = vpop.f32.mrb[26].mxu1 }
 0x299   : > { %v2294_v32 = vadd.f32 %v2258_v29, %v2122_v53  ;;  %v2125_v17 = vadd.f32 %v2726_v18, %v4414_v45  ;;  %v2116_v26 = vpop.f32.mrb[27].mxu1  ;;  %v2268_v29 = vld [vmem:[%s3339_s14 + $0x73] sm:$0xff] }
 0x29a   : > { %v2292_v57 = vadd.f32 %v2256_v51, %v2114_v11  ;;  %v2117_v7 = vadd.f32 %v4414_v45, %v2116_v26  ;;  %v2271_v51 = vld [vmem:[%s3339_s14 + $0x8b] sm:$0xff] }
 0x29b   : > { %v2330_v60 = vmax.f32 %v2294_v32, 0.0  ;;  %v2295_v19 = vadd.f32 %v2259_v38, %v2125_v17  ;;  %v2269_v32 = vld [vmem:[%s3339_s14 + $0x7b] sm:$0xff] }
 0x29c   : > { %v2328_v41 = vmax.f32 %v2292_v57, 0.0  ;;  %v2293_v63 = vadd.f32 %v2257_v61, %v2117_v7 }
 0x29d   : > { %2366 = vst [vmem:[%s4425_s20 + $0x10] sm:$0xff] %v2330_v60  ;;  %v2331_v49 = vmax.f32 %v2295_v19, 0.0 }
 0x29e   : > { %2364 = vst [vmem:[%s4425_s20] sm:$0xff] %v2328_v41  ;;  %v2329_v31 = vmax.f32 %v2293_v63, 0.0 }
 0x29f   : > { %2367 = vst [vmem:[%s4425_s20 + $0x18] sm:$0xff] %v2331_v49  ;;  %v2274_v49 = vld [vmem:[%s3339_s14 + $0xa3] sm:$0xff] }
 0x2a0   : > { %2365 = vst [vmem:[%s4425_s20 + $0x8] sm:$0xff] %v2329_v31 }
 0x2ac   : > { %v2729_v23 = vpop.f32.mrb[28].mxu1 }
 0x2ad   : > { %v2138_v34 = vadd.f32 %v2729_v23, %v4414_v45  ;;  %v2129_v13 = vpop.f32.mrb[29].mxu1 }
 0x2ae   : > { %v2130_v25 = vadd.f32 %v4414_v45, %v2129_v13  ;;  %v2730_v8 = vpop.f32.mrb[30].mxu1 }
 0x2af   : > { %v2298_v30 = vadd.f32 %v2262_v15, %v2138_v34  ;;  %v2141_v62 = vadd.f32 %v2730_v8, %v4414_v45  ;;  %v2132_v5 = vpop.f32.mrb[31].mxu1  ;;  %v2272_v15 = vld [vmem:[%s3339_s14 + $0x93] sm:$0xff] }
 0x2b0   : > { %v2296_v27 = vadd.f32 %v2260_v55, %v2130_v25  ;;  %v2133_v52 = vadd.f32 %v4414_v45, %v2132_v5  ;;  %v2275_v55 = vld [vmem:[%s3339_s14 + $0xab] sm:$0xff] }
 0x2b1   : > { %v2334_v3 = vmax.f32 %v2298_v30, 0.0  ;;  %v2299_v4 = vadd.f32 %v2263_v6, %v2141_v62  ;;  %v2273_v30 = vld [vmem:[%s3339_s14 + $0x9b] sm:$0xff] }
 0x2b2   : > { %v2332_v59 = vmax.f32 %v2296_v27, 0.0  ;;  %v2297_v12 = vadd.f32 %v2261_v48, %v2133_v52 }
 0x2b3   : > { %2370 = vst [vmem:[%s4425_s20 + $0x30] sm:$0xff] %v2334_v3  ;;  %v2335_v20 = vmax.f32 %v2299_v4, 0.0 }
 0x2b4   : > { %2368 = vst [vmem:[%s4425_s20 + $0x20] sm:$0xff] %v2332_v59  ;;  %v2333_v56 = vmax.f32 %v2297_v12, 0.0 }
 0x2b5   : > { %2371 = vst [vmem:[%s4425_s20 + $0x38] sm:$0xff] %v2335_v20  ;;  %v2278_v20 = vld [vmem:[%s3339_s14 + $0xc3] sm:$0xff] }
 0x2b6   : > { %2369 = vst [vmem:[%s4425_s20 + $0x28] sm:$0xff] %v2333_v56 }
 0x2c2   : > { %v2733_v47 = vpop.f32.mrb[32].mxu1 }
 0x2c3   : > { %v2154_v22 = vadd.f32 %v2733_v47, %v4414_v45  ;;  %v2145_v16 = vpop.f32.mrb[33].mxu1 }
 0x2c4   : > { %v2146_v33 = vadd.f32 %v4414_v45, %v2145_v16  ;;  %v2734_v21 = vpop.f32.mrb[34].mxu1 }
 0x2c5   : > { %v2302_v24 = vadd.f32 %v2266_v43, %v2154_v22  ;;  %v2157_v0 = vadd.f32 %v2734_v21, %v4414_v45  ;;  %v2148_v14 = vpop.f32.mrb[35].mxu1  ;;  %v2276_v43 = vld [vmem:[%s3339_s14 + $0xb3] sm:$0xff] }
 0x2c6   : > { %v2300_v37 = vadd.f32 %v2264_v44, %v2146_v33  ;;  %v2149_v28 = vadd.f32 %v4414_v45, %v2148_v14  ;;  %v2279_v44 = vld [vmem:[%s3339_s14 + $0xcb] sm:$0xff] }
 0x2c7   : > { %v2338_v58 = vmax.f32 %v2302_v24, 0.0  ;;  %v2303_v35 = vadd.f32 %v2267_v40, %v2157_v0  ;;  %v2277_v24 = vld [vmem:[%s3339_s14 + $0xbb] sm:$0xff] }
 0x2c8   : > { %v2336_v10 = vmax.f32 %v2300_v37, 0.0  ;;  %v2301_v39 = vadd.f32 %v2265_v36, %v2149_v28 }
 0x2c9   : > { %2374 = vst [vmem:[%s4425_s20 + $0x50] sm:$0xff] %v2338_v58  ;;  %v2339_v1 = vmax.f32 %v2303_v35, 0.0 }
 0x2ca   : > { %2372 = vst [vmem:[%s4425_s20 + $0x40] sm:$0xff] %v2336_v10  ;;  %v2337_v42 = vmax.f32 %v2301_v39, 0.0 }
 0x2cb   : > { %2375 = vst [vmem:[%s4425_s20 + $0x58] sm:$0xff] %v2339_v1  ;;  %v2282_v1 = vld [vmem:[%s3339_s14 + $0xe3] sm:$0xff] }
 0x2cc   : > { %2373 = vst [vmem:[%s4425_s20 + $0x48] sm:$0xff] %v2337_v42 }
 0x2d9   : > { %v2737_v2 = vpop.f32.mrb[36].mxu1 }
 0x2da   : > { %v2170_v46 = vadd.f32 %v2737_v2, %v4414_v45  ;;  %v2161_v9 = vpop.f32.mrb[37].mxu1 }
 0x2db   : > { %v2162_v53 = vadd.f32 %v4414_v45, %v2161_v9  ;;  %v2738_v50 = vpop.f32.mrb[38].mxu1 }
 0x2dc   : > { %v2306_v11 = vadd.f32 %v2270_v54, %v2170_v46  ;;  %v2173_v18 = vadd.f32 %v2738_v50, %v4414_v45  ;;  %v2164_v38 = vpop.f32.mrb[39].mxu1  ;;  %v2280_v54 = vld [vmem:[%s3339_s14 + $0xd3] sm:$0xff] }
 0x2dd   : > { %v2304_v17 = vadd.f32 %v2268_v29, %v2162_v53  ;;  %v2165_v26 = vadd.f32 %v4414_v45, %v2164_v38  ;;  %v2283_v29 = vld [vmem:[%s3339_s14 + $0xeb] sm:$0xff] }
 0x2de   : > { %v2342_v61 = vmax.f32 %v2306_v11, 0.0  ;;  %v2307_v57 = vadd.f32 %v2271_v51, %v2173_v18  ;;  %v2281_v11 = vld [vmem:[%s3339_s14 + $0xdb] sm:$0xff] }
 0x2df   : > { %v2340_v7 = vmax.f32 %v2304_v17, 0.0  ;;  %v2305_v60 = vadd.f32 %v2269_v32, %v2165_v26 }
 0x2e0   : > { %2378 = vst [vmem:[%s4425_s20 + $0x70] sm:$0xff] %v2342_v61  ;;  %v2343_v19 = vmax.f32 %v2307_v57, 0.0 }
 0x2e1   : > { %2376 = vst [vmem:[%s4425_s20 + $0x60] sm:$0xff] %v2340_v7  ;;  %v2341_v41 = vmax.f32 %v2305_v60, 0.0 }
 0x2e2   : > { %2379 = vst [vmem:[%s4425_s20 + $0x78] sm:$0xff] %v2343_v19  ;;  %v2286_v19 = vld [vmem:[%s3339_s14 + $0x103] sm:$0xff] }
 0x2e3   : > { %2377 = vst [vmem:[%s4425_s20 + $0x68] sm:$0xff] %v2341_v41 }
 0x2ee   : > { %v2741_v63 = vpop.f32.mrb[40].mxu1 }
 0x2ef   : > { %v2186_v31 = vadd.f32 %v2741_v63, %v4414_v45  ;;  %v2177_v23 = vpop.f32.mrb[41].mxu1 }
 0x2f0   : > { %v2178_v34 = vadd.f32 %v4414_v45, %v2177_v23  ;;  %v2742_v13 = vpop.f32.mrb[42].mxu1 }
 0x2f1   : > { %v2310_v25 = vadd.f32 %v2274_v49, %v2186_v31  ;;  %v2189_v8 = vadd.f32 %v2742_v13, %v4414_v45  ;;  %v2180_v6 = vpop.f32.mrb[43].mxu1  ;;  %v2284_v49 = vld [vmem:[%s3339_s14 + $0xf3] sm:$0xff] }
 0x2f2   : > { %v2308_v62 = vadd.f32 %v2272_v15, %v2178_v34  ;;  %v2181_v5 = vadd.f32 %v4414_v45, %v2180_v6  ;;  %v2287_v15 = vld [vmem:[%s3339_s14 + $0x10b] sm:$0xff] }
 0x2f3   : > { %v2346_v48 = vmax.f32 %v2310_v25, 0.0  ;;  %v2311_v27 = vadd.f32 %v2275_v55, %v2189_v8  ;;  %v2285_v25 = vld [vmem:[%s3339_s14 + $0xfb] sm:$0xff] }
 0x2f4   : > { %v2344_v52 = vmax.f32 %v2308_v62, 0.0  ;;  %v2309_v3 = vadd.f32 %v2273_v30, %v2181_v5 }
 0x2f5   : > { %2382 = vst [vmem:[%s4425_s20 + $0x90] sm:$0xff] %v2346_v48  ;;  %v2347_v4 = vmax.f32 %v2311_v27, 0.0 }
 0x2f6   : > { %2380 = vst [vmem:[%s4425_s20 + $0x80] sm:$0xff] %v2344_v52  ;;  %v2345_v59 = vmax.f32 %v2309_v3, 0.0 }
 0x2f7   : > { %2383 = vst [vmem:[%s4425_s20 + $0x98] sm:$0xff] %v2347_v4  ;;  %v2290_v4 = vld [vmem:[%s3339_s14 + $0x123] sm:$0xff] }
 0x2f8   : > { %2381 = vst [vmem:[%s4425_s20 + $0x88] sm:$0xff] %v2345_v59 }
 0x300   : > { %v2745_v12 = vpop.f32.mrb[44].mxu1 }
 0x301   : > { %v2202_v56 = vadd.f32 %v2745_v12, %v4414_v45  ;;  %v2193_v47 = vpop.f32.mrb[45].mxu1 }
 0x302   : > { %v2194_v22 = vadd.f32 %v4414_v45, %v2193_v47  ;;  %v2746_v16 = vpop.f32.mrb[46].mxu1 }
 0x303   : > { %v2314_v33 = vadd.f32 %v2278_v20, %v2202_v56  ;;  %v2205_v21 = vadd.f32 %v2746_v16, %v4414_v45  ;;  %v2196_v40 = vpop.f32.mrb[47].mxu1  ;;  %v2288_v20 = vld [vmem:[%s3339_s14 + $0x113] sm:$0xff] }
 0x304   : > { %v2312_v0 = vadd.f32 %v2276_v43, %v2194_v22  ;;  %v2197_v14 = vadd.f32 %v4414_v45, %v2196_v40  ;;  %v2291_v43 = vld [vmem:[%s3339_s14 + $0x12b] sm:$0xff] }
 0x305   : > { %v2350_v36 = vmax.f32 %v2314_v33, 0.0  ;;  %v2315_v37 = vadd.f32 %v2279_v44, %v2205_v21  ;;  %v2289_v33 = vld [vmem:[%s3339_s14 + $0x11b] sm:$0xff]  ;;  %s3003_s14 = scalar_lea.vmem %s4532_s19, 4608 }
 0x306   : > { %v2348_v28 = vmax.f32 %v2312_v0, 0.0  ;;  %v2313_v58 = vadd.f32 %v2277_v24, %v2197_v14  ;;  %p3004_p10 = scmp.ne.s32.totalorder %s4532_s19, %s3003_s14  ;;  %p3011_p1 = scmp.lt.s32.totalorder %s3009_s1, %s3003_s14 }
 0x307   : > { %2386 = vst [vmem:[%s4425_s20 + $0xb0] sm:$0xff] %v2350_v36  ;;  %v2351_v35 = vmax.f32 %v2315_v37, 0.0 }
 0x308   : > { %2384 = vst [vmem:[%s4425_s20 + $0xa0] sm:$0xff] %v2348_v28  ;;  %v2349_v10 = vmax.f32 %v2313_v58, 0.0  ;;  %p3005_p3 = pnand %p3004_p10, %p3284_p5  ;;  %p3012_p2 = por %p3011_p1, %p3010_p12 }
 0x309   : > { %2387 = vst [vmem:[%s4425_s20 + $0xb8] sm:$0xff] %v2351_v35 }
 0x30a   : > { %2385 = vst [vmem:[%s4425_s20 + $0xa8] sm:$0xff] %v2349_v10  ;;  %p3006_p11 = pneg %p3005_p3 }
 0x30c   : > { %p3013_p4 = pnand %p3012_p2, %p3006_p11 }
 0x313   : > { %v2749_v39 = vpop.f32.mrb[48].mxu1 }
 0x314   : > { %v2218_v42 = vadd.f32 %v2749_v39, %v4414_v45  ;;  %v2209_v2 = vpop.f32.mrb[49].mxu1 }
 0x315   : > { %v2210_v46 = vadd.f32 %v4414_v45, %v2209_v2  ;;  %v2750_v9 = vpop.f32.mrb[50].mxu1 }
 0x316   : > { %v2318_v53 = vadd.f32 %v2282_v1, %v2218_v42  ;;  %v2221_v50 = vadd.f32 %v2750_v9, %v4414_v45  ;;  %v2212_v51 = vpop.f32.mrb[51].mxu1 }
 0x317   : > { %v2316_v18 = vadd.f32 %v2280_v54, %v2210_v46  ;;  %v2213_v38 = vadd.f32 %v4414_v45, %v2212_v51 }
 0x318   : > { %v2354_v32 = vmax.f32 %v2318_v53, 0.0  ;;  %v2319_v17 = vadd.f32 %v2283_v29, %v2221_v50 }
 0x319   : > { %v2352_v26 = vmax.f32 %v2316_v18, 0.0  ;;  %v2317_v61 = vadd.f32 %v2281_v11, %v2213_v38 }
 0x31a   : > { %2390 = vst [vmem:[%s4425_s20 + $0xd0] sm:$0xff] %v2354_v32  ;;  %v2355_v57 = vmax.f32 %v2319_v17, 0.0 }
 0x31b   : > { %2388 = vst [vmem:[%s4425_s20 + $0xc0] sm:$0xff] %v2352_v26  ;;  %v2353_v7 = vmax.f32 %v2317_v61, 0.0 }
 0x31c   : > { %2391 = vst [vmem:[%s4425_s20 + $0xd8] sm:$0xff] %v2355_v57 }
 0x31d   : > { %2389 = vst [vmem:[%s4425_s20 + $0xc8] sm:$0xff] %v2353_v7 }
 0x321   : > { %v2753_v60 = vpop.f32.mrb[52].mxu1 }
 0x322   : > { %v2234_v41 = vadd.f32 %v2753_v60, %v4414_v45  ;;  %v2225_v63 = vpop.f32.mrb[53].mxu1 }
 0x323   : > { %v2226_v31 = vadd.f32 %v4414_v45, %v2225_v63  ;;  %v2754_v23 = vpop.f32.mrb[54].mxu1 }
 0x324   : > { %v2322_v34 = vadd.f32 %v2286_v19, %v2234_v41  ;;  %v2237_v13 = vadd.f32 %v2754_v23, %v4414_v45  ;;  %v2228_v55 = vpop.f32.mrb[55].mxu1 }
 0x325   : > { %v2320_v8 = vadd.f32 %v2284_v49, %v2226_v31  ;;  %v2229_v6 = vadd.f32 %v4414_v45, %v2228_v55 }
 0x326   : > { %v2358_v30 = vmax.f32 %v2322_v34, 0.0  ;;  %v2323_v62 = vadd.f32 %v2287_v15, %v2237_v13 }
 0x327   : > { %v2356_v5 = vmax.f32 %v2320_v8, 0.0  ;;  %v2321_v48 = vadd.f32 %v2285_v25, %v2229_v6 }
 0x328   : > { %2394 = vst [vmem:[%s4425_s20 + $0xf0] sm:$0xff] %v2358_v30  ;;  %v2359_v27 = vmax.f32 %v2323_v62, 0.0 }
 0x329   : > { %2392 = vst [vmem:[%s4425_s20 + $0xe0] sm:$0xff] %v2356_v5  ;;  %v2357_v52 = vmax.f32 %v2321_v48, 0.0 }
 0x32a   : > { %2395 = vst [vmem:[%s4425_s20 + $0xf8] sm:$0xff] %v2359_v27 }
 0x32b   : > { %2393 = vst [vmem:[%s4425_s20 + $0xe8] sm:$0xff] %v2357_v52 }
 0x335   : > { %v2757_v3 = vpop.f32.mrb[56].mxu1 }
 0x336   : > { %v2250_v59 = vadd.f32 %v2757_v3, %v4414_v45  ;;  %v2241_v12 = vpop.f32.mrb[57].mxu1 }
 0x337   : > { %v2242_v56 = vadd.f32 %v4414_v45, %v2241_v12  ;;  %v2758_v47 = vpop.f32.mrb[58].mxu1 }
 0x338   : > { %v2326_v22 = vadd.f32 %v2290_v4, %v2250_v59  ;;  %v2253_v16 = vadd.f32 %v2758_v47, %v4414_v45  ;;  %v2244_v44 = vpop.f32.mrb[59].mxu1 }
 0x339   : > { %v2324_v21 = vadd.f32 %v2288_v20, %v2242_v56  ;;  %v2245_v40 = vadd.f32 %v4414_v45, %v2244_v44 }
 0x33a   : > { %v2362_v24 = vmax.f32 %v2326_v22, 0.0  ;;  %v2327_v0 = vadd.f32 %v2291_v43, %v2253_v16 }
 0x33b   : > { %v2360_v14 = vmax.f32 %v2324_v21, 0.0  ;;  %v2325_v36 = vadd.f32 %v2289_v33, %v2245_v40 }
 0x33c   : > { %2398 = vst [vmem:[%s4425_s20 + $0x110] sm:$0xff] %v2362_v24  ;;  %v2363_v37 = vmax.f32 %v2327_v0, 0.0 }
 0x33d   : > { %2396 = vst [vmem:[%s4425_s20 + $0x100] sm:$0xff] %v2360_v14  ;;  %v2361_v28 = vmax.f32 %v2325_v36, 0.0 }
 0x33e   : > { %2399 = vst [vmem:[%s4425_s20 + $0x118] sm:$0xff] %v2363_v37 }
 0x33f   : > { %2397 = vst [vmem:[%s4425_s20 + $0x108] sm:$0xff] %v2361_v28 }
 0x340   : > { %3016 = shalt.err (!%p3013_p4)
}
 0x341   : > { %s3017_s8 = scalar_lea.hbm %s4529_s15, 4608  ;;  %s3021_s10 = scalar_lea.hbm %s4585_s7, 9216 }
 0x342   : > { %p3018_p9 = scmp.ne.s32.totalorder %s4529_s15, %s3017_s8  ;;  %p3022_p8 = scmp.lt.u32.totalorder %s4529_s15, %s4585_s7 }
 0x343   : > { %p3023_p13 = scmp.lt.u32.totalorder %s3021_s10, %s3017_s8  ;;  %p3025_p10 = scmp.lt.u32.totalorder %s3017_s8, %s4529_s15 }
 0x344   : > { %p3019_p0 = pnand %p3018_p9, %p3284_p5 }
 0x345   : > { %p3024_p6 = por %p3023_p13, %p3022_p8 }
 0x346   : > { %p3020_p7 = pneg %p3019_p0 }
 0x347   : > { %p3026_p3 = por %p3025_p10, %p3024_p6 }
 0x349   : > { %p3027_p11 = pnand %p3026_p3, %p3020_p7 }
 0x34b   : > { %3030 = shalt.err (!%p3027_p11)
}
 0x34c   : > { %s3091_s22 = smov 128   ;;  %s3092_s30 = smov 8  }
 0x34d   : > { %2792 = dma.vmem_to_hbm [thread:$0]  (%p3284_p5), %s4532_s19, 4608, %s4529_s15, %s2401_s28, %s3091_s22, %s3091_s22, %s3092_s30  }
 0x34e PF: > { %s4651_s9 = sld [smem:[#allocation16_spill]]  ;;  %s2429_s14 = sand.u32 1, %s3065_s24  }
 0x34f   : > { %p4653_p1 = scmp.ge.s32.totalorder %s3077_s27, 2  ;;  %s2430_s11 = scalar_lea.sflag [#allocation5], %s2429_s14 }
 0x354   : > { %p4652_p12 = scmp.ne.s32.totalorder %s4651_s9, 0 }
 0x356   : > { %p2809_p2 = pnand %p4653_p1, %p4652_p12 }
 0x358   : > { %3060 = dma.done.wait (!%p2809_p2), %s2430_s11, 4608  }
 0x359   : > { %3062 = vsyncadd (!%p2809_p2), %s2430_s11, 4294962688  ;;  %p22_p4 = scmp.ge.s32.totalorder %s3249_s21, 4   ;;  %s4654_s24 = smov %s3069_s25 }
 0x35a   : > { %s4655_s25 = smov %s3073_s26  ;;  %s4656_s26 = smov %s3280_s16 }
 0x35b   : > { %s4657_s27 = smov %s3249_s21  ;;  %24 = sbr.rel (!%p22_p4) target bundleno = 9 (0x9), region = 105 }
 0x362   :  { %2435 = vsyncpa [#allocation4], 1 }
 0x363   :  { %2437 = vsyncpa [#allocation4 + $0x1], 1 }
 0x364   :  { %2438 = vsyncpa [#allocation7], 1 }
 0x365   :  { %2439 = vsyncpa [#allocation10], 1 }
 0x366   :  { %2440 = vsyncpa [#allocation5], 1 }
 0x367   :  { %2442 = vsyncpa [#allocation5 + $0x1], 1 }

</bundles_post_ra>
